<compile_context>
chip_gen: v6e
topology: v6e:2x2x1
jax: 0.10.0
libtpu: 0.0.40
codegen_flags: <defaults>
</compile_context>

<pallas_src>
import jax
import jax.numpy as jnp
import numpy as np
from jax.experimental import pallas as pl
from jax.experimental.pallas import tpu as pltpu

BN_EPS = 1e-5
LANE = 128
SUBLANE = 8
VMEM_LIMIT_BYTES = 32 * 1024 * 1024


def _round_up(v, m):
    return (v + m - 1) // m * m


# ----------------------------------------------------------------------------
# Kernel A: fused stride-1 3x3 conv (+BN bias) (+residual) (+ReLU)
#   The 3x3 conv is computed as 9 shifted matmuls over the flattened padded image
#   (no im2col tensor in HBM).  Grid = (batch, Cout/128); both axes "parallel".
# ----------------------------------------------------------------------------
def _make_conv3x3_kernel(wp, l_out, apply_relu, has_residual):
    def kernel(x_ref, w_ref, b_ref, *rest):
        if has_residual:
            r_ref, o_ref = rest
        else:
            (o_ref,) = rest
        cout_t = o_ref.shape[-1]
        acc = jnp.zeros((l_out, cout_t), jnp.float32)
        for kh in range(3):
            for kw in range(3):
                off = kh * wp + kw                       # static tap offset
                lhs = x_ref[0, pl.ds(off, l_out), :]      # (l_out, Cin_p) bf16
                acc = acc + jnp.dot(lhs, w_ref[kh * 3 + kw],
                                    preferred_element_type=jnp.float32)
        y = acc + b_ref[...]                              # (1, Cout_t) f32 broadcast
        if has_residual:
            y = y + r_ref[0].astype(jnp.float32)
        if apply_relu:
            y = jnp.maximum(y, 0.0)
        o_ref[0] = y.astype(o_ref.dtype)
    return kernel


def conv3x3_s1_bn(x, w_taps, bias, residual=None, relu=True):
    """x: (N,H,W,Cin_p) bf16; w_taps: (9,Cin_p,Cout_p) bf16 (BN-scale folded);
       bias: (1,Cout_p) f32; residual: (N,H,W,Cout_p) bf16 or None.
       Returns (N,H,W,Cout_p) bf16 (stride 1, pad 1)."""
    n, h, w_, cin_p = x.shape
    cout_p = w_taps.shape[-1]
    ho, wo = h, w_
    hp, wp = h + 2, w_ + 2
    l_out = _round_up(ho * wp, SUBLANE)
    flat = hp * wp + 2 * SUBLANE                          # slack so every tap slice is in-bounds

    xp = jnp.pad(x, ((0, 0), (1, 1), (1, 1), (0, 0))).reshape(n, hp * wp, cin_p)
    xp = jnp.pad(xp, ((0, 0), (0, flat - hp * wp), (0, 0)))

    inputs = [xp, w_taps, bias]
    in_specs = [
        pl.BlockSpec((1, flat, cin_p), lambda b, c: (b, 0, 0)),
        pl.BlockSpec((9, cin_p, LANE), lambda b, c: (0, 0, c)),
        pl.BlockSpec((1, LANE), lambda b, c: (0, c)),
    ]
    if residual is not None:
        # Scatter the residual into the same "padded-row" layout the kernel produces.
        r = jnp.pad(residual, ((0, 0), (0, 0), (0, wp - wo), (0, 0)))
        r = r.reshape(n, ho * wp, cout_p)
        r = jnp.pad(r, ((0, 0), (0, l_out - ho * wp), (0, 0)))
        inputs.append(r)
        in_specs.append(pl.BlockSpec((1, l_out, LANE), lambda b, c: (b, 0, c)))

    kernel = _make_conv3x3_kernel(wp, l_out, relu, residual is not None)
    flops = 2 * n * ho * wo * 9 * cin_p * cout_p
    bytes_accessed = (xp.size * 2 + w_taps.size * 2 + bias.size * 4
                      + (0 if residual is None else residual.size * 2)
                      + n * l_out * cout_p * 2)

    out = pl.pallas_call(
        kernel,
        out_shape=jax.ShapeDtypeStruct((n, l_out, cout_p), jnp.bfloat16),
        grid=(n, cout_p // LANE),
        in_specs=in_specs,
        out_specs=pl.BlockSpec((1, l_out, LANE), lambda b, c: (b, 0, c)),
        compiler_params=pltpu.CompilerParams(
            dimension_semantics=("parallel", "parallel"),
            vmem_limit_bytes=VMEM_LIMIT_BYTES),
        cost_estimate=pl.CostEstimate(flops=flops, transcendentals=0,
                                      bytes_accessed=bytes_accessed),
    )(*inputs)

    # Drop junk columns (padded-row layout) -> (N, Ho, Wo, Cout_p)
    out = out[:, :ho * wp, :].reshape(n, ho, wp, cout_p)[:, :, :wo, :]
    return out


# ----------------------------------------------------------------------------
# Kernel B: tiled fused matmul (+BN bias) (+ReLU) for the strided conv1 (im2col)
#           and the 1x1 shortcut.  Grid = (M/TM, Cout/128); both axes "parallel".
# ----------------------------------------------------------------------------
def _make_matmul_kernel(apply_relu):
    def kernel(p_ref, w_ref, b_ref, o_ref):
        acc = jnp.dot(p_ref[...], w_ref[...], preferred_element_type=jnp.float32)
        y = acc + b_ref[...]
        if apply_relu:
            y = jnp.maximum(y, 0.0)
        o_ref[...] = y.astype(o_ref.dtype)
    return kernel


def matmul_bn(lhs, w_mat, bias, relu=True):
    """lhs: (M, K) bf16; w_mat: (K, Cout_p) bf16 (BN-scale folded); bias: (1, Cout_p) f32."""
    m, k = lhs.shape
    cout_p = w_mat.shape[-1]
    tm = 256 if m >= 256 else _round_up(m, SUBLANE)
    mp = _round_up(m, tm)
    if mp != m:
        lhs = jnp.pad(lhs, ((0, mp - m), (0, 0)))

    flops = 2 * mp * k * cout_p
    bytes_accessed = lhs.size * 2 + w_mat.size * 2 + bias.size * 4 + mp * cout_p * 2

    out = pl.pallas_call(
        _make_matmul_kernel(relu),
        out_shape=jax.ShapeDtypeStruct((mp, cout_p), jnp.bfloat16),
        grid=(mp // tm, cout_p // LANE),
        in_specs=[
            pl.BlockSpec((tm, k), lambda i, j: (i, 0)),
            pl.BlockSpec((k, LANE), lambda i, j: (0, j)),
            pl.BlockSpec((1, LANE), lambda i, j: (0, j)),
        ],
        out_specs=pl.BlockSpec((tm, LANE), lambda i, j: (i, j)),
        compiler_params=pltpu.CompilerParams(
            dimension_semantics=("parallel", "parallel"),
            vmem_limit_bytes=VMEM_LIMIT_BYTES),
        cost_estimate=pl.CostEstimate(flops=flops, transcendentals=0,
                                      bytes_accessed=bytes_accessed),
    )(lhs, w_mat, bias)
    return out[:m]


# ----------------------------------------------------------------------------
# Wrapper glue: im2col (only for the strided conv1), BN folding, weight packing
# ----------------------------------------------------------------------------
def im2col_3x3(x, stride):
    """x: (N,H,W,C) -> (N*Ho*Wo, 9*C), tap order (kh, kw, c)."""
    n, h, w_, c = x.shape
    ho = (h + 2 - 3) // stride + 1
    wo = (w_ + 2 - 3) // stride + 1
    xp = jnp.pad(x, ((0, 0), (1, 1), (1, 1), (0, 0)))
    cols = []
    for kh in range(3):
        for kw in range(3):
            cols.append(xp[:, kh:kh + (ho - 1) * stride + 1:stride,
                           kw:kw + (wo - 1) * stride + 1:stride, :])
    patches = jnp.stack(cols, axis=3).reshape(n * ho * wo, 9 * c)
    return patches, (n, ho, wo)


def bn_fold(channels):
    """PyTorch default-init eval-mode BN (gamma=1, beta=0, mean=0, var=1) -> scale, bias."""
    scale = jnp.full((channels,), 1.0 / np.sqrt(1.0 + BN_EPS), jnp.float32)
    bias = jnp.zeros((channels,), jnp.float32)
    return scale, bias


def pack_conv3x3(w_oihw, bn_scale, cin_p, cout_p):
    """(Cout,Cin,3,3) -> taps (9,Cin_p,Cout_p) bf16 and mat (9*Cin_p,Cout_p) bf16 (scale folded)."""
    cout, cin = w_oihw.shape[0], w_oihw.shape[1]
    wf = w_oihw * bn_scale[:, None, None, None]
    wf = jnp.pad(wf, ((0, cout_p - cout), (0, cin_p - cin), (0, 0), (0, 0)))
    taps = jnp.transpose(wf, (2, 3, 1, 0)).reshape(9, cin_p, cout_p).astype(jnp.bfloat16)
    return taps, taps.reshape(9 * cin_p, cout_p)


def pack_conv1x1(w_oi11, bn_scale, cin_p, cout_p):
    cout, cin = w_oi11.shape[0], w_oi11.shape[1]
    wf = w_oi11[:, :, 0, 0] * bn_scale[:, None]
    wf = jnp.pad(wf, ((0, cout_p - cout), (0, cin_p - cin)))
    return jnp.transpose(wf).astype(jnp.bfloat16)          # (Cin_p, Cout_p)


def pad_bias(b, cout_p):
    return jnp.pad(b, (0, cout_p - b.shape[0])).reshape(1, cout_p).astype(jnp.float32)


def prepare_block(blk):
    cin, cout, s = blk["cin"], blk["cout"], blk["stride"]
    cin_p, cout_p = _round_up(cin, LANE), _round_up(cout, LANE)
    s1, b1 = blk["bn1"]
    s2, b2 = blk["bn2"]
    w1_taps, w1_mat = pack_conv3x3(blk["w1"], s1, cin_p, cout_p)
    w2_taps, _ = pack_conv3x3(blk["w2"], s2, cout_p, cout_p)
    p = {"stride": s, "cin": cin, "cout": cout, "cin_p": cin_p, "cout_p": cout_p,
         "w1_taps": w1_taps, "w1_mat": w1_mat, "b1": pad_bias(b1, cout_p),
         "w2_taps": w2_taps, "b2": pad_bias(b2, cout_p), "shortcut": None}
    if blk["shortcut"] is not None:
        ss, bs = blk["shortcut"]["bn"]
        p["shortcut"] = {"w_mat": pack_conv1x1(blk["shortcut"]["w"], ss, cin_p, cout_p),
                         "b": pad_bias(bs, cout_p)}
    return p


# ----------------------------------------------------------------------------
# BasicBlock + ResBlockLayer forward built from the Pallas kernels
# ----------------------------------------------------------------------------
def basic_block_forward(x, p):
    """x: (N, H, W, cin_p) bf16 (channel-padded)."""
    n, h, w_, _ = x.shape
    s = p["stride"]
    cout_p = p["cout_p"]

    # conv1 + bn1 + relu
    if s == 1:
        out = conv3x3_s1_bn(x, p["w1_taps"], p["b1"], residual=None, relu=True)
        ho, wo = h, w_
    else:
        # TODO(synk): the strided 3x3 conv still builds im2col patches in the wrapper;
        # it could be moved in-kernel via a 4-phase decomposition of the padded input.
        patches, (_, ho, wo) = im2col_3x3(x, s)
        out = matmul_bn(patches, p["w1_mat"], p["b1"], relu=True).reshape(n, ho, wo, cout_p)

    # shortcut (1x1 conv + BN, or identity)
    if p["shortcut"] is not None:
        xs = x[:, ::s, ::s, :].reshape(n * ho * wo, x.shape[-1])
        sc = matmul_bn(xs, p["shortcut"]["w_mat"], p["shortcut"]["b"],
                       relu=False).reshape(n, ho, wo, cout_p)
    else:
        sc = x

    # conv2 + bn2 + residual add + relu, fully fused in one kernel
    # TODO(synk): conv1 and conv2 could be fused into a single pallas_call keeping the
    # intermediate tile in VMEM; kept as two calls with bf16 intermediates for now.
    return conv3x3_s1_bn(out, p["w2_taps"], p["b2"], residual=sc, relu=True)


def res_block_layer_forward(x_nhwc, prepared_blocks):
    cin, cin_p = prepared_blocks[0]["cin"], prepared_blocks[0]["cin_p"]
    x = jnp.pad(x_nhwc, ((0, 0), (0, 0), (0, 0), (0, cin_p - cin))).astype(jnp.bfloat16)
    for p in prepared_blocks:
        x = basic_block_forward(x, p)
    cout = prepared_blocks[-1]["cout"]
    return x[..., :cout].astype(jnp.float32)


def make_res_block_layer_params(key, planes, num_blocks, stride, in_planes):
    """Mirrors ResBlockLayer._make_layer with BasicBlock (expansion = 1)."""
    strides = [stride] + [1] * (num_blocks - 1)
    blocks = []
    cin = in_planes
    for s in strides:
        key, k1, k2, k3 = jax.random.split(key, 4)
        blk = {"stride": s, "cin": cin, "cout": planes,
               "w1": 0.1 * jax.random.normal(k1, (planes, cin, 3, 3), jnp.float32),
               "w2": 0.1 * jax.random.normal(k2, (planes, planes, 3, 3), jnp.float32),
               "bn1": bn_fold(planes), "bn2": bn_fold(planes), "shortcut": None}
        if s != 1 or cin != planes:
            blk["shortcut"] = {"w": 0.1 * jax.random.normal(k3, (planes, cin, 1, 1), jnp.float32),
                               "bn": bn_fold(planes)}
        blocks.append(blk)
        cin = planes
    return blocks


# ----------------------------------------------------------------------------
# Pure-JAX reference (XLA convs, bf16 operands / f32 accumulate to match kernels)
# ----------------------------------------------------------------------------
def _ref_conv_bn(x, w_oihw, scale, bias, stride, pad):
    wf = (w_oihw * scale[:, None, None, None]).astype(jnp.bfloat16)
    w_hwio = jnp.transpose(wf, (2, 3, 1, 0))
    y = jax.lax.conv_general_dilated(
        x.astype(jnp.bfloat16), w_hwio, (stride, stride), [(pad, pad), (pad, pad)],
        dimension_numbers=("NHWC", "HWIO", "NHWC"),
        preferred_element_type=jnp.float32)
    return y + bias


def ref_forward(x, blocks):
    for blk in blocks:
        s = blk["stride"]
        s1, b1 = blk["bn1"]
        s2, b2 = blk["bn2"]
        out = jax.nn.relu(_ref_conv_bn(x, blk["w1"], s1, b1, s, 1))
        out = _ref_conv_bn(out, blk["w2"], s2, b2, 1, 1)
        if blk["shortcut"] is not None:
            ss, bs = blk["shortcut"]["bn"]
            sc = _ref_conv_bn(x, blk["shortcut"]["w"], ss, bs, s, 0)
        else:
            sc = x
        x = jax.nn.relu(out + sc)
    return x


# ----------------------------------------------------------------------------
if __name__ == "__main__":
    key = jax.random.PRNGKey(0)
    key, kx, kp = jax.random.split(key, 3)

    # ResBlockLayer(BasicBlock, planes=8, num_blocks=2, stride=2, in_planes=4)
    N, Cin, H, W = 2, 4, 16, 16
    planes, num_blocks, stride = 8, 2, 2

    x_nchw = jax.random.normal(kx, (N, Cin, H, W), jnp.float32)      # PyTorch layout
    blocks = make_res_block_layer_params(kp, planes, num_blocks, stride, in_planes=Cin)
    prepared = [prepare_block(b) for b in blocks]

    x_nhwc = jnp.transpose(x_nchw, (0, 2, 3, 1))

    @jax.jit
    def run(x):
        return res_block_layer_forward(x, prepared)

    out_nhwc = run(x_nhwc)
    out_nchw = jnp.transpose(out_nhwc, (0, 3, 1, 2))
    out_nchw = jax.block_until_ready(out_nchw)

    assert out_nchw.shape == (N, planes, H // stride, W // stride), out_nchw.shape

    ref = jnp.transpose(ref_forward(x_nhwc, blocks), (0, 3, 1, 2))
    np.testing.assert_allclose(np.asarray(out_nchw), np.asarray(ref),
                               rtol=2e-2, atol=2e-2)
    print("KERNEL_OK")
</pallas_src>

<mosaic_0001>
module attributes {stable_mosaic.version = 11 : i64} {
  func.func @kernel(%arg0: i32, %arg1: i32, %arg2: memref<128x128xbf16, #tpu.memory_space<vmem>>, %arg3: memref<128x128xbf16, #tpu.memory_space<vmem>>, %arg4: memref<1x128xf32, #tpu.memory_space<vmem>>, %arg5: memref<128x128xbf16, #tpu.memory_space<vmem>>) attributes {dimension_semantics = [#tpu.dimension_semantics<parallel>, #tpu.dimension_semantics<parallel>], iteration_bounds = array<i64: 1, 1>, scalar_prefetch = 0 : i64, scratch_operands = 0 : i64, tpu.core_type = #tpu.core_type<tc>, window_params = [{transform_indices = @transform_0, window_bounds = array<i64: 128, 128>}, {transform_indices = @transform_1, window_bounds = array<i64: 128, 128>}, {transform_indices = @transform_2, window_bounds = array<i64: 1, 128>}, {transform_indices = @transform_3, window_bounds = array<i64: 128, 128>}]} {
    %c0 = arith.constant 0 : index
    %c0_0 = arith.constant 0 : index
    %0 = vector.load %arg2[%c0, %c0_0] : memref<128x128xbf16, #tpu.memory_space<vmem>>, vector<128x128xbf16>
    %c0_1 = arith.constant 0 : index
    %c0_2 = arith.constant 0 : index
    %1 = vector.load %arg3[%c0_1, %c0_2] : memref<128x128xbf16, #tpu.memory_space<vmem>>, vector<128x128xbf16>
    %cst = arith.constant dense<0.000000e+00> : vector<128x128xf32>
    %2 = tpu.matmul %0, %1, %cst {dimension_numbers = #tpu.dot_dimension_numbers<[1], [0], [0], [1], [0, 0, 1, 1], [], []>} : vector<128x128xbf16>, vector<128x128xbf16>, vector<128x128xf32> -> vector<128x128xf32>
    %c0_3 = arith.constant 0 : index
    %c0_4 = arith.constant 0 : index
    %3 = vector.load %arg4[%c0_3, %c0_4] : memref<1x128xf32, #tpu.memory_space<vmem>>, vector<1x128xf32>
    %4 = vector.broadcast %3 : vector<1x128xf32> to vector<128x128xf32>
    %5 = arith.addf %2, %4 : vector<128x128xf32>
    %6 = arith.truncf %5 : vector<128x128xf32> to vector<128x128xbf16>
    %c0_5 = arith.constant 0 : index
    %c0_6 = arith.constant 0 : index
    %7 = vector.load %arg5[%c0_5, %c0_6] : memref<128x128xbf16, #tpu.memory_space<vmem>>, vector<128x128xbf16>
    tpu.vector_store %arg5[%c0_5, %c0_6], %6 {strides = array<i32>} : memref<128x128xbf16, #tpu.memory_space<vmem>>, vector<128x128xbf16>,
    return
  }
  func.func @transform_0(%arg0: i32, %arg1: i32) -> (i32, i32) {
    %c0_i32 = arith.constant 0 : i32
    %c0_i32_0 = arith.constant 0 : i32
    return %arg0, %c0_i32 : i32, i32
  }
  func.func @transform_1(%arg0: i32, %arg1: i32) -> (i32, i32) {
    %c0_i32 = arith.constant 0 : i32
    %c0_i32_0 = arith.constant 0 : i32
    return %c0_i32, %arg1 : i32, i32
  }
  func.func @transform_2(%arg0: i32, %arg1: i32) -> (i32, i32) {
    %c0_i32 = arith.constant 0 : i32
    %c0_i32_0 = arith.constant 0 : i32
    return %c0_i32, %arg1 : i32, i32
  }
  func.func @transform_3(%arg0: i32, %arg1: i32) -> (i32, i32) {
    %c0_i32 = arith.constant 0 : i32
    return %arg0, %arg1 : i32, i32
  }
}

module attributes {stable_mosaic.version = 11 : i64} {
  func.func @kernel(%arg0: i32, %arg1: i32, %arg2: memref<128x1152xbf16, #tpu.memory_space<vmem>>, %arg3: memref<1152x128xbf16, #tpu.memory_space<vmem>>, %arg4: memref<1x128xf32, #tpu.memory_space<vmem>>, %arg5: memref<128x128xbf16, #tpu.memory_space<vmem>>) attributes {dimension_semantics = [#tpu.dimension_semantics<parallel>, #tpu.dimension_semantics<parallel>], iteration_bounds = array<i64: 1, 1>, scalar_prefetch = 0 : i64, scratch_operands = 0 : i64, tpu.core_type = #tpu.core_type<tc>, window_params = [{transform_indices = @transform_0, window_bounds = array<i64: 128, 1152>}, {transform_indices = @transform_1, window_bounds = array<i64: 1152, 128>}, {transform_indices = @transform_2, window_bounds = array<i64: 1, 128>}, {transform_indices = @transform_3, window_bounds = array<i64: 128, 128>}]} {
    %c0 = arith.constant 0 : index
    %c0_0 = arith.constant 0 : index
    %0 = vector.load %arg2[%c0, %c0_0] : memref<128x1152xbf16, #tpu.memory_space<vmem>>, vector<128x1152xbf16>
    %c0_1 = arith.constant 0 : index
    %c0_2 = arith.constant 0 : index
    %1 = vector.load %arg3[%c0_1, %c0_2] : memref<1152x128xbf16, #tpu.memory_space<vmem>>, vector<1152x128xbf16>
    %cst = arith.constant dense<0.000000e+00> : vector<128x128xf32>
    %2 = tpu.matmul %0, %1, %cst {dimension_numbers = #tpu.dot_dimension_numbers<[1], [0], [0], [1], [0, 0, 1, 1], [], []>} : vector<128x1152xbf16>, vector<1152x128xbf16>, vector<128x128xf32> -> vector<128x128xf32>
    %c0_3 = arith.constant 0 : index
    %c0_4 = arith.constant 0 : index
    %3 = vector.load %arg4[%c0_3, %c0_4] : memref<1x128xf32, #tpu.memory_space<vmem>>, vector<1x128xf32>
    %4 = vector.broadcast %3 : vector<1x128xf32> to vector<128x128xf32>
    %5 = arith.addf %2, %4 : vector<128x128xf32>
    %cst_5 = arith.constant 0.000000e+00 : f32
    %6 = vector.broadcast %cst_5 : f32 to vector<128x128xf32>
    %7 = arith.maximumf %5, %6 : vector<128x128xf32>
    %8 = arith.truncf %7 : vector<128x128xf32> to vector<128x128xbf16>
    %c0_6 = arith.constant 0 : index
    %c0_7 = arith.constant 0 : index
    %9 = vector.load %arg5[%c0_6, %c0_7] : memref<128x128xbf16, #tpu.memory_space<vmem>>, vector<128x128xbf16>
    tpu.vector_store %arg5[%c0_6, %c0_7], %8 {strides = array<i32>} : memref<128x128xbf16, #tpu.memory_space<vmem>>, vector<128x128xbf16>,
    return
  }
  func.func @transform_0(%arg0: i32, %arg1: i32) -> (i32, i32) {
    %c0_i32 = arith.constant 0 : i32
    %c0_i32_0 = arith.constant 0 : i32
    return %arg0, %c0_i32 : i32, i32
  }
  func.func @transform_1(%arg0: i32, %arg1: i32) -> (i32, i32) {
    %c0_i32 = arith.constant 0 : i32
    %c0_i32_0 = arith.constant 0 : i32
    return %c0_i32, %arg1 : i32, i32
  }
  func.func @transform_2(%arg0: i32, %arg1: i32) -> (i32, i32) {
    %c0_i32 = arith.constant 0 : i32
    %c0_i32_0 = arith.constant 0 : i32
    return %c0_i32, %arg1 : i32, i32
  }
  func.func @transform_3(%arg0: i32, %arg1: i32) -> (i32, i32) {
    %c0_i32 = arith.constant 0 : i32
    return %arg0, %arg1 : i32, i32
  }
}

module attributes {stable_mosaic.version = 11 : i64} {
  func.func @kernel(%arg0: i32, %arg1: i32, %arg2: memref<1x116x128xbf16, #tpu.memory_space<vmem>>, %arg3: memref<9x128x128xbf16, #tpu.memory_space<vmem>>, %arg4: memref<1x128xf32, #tpu.memory_space<vmem>>, %arg5: memref<1x80x128xbf16, #tpu.memory_space<vmem>>, %arg6: memref<1x80x128xbf16, #tpu.memory_space<vmem>>) attributes {dimension_semantics = [#tpu.dimension_semantics<parallel>, #tpu.dimension_semantics<parallel>], iteration_bounds = array<i64: 2, 1>, scalar_prefetch = 0 : i64, scratch_operands = 0 : i64, tpu.core_type = #tpu.core_type<tc>, window_params = [{transform_indices = @transform_0, window_bounds = array<i64: 1, 116, 128>}, {transform_indices = @transform_1, window_bounds = array<i64: 9, 128, 128>}, {transform_indices = @transform_2, window_bounds = array<i64: 1, 128>}, {transform_indices = @transform_3, window_bounds = array<i64: 1, 80, 128>}, {transform_indices = @transform_4, window_bounds = array<i64: 1, 80, 128>}]} {
    %cst = arith.constant 0.000000e+00 : f32
    %0 = vector.broadcast %cst : f32 to vector<80x128xf32>
    %c0 = arith.constant 0 : index
    %c0_0 = arith.constant 0 : index
    %c0_1 = arith.constant 0 : index
    %1 = vector.load %arg2[%c0, %c0_0, %c0_1] : memref<1x116x128xbf16, #tpu.memory_space<vmem>>, vector<1x80x128xbf16>
    %2 = vector.shape_cast %1 : vector<1x80x128xbf16> to vector<80x128xbf16>
    %c0_2 = arith.constant 0 : index
    %c0_3 = arith.constant 0 : index
    %c0_4 = arith.constant 0 : index
    %3 = vector.load %arg3[%c0_2, %c0_3, %c0_4] : memref<9x128x128xbf16, #tpu.memory_space<vmem>>, vector<1x128x128xbf16>
    %4 = vector.shape_cast %3 : vector<1x128x128xbf16> to vector<128x128xbf16>
    %cst_5 = arith.constant dense<0.000000e+00> : vector<80x128xf32>
    %5 = tpu.matmul %2, %4, %cst_5 {dimension_numbers = #tpu.dot_dimension_numbers<[1], [0], [0], [1], [0, 0, 1, 1], [], []>} : vector<80x128xbf16>, vector<128x128xbf16>, vector<80x128xf32> -> vector<80x128xf32>
    %6 = arith.addf %0, %5 : vector<80x128xf32>
    %c0_6 = arith.constant 0 : index
    %c1 = arith.constant 1 : index
    %c0_7 = arith.constant 0 : index
    %7 = vector.load %arg2[%c0_6, %c1, %c0_7] : memref<1x116x128xbf16, #tpu.memory_space<vmem>>, vector<1x80x128xbf16>
    %8 = vector.shape_cast %7 : vector<1x80x128xbf16> to vector<80x128xbf16>
    %c1_8 = arith.constant 1 : index
    %c0_9 = arith.constant 0 : index
    %c0_10 = arith.constant 0 : index
    %9 = vector.load %arg3[%c1_8, %c0_9, %c0_10] : memref<9x128x128xbf16, #tpu.memory_space<vmem>>, vector<1x128x128xbf16>
    %10 = vector.shape_cast %9 : vector<1x128x128xbf16> to vector<128x128xbf16>
    %cst_11 = arith.constant dense<0.000000e+00> : vector<80x128xf32>
    %11 = tpu.matmul %8, %10, %cst_11 {dimension_numbers = #tpu.dot_dimension_numbers<[1], [0], [0], [1], [0, 0, 1, 1], [], []>} : vector<80x128xbf16>, vector<128x128xbf16>, vector<80x128xf32> -> vector<80x128xf32>
    %12 = arith.addf %6, %11 : vector<80x128xf32>
    %c0_12 = arith.constant 0 : index
    %c2 = arith.constant 2 : index
    %c0_13 = arith.constant 0 : index
    %13 = vector.load %arg2[%c0_12, %c2, %c0_13] : memref<1x116x128xbf16, #tpu.memory_space<vmem>>, vector<1x80x128xbf16>
    %14 = vector.shape_cast %13 : vector<1x80x128xbf16> to vector<80x128xbf16>
    %c2_14 = arith.constant 2 : index
    %c0_15 = arith.constant 0 : index
    %c0_16 = arith.constant 0 : index
    %15 = vector.load %arg3[%c2_14, %c0_15, %c0_16] : memref<9x128x128xbf16, #tpu.memory_space<vmem>>, vector<1x128x128xbf16>
    %16 = vector.shape_cast %15 : vector<1x128x128xbf16> to vector<128x128xbf16>
    %cst_17 = arith.constant dense<0.000000e+00> : vector<80x128xf32>
    %17 = tpu.matmul %14, %16, %cst_17 {dimension_numbers = #tpu.dot_dimension_numbers<[1], [0], [0], [1], [0, 0, 1, 1], [], []>} : vector<80x128xbf16>, vector<128x128xbf16>, vector<80x128xf32> -> vector<80x128xf32>
    %18 = arith.addf %12, %17 : vector<80x128xf32>
    %c0_18 = arith.constant 0 : index
    %c10 = arith.constant 10 : index
    %c0_19 = arith.constant 0 : index
    %19 = vector.load %arg2[%c0_18, %c10, %c0_19] : memref<1x116x128xbf16, #tpu.memory_space<vmem>>, vector<1x80x128xbf16>
    %20 = vector.shape_cast %19 : vector<1x80x128xbf16> to vector<80x128xbf16>
    %c3 = arith.constant 3 : index
    %c0_20 = arith.constant 0 : index
    %c0_21 = arith.constant 0 : index
    %21 = vector.load %arg3[%c3, %c0_20, %c0_21] : memref<9x128x128xbf16, #tpu.memory_space<vmem>>, vector<1x128x128xbf16>
    %22 = vector.shape_cast %21 : vector<1x128x128xbf16> to vector<128x128xbf16>
    %cst_22 = arith.constant dense<0.000000e+00> : vector<80x128xf32>
    %23 = tpu.matmul %20, %22, %cst_22 {dimension_numbers = #tpu.dot_dimension_numbers<[1], [0], [0], [1], [0, 0, 1, 1], [], []>} : vector<80x128xbf16>, vector<128x128xbf16>, vector<80x128xf32> -> vector<80x128xf32>
    %24 = arith.addf %18, %23 : vector<80x128xf32>
    %c0_23 = arith.constant 0 : index
    %c11 = arith.constant 11 : index
    %c0_24 = arith.constant 0 : index
    %25 = vector.load %arg2[%c0_23, %c11, %c0_24] : memref<1x116x128xbf16, #tpu.memory_space<vmem>>, vector<1x80x128xbf16>
    %26 = vector.shape_cast %25 : vector<1x80x128xbf16> to vector<80x128xbf16>
    %c4 = arith.constant 4 : index
    %c0_25 = arith.constant 0 : index
    %c0_26 = arith.constant 0 : index
    %27 = vector.load %arg3[%c4, %c0_25, %c0_26] : memref<9x128x128xbf16, #tpu.memory_space<vmem>>, vector<1x128x128xbf16>
    %28 = vector.shape_cast %27 : vector<1x128x128xbf16> to vector<128x128xbf16>
    %cst_27 = arith.constant dense<0.000000e+00> : vector<80x128xf32>
    %29 = tpu.matmul %26, %28, %cst_27 {dimension_numbers = #tpu.dot_dimension_numbers<[1], [0], [0], [1], [0, 0, 1, 1], [], []>} : vector<80x128xbf16>, vector<128x128xbf16>, vector<80x128xf32> -> vector<80x128xf32>
    %30 = arith.addf %24, %29 : vector<80x128xf32>
    %c0_28 = arith.constant 0 : index
    %c12 = arith.constant 12 : index
    %c0_29 = arith.constant 0 : index
    %31 = vector.load %arg2[%c0_28, %c12, %c0_29] : memref<1x116x128xbf16, #tpu.memory_space<vmem>>, vector<1x80x128xbf16>
    %32 = vector.shape_cast %31 : vector<1x80x128xbf16> to vector<80x128xbf16>
    %c5 = arith.constant 5 : index
    %c0_30 = arith.constant 0 : index
    %c0_31 = arith.constant 0 : index
    %33 = vector.load %arg3[%c5, %c0_30, %c0_31] : memref<9x128x128xbf16, #tpu.memory_space<vmem>>, vector<1x128x128xbf16>
    %34 = vector.shape_cast %33 : vector<1x128x128xbf16> to vector<128x128xbf16>
    %cst_32 = arith.constant dense<0.000000e+00> : vector<80x128xf32>
    %35 = tpu.matmul %32, %34, %cst_32 {dimension_numbers = #tpu.dot_dimension_numbers<[1], [0], [0], [1], [0, 0, 1, 1], [], []>} : vector<80x128xbf16>, vector<128x128xbf16>, vector<80x128xf32> -> vector<80x128xf32>
    %36 = arith.addf %30, %35 : vector<80x128xf32>
    %c0_33 = arith.constant 0 : index
    %c20 = arith.constant 20 : index
    %c0_34 = arith.constant 0 : index
    %37 = vector.load %arg2[%c0_33, %c20, %c0_34] : memref<1x116x128xbf16, #tpu.memory_space<vmem>>, vector<1x80x128xbf16>
    %38 = vector.shape_cast %37 : vector<1x80x128xbf16> to vector<80x128xbf16>
    %c6 = arith.constant 6 : index
    %c0_35 = arith.constant 0 : index
    %c0_36 = arith.constant 0 : index
    %39 = vector.load %arg3[%c6, %c0_35, %c0_36] : memref<9x128x128xbf16, #tpu.memory_space<vmem>>, vector<1x128x128xbf16>
    %40 = vector.shape_cast %39 : vector<1x128x128xbf16> to vector<128x128xbf16>
    %cst_37 = arith.constant dense<0.000000e+00> : vector<80x128xf32>
    %41 = tpu.matmul %38, %40, %cst_37 {dimension_numbers = #tpu.dot_dimension_numbers<[1], [0], [0], [1], [0, 0, 1, 1], [], []>} : vector<80x128xbf16>, vector<128x128xbf16>, vector<80x128xf32> -> vector<80x128xf32>
    %42 = arith.addf %36, %41 : vector<80x128xf32>
    %c0_38 = arith.constant 0 : index
    %c21 = arith.constant 21 : index
    %c0_39 = arith.constant 0 : index
    %43 = vector.load %arg2[%c0_38, %c21, %c0_39] : memref<1x116x128xbf16, #tpu.memory_space<vmem>>, vector<1x80x128xbf16>
    %44 = vector.shape_cast %43 : vector<1x80x128xbf16> to vector<80x128xbf16>
    %c7 = arith.constant 7 : index
    %c0_40 = arith.constant 0 : index
    %c0_41 = arith.constant 0 : index
    %45 = vector.load %arg3[%c7, %c0_40, %c0_41] : memref<9x128x128xbf16, #tpu.memory_space<vmem>>, vector<1x128x128xbf16>
    %46 = vector.shape_cast %45 : vector<1x128x128xbf16> to vector<128x128xbf16>
    %cst_42 = arith.constant dense<0.000000e+00> : vector<80x128xf32>
    %47 = tpu.matmul %44, %46, %cst_42 {dimension_numbers = #tpu.dot_dimension_numbers<[1], [0], [0], [1], [0, 0, 1, 1], [], []>} : vector<80x128xbf16>, vector<128x128xbf16>, vector<80x128xf32> -> vector<80x128xf32>
    %48 = arith.addf %42, %47 : vector<80x128xf32>
    %c0_43 = arith.constant 0 : index
    %c22 = arith.constant 22 : index
    %c0_44 = arith.constant 0 : index
    %49 = vector.load %arg2[%c0_43, %c22, %c0_44] : memref<1x116x128xbf16, #tpu.memory_space<vmem>>, vector<1x80x128xbf16>
    %50 = vector.shape_cast %49 : vector<1x80x128xbf16> to vector<80x128xbf16>
    %c8 = arith.constant 8 : index
    %c0_45 = arith.constant 0 : index
    %c0_46 = arith.constant 0 : index
    %51 = vector.load %arg3[%c8, %c0_45, %c0_46] : memref<9x128x128xbf16, #tpu.memory_space<vmem>>, vector<1x128x128xbf16>
    %52 = vector.shape_cast %51 : vector<1x128x128xbf16> to vector<128x128xbf16>
    %cst_47 = arith.constant dense<0.000000e+00> : vector<80x128xf32>
    %53 = tpu.matmul %50, %52, %cst_47 {dimension_numbers = #tpu.dot_dimension_numbers<[1], [0], [0], [1], [0, 0, 1, 1], [], []>} : vector<80x128xbf16>, vector<128x128xbf16>, vector<80x128xf32> -> vector<80x128xf32>
    %54 = arith.addf %48, %53 : vector<80x128xf32>
    %c0_48 = arith.constant 0 : index
    %c0_49 = arith.constant 0 : index
    %55 = vector.load %arg4[%c0_48, %c0_49] : memref<1x128xf32, #tpu.memory_space<vmem>>, vector<1x128xf32>
    %56 = vector.broadcast %55 : vector<1x128xf32> to vector<80x128xf32>
    %57 = arith.addf %54, %56 : vector<80x128xf32>
    %c0_50 = arith.constant 0 : index
    %c0_51 = arith.constant 0 : index
    %c0_52 = arith.constant 0 : index
    %58 = vector.load %arg5[%c0_50, %c0_51, %c0_52] : memref<1x80x128xbf16, #tpu.memory_space<vmem>>, vector<1x80x128xbf16>
    %59 = vector.shape_cast %58 : vector<1x80x128xbf16> to vector<80x128xbf16>
    %60 = arith.extf %59 : vector<80x128xbf16> to vector<80x128xf32>
    %61 = arith.addf %57, %60 : vector<80x128xf32>
    %cst_53 = arith.constant 0.000000e+00 : f32
    %62 = vector.broadcast %cst_53 : f32 to vector<80x128xf32>
    %63 = arith.maximumf %61, %62 : vector<80x128xf32>
    %64 = arith.truncf %63 : vector<80x128xf32> to vector<80x128xbf16>
    %c0_54 = arith.constant 0 : index
    %c0_55 = arith.constant 0 : index
    %c0_56 = arith.constant 0 : index
    %65 = vector.load %arg6[%c0_54, %c0_55, %c0_56] : memref<1x80x128xbf16, #tpu.memory_space<vmem>>, vector<1x80x128xbf16>
    %66 = vector.shape_cast %65 : vector<1x80x128xbf16> to vector<80x128xbf16>
    %67 = vector.shape_cast %64 : vector<80x128xbf16> to vector<1x80x128xbf16>
    tpu.vector_store %arg6[%c0_54, %c0_55, %c0_56], %67 {strides = array<i32>} : memref<1x80x128xbf16, #tpu.memory_space<vmem>>, vector<1x80x128xbf16>,
    return
  }
  func.func @transform_0(%arg0: i32, %arg1: i32) -> (i32, i32, i32) {
    %c0_i32 = arith.constant 0 : i32
    %c0_i32_0 = arith.constant 0 : i32
    %c0_i32_1 = arith.constant 0 : i32
    return %arg0, %c0_i32, %c0_i32_0 : i32, i32, i32
  }
  func.func @transform_1(%arg0: i32, %arg1: i32) -> (i32, i32, i32) {
    %c0_i32 = arith.constant 0 : i32
    %c0_i32_0 = arith.constant 0 : i32
    %c0_i32_1 = arith.constant 0 : i32
    return %c0_i32, %c0_i32_0, %arg1 : i32, i32, i32
  }
  func.func @transform_2(%arg0: i32, %arg1: i32) -> (i32, i32) {
    %c0_i32 = arith.constant 0 : i32
    %c0_i32_0 = arith.constant 0 : i32
    return %c0_i32, %arg1 : i32, i32
  }
  func.func @transform_3(%arg0: i32, %arg1: i32) -> (i32, i32, i32) {
    %c0_i32 = arith.constant 0 : i32
    %c0_i32_0 = arith.constant 0 : i32
    return %arg0, %c0_i32, %arg1 : i32, i32, i32
  }
  func.func @transform_4(%arg0: i32, %arg1: i32) -> (i32, i32, i32) {
    %c0_i32 = arith.constant 0 : i32
    %c0_i32_0 = arith.constant 0 : i32
    return %arg0, %c0_i32, %arg1 : i32, i32, i32
  }
}

module attributes {stable_mosaic.version = 11 : i64} {
  func.func @kernel(%arg0: i32, %arg1: i32, %arg2: memref<1x116x128xbf16, #tpu.memory_space<vmem>>, %arg3: memref<9x128x128xbf16, #tpu.memory_space<vmem>>, %arg4: memref<1x128xf32, #tpu.memory_space<vmem>>, %arg5: memref<1x80x128xbf16, #tpu.memory_space<vmem>>) attributes {dimension_semantics = [#tpu.dimension_semantics<parallel>, #tpu.dimension_semantics<parallel>], iteration_bounds = array<i64: 2, 1>, scalar_prefetch = 0 : i64, scratch_operands = 0 : i64, tpu.core_type = #tpu.core_type<tc>, window_params = [{transform_indices = @transform_0, window_bounds = array<i64: 1, 116, 128>}, {transform_indices = @transform_1, window_bounds = array<i64: 9, 128, 128>}, {transform_indices = @transform_2, window_bounds = array<i64: 1, 128>}, {transform_indices = @transform_3, window_bounds = array<i64: 1, 80, 128>}]} {
    %cst = arith.constant 0.000000e+00 : f32
    %0 = vector.broadcast %cst : f32 to vector<80x128xf32>
    %c0 = arith.constant 0 : index
    %c0_0 = arith.constant 0 : index
    %c0_1 = arith.constant 0 : index
    %1 = vector.load %arg2[%c0, %c0_0, %c0_1] : memref<1x116x128xbf16, #tpu.memory_space<vmem>>, vector<1x80x128xbf16>
    %2 = vector.shape_cast %1 : vector<1x80x128xbf16> to vector<80x128xbf16>
    %c0_2 = arith.constant 0 : index
    %c0_3 = arith.constant 0 : index
    %c0_4 = arith.constant 0 : index
    %3 = vector.load %arg3[%c0_2, %c0_3, %c0_4] : memref<9x128x128xbf16, #tpu.memory_space<vmem>>, vector<1x128x128xbf16>
    %4 = vector.shape_cast %3 : vector<1x128x128xbf16> to vector<128x128xbf16>
    %cst_5 = arith.constant dense<0.000000e+00> : vector<80x128xf32>
    %5 = tpu.matmul %2, %4, %cst_5 {dimension_numbers = #tpu.dot_dimension_numbers<[1], [0], [0], [1], [0, 0, 1, 1], [], []>} : vector<80x128xbf16>, vector<128x128xbf16>, vector<80x128xf32> -> vector<80x128xf32>
    %6 = arith.addf %0, %5 : vector<80x128xf32>
    %c0_6 = arith.constant 0 : index
    %c1 = arith.constant 1 : index
    %c0_7 = arith.constant 0 : index
    %7 = vector.load %arg2[%c0_6, %c1, %c0_7] : memref<1x116x128xbf16, #tpu.memory_space<vmem>>, vector<1x80x128xbf16>
    %8 = vector.shape_cast %7 : vector<1x80x128xbf16> to vector<80x128xbf16>
    %c1_8 = arith.constant 1 : index
    %c0_9 = arith.constant 0 : index
    %c0_10 = arith.constant 0 : index
    %9 = vector.load %arg3[%c1_8, %c0_9, %c0_10] : memref<9x128x128xbf16, #tpu.memory_space<vmem>>, vector<1x128x128xbf16>
    %10 = vector.shape_cast %9 : vector<1x128x128xbf16> to vector<128x128xbf16>
    %cst_11 = arith.constant dense<0.000000e+00> : vector<80x128xf32>
    %11 = tpu.matmul %8, %10, %cst_11 {dimension_numbers = #tpu.dot_dimension_numbers<[1], [0], [0], [1], [0, 0, 1, 1], [], []>} : vector<80x128xbf16>, vector<128x128xbf16>, vector<80x128xf32> -> vector<80x128xf32>
    %12 = arith.addf %6, %11 : vector<80x128xf32>
    %c0_12 = arith.constant 0 : index
    %c2 = arith.constant 2 : index
    %c0_13 = arith.constant 0 : index
    %13 = vector.load %arg2[%c0_12, %c2, %c0_13] : memref<1x116x128xbf16, #tpu.memory_space<vmem>>, vector<1x80x128xbf16>
    %14 = vector.shape_cast %13 : vector<1x80x128xbf16> to vector<80x128xbf16>
    %c2_14 = arith.constant 2 : index
    %c0_15 = arith.constant 0 : index
    %c0_16 = arith.constant 0 : index
    %15 = vector.load %arg3[%c2_14, %c0_15, %c0_16] : memref<9x128x128xbf16, #tpu.memory_space<vmem>>, vector<1x128x128xbf16>
    %16 = vector.shape_cast %15 : vector<1x128x128xbf16> to vector<128x128xbf16>
    %cst_17 = arith.constant dense<0.000000e+00> : vector<80x128xf32>
    %17 = tpu.matmul %14, %16, %cst_17 {dimension_numbers = #tpu.dot_dimension_numbers<[1], [0], [0], [1], [0, 0, 1, 1], [], []>} : vector<80x128xbf16>, vector<128x128xbf16>, vector<80x128xf32> -> vector<80x128xf32>
    %18 = arith.addf %12, %17 : vector<80x128xf32>
    %c0_18 = arith.constant 0 : index
    %c10 = arith.constant 10 : index
    %c0_19 = arith.constant 0 : index
    %19 = vector.load %arg2[%c0_18, %c10, %c0_19] : memref<1x116x128xbf16, #tpu.memory_space<vmem>>, vector<1x80x128xbf16>
    %20 = vector.shape_cast %19 : vector<1x80x128xbf16> to vector<80x128xbf16>
    %c3 = arith.constant 3 : index
    %c0_20 = arith.constant 0 : index
    %c0_21 = arith.constant 0 : index
    %21 = vector.load %arg3[%c3, %c0_20, %c0_21] : memref<9x128x128xbf16, #tpu.memory_space<vmem>>, vector<1x128x128xbf16>
    %22 = vector.shape_cast %21 : vector<1x128x128xbf16> to vector<128x128xbf16>
    %cst_22 = arith.constant dense<0.000000e+00> : vector<80x128xf32>
    %23 = tpu.matmul %20, %22, %cst_22 {dimension_numbers = #tpu.dot_dimension_numbers<[1], [0], [0], [1], [0, 0, 1, 1], [], []>} : vector<80x128xbf16>, vector<128x128xbf16>, vector<80x128xf32> -> vector<80x128xf32>
    %24 = arith.addf %18, %23 : vector<80x128xf32>
    %c0_23 = arith.constant 0 : index
    %c11 = arith.constant 11 : index
    %c0_24 = arith.constant 0 : index
    %25 = vector.load %arg2[%c0_23, %c11, %c0_24] : memref<1x116x128xbf16, #tpu.memory_space<vmem>>, vector<1x80x128xbf16>
    %26 = vector.shape_cast %25 : vector<1x80x128xbf16> to vector<80x128xbf16>
    %c4 = arith.constant 4 : index
    %c0_25 = arith.constant 0 : index
    %c0_26 = arith.constant 0 : index
    %27 = vector.load %arg3[%c4, %c0_25, %c0_26] : memref<9x128x128xbf16, #tpu.memory_space<vmem>>, vector<1x128x128xbf16>
    %28 = vector.shape_cast %27 : vector<1x128x128xbf16> to vector<128x128xbf16>
    %cst_27 = arith.constant dense<0.000000e+00> : vector<80x128xf32>
    %29 = tpu.matmul %26, %28, %cst_27 {dimension_numbers = #tpu.dot_dimension_numbers<[1], [0], [0], [1], [0, 0, 1, 1], [], []>} : vector<80x128xbf16>, vector<128x128xbf16>, vector<80x128xf32> -> vector<80x128xf32>
    %30 = arith.addf %24, %29 : vector<80x128xf32>
    %c0_28 = arith.constant 0 : index
    %c12 = arith.constant 12 : index
    %c0_29 = arith.constant 0 : index
    %31 = vector.load %arg2[%c0_28, %c12, %c0_29] : memref<1x116x128xbf16, #tpu.memory_space<vmem>>, vector<1x80x128xbf16>
    %32 = vector.shape_cast %31 : vector<1x80x128xbf16> to vector<80x128xbf16>
    %c5 = arith.constant 5 : index
    %c0_30 = arith.constant 0 : index
    %c0_31 = arith.constant 0 : index
    %33 = vector.load %arg3[%c5, %c0_30, %c0_31] : memref<9x128x128xbf16, #tpu.memory_space<vmem>>, vector<1x128x128xbf16>
    %34 = vector.shape_cast %33 : vector<1x128x128xbf16> to vector<128x128xbf16>
    %cst_32 = arith.constant dense<0.000000e+00> : vector<80x128xf32>
    %35 = tpu.matmul %32, %34, %cst_32 {dimension_numbers = #tpu.dot_dimension_numbers<[1], [0], [0], [1], [0, 0, 1, 1], [], []>} : vector<80x128xbf16>, vector<128x128xbf16>, vector<80x128xf32> -> vector<80x128xf32>
    %36 = arith.addf %30, %35 : vector<80x128xf32>
    %c0_33 = arith.constant 0 : index
    %c20 = arith.constant 20 : index
    %c0_34 = arith.constant 0 : index
    %37 = vector.load %arg2[%c0_33, %c20, %c0_34] : memref<1x116x128xbf16, #tpu.memory_space<vmem>>, vector<1x80x128xbf16>
    %38 = vector.shape_cast %37 : vector<1x80x128xbf16> to vector<80x128xbf16>
    %c6 = arith.constant 6 : index
    %c0_35 = arith.constant 0 : index
    %c0_36 = arith.constant 0 : index
    %39 = vector.load %arg3[%c6, %c0_35, %c0_36] : memref<9x128x128xbf16, #tpu.memory_space<vmem>>, vector<1x128x128xbf16>
    %40 = vector.shape_cast %39 : vector<1x128x128xbf16> to vector<128x128xbf16>
    %cst_37 = arith.constant dense<0.000000e+00> : vector<80x128xf32>
    %41 = tpu.matmul %38, %40, %cst_37 {dimension_numbers = #tpu.dot_dimension_numbers<[1], [0], [0], [1], [0, 0, 1, 1], [], []>} : vector<80x128xbf16>, vector<128x128xbf16>, vector<80x128xf32> -> vector<80x128xf32>
    %42 = arith.addf %36, %41 : vector<80x128xf32>
    %c0_38 = arith.constant 0 : index
    %c21 = arith.constant 21 : index
    %c0_39 = arith.constant 0 : index
    %43 = vector.load %arg2[%c0_38, %c21, %c0_39] : memref<1x116x128xbf16, #tpu.memory_space<vmem>>, vector<1x80x128xbf16>
    %44 = vector.shape_cast %43 : vector<1x80x128xbf16> to vector<80x128xbf16>
    %c7 = arith.constant 7 : index
    %c0_40 = arith.constant 0 : index
    %c0_41 = arith.constant 0 : index
    %45 = vector.load %arg3[%c7, %c0_40, %c0_41] : memref<9x128x128xbf16, #tpu.memory_space<vmem>>, vector<1x128x128xbf16>
    %46 = vector.shape_cast %45 : vector<1x128x128xbf16> to vector<128x128xbf16>
    %cst_42 = arith.constant dense<0.000000e+00> : vector<80x128xf32>
    %47 = tpu.matmul %44, %46, %cst_42 {dimension_numbers = #tpu.dot_dimension_numbers<[1], [0], [0], [1], [0, 0, 1, 1], [], []>} : vector<80x128xbf16>, vector<128x128xbf16>, vector<80x128xf32> -> vector<80x128xf32>
    %48 = arith.addf %42, %47 : vector<80x128xf32>
    %c0_43 = arith.constant 0 : index
    %c22 = arith.constant 22 : index
    %c0_44 = arith.constant 0 : index
    %49 = vector.load %arg2[%c0_43, %c22, %c0_44] : memref<1x116x128xbf16, #tpu.memory_space<vmem>>, vector<1x80x128xbf16>
    %50 = vector.shape_cast %49 : vector<1x80x128xbf16> to vector<80x128xbf16>
    %c8 = arith.constant 8 : index
    %c0_45 = arith.constant 0 : index
    %c0_46 = arith.constant 0 : index
    %51 = vector.load %arg3[%c8, %c0_45, %c0_46] : memref<9x128x128xbf16, #tpu.memory_space<vmem>>, vector<1x128x128xbf16>
    %52 = vector.shape_cast %51 : vector<1x128x128xbf16> to vector<128x128xbf16>
    %cst_47 = arith.constant dense<0.000000e+00> : vector<80x128xf32>
    %53 = tpu.matmul %50, %52, %cst_47 {dimension_numbers = #tpu.dot_dimension_numbers<[1], [0], [0], [1], [0, 0, 1, 1], [], []>} : vector<80x128xbf16>, vector<128x128xbf16>, vector<80x128xf32> -> vector<80x128xf32>
    %54 = arith.addf %48, %53 : vector<80x128xf32>
    %c0_48 = arith.constant 0 : index
    %c0_49 = arith.constant 0 : index
    %55 = vector.load %arg4[%c0_48, %c0_49] : memref<1x128xf32, #tpu.memory_space<vmem>>, vector<1x128xf32>
    %56 = vector.broadcast %55 : vector<1x128xf32> to vector<80x128xf32>
    %57 = arith.addf %54, %56 : vector<80x128xf32>
    %cst_50 = arith.constant 0.000000e+00 : f32
    %58 = vector.broadcast %cst_50 : f32 to vector<80x128xf32>
    %59 = arith.maximumf %57, %58 : vector<80x128xf32>
    %60 = arith.truncf %59 : vector<80x128xf32> to vector<80x128xbf16>
    %c0_51 = arith.constant 0 : index
    %c0_52 = arith.constant 0 : index
    %c0_53 = arith.constant 0 : index
    %61 = vector.load %arg5[%c0_51, %c0_52, %c0_53] : memref<1x80x128xbf16, #tpu.memory_space<vmem>>, vector<1x80x128xbf16>
    %62 = vector.shape_cast %61 : vector<1x80x128xbf16> to vector<80x128xbf16>
    %63 = vector.shape_cast %60 : vector<80x128xbf16> to vector<1x80x128xbf16>
    tpu.vector_store %arg5[%c0_51, %c0_52, %c0_53], %63 {strides = array<i32>} : memref<1x80x128xbf16, #tpu.memory_space<vmem>>, vector<1x80x128xbf16>,
    return
  }
  func.func @transform_0(%arg0: i32, %arg1: i32) -> (i32, i32, i32) {
    %c0_i32 = arith.constant 0 : i32
    %c0_i32_0 = arith.constant 0 : i32
    %c0_i32_1 = arith.constant 0 : i32
    return %arg0, %c0_i32, %c0_i32_0 : i32, i32, i32
  }
  func.func @transform_1(%arg0: i32, %arg1: i32) -> (i32, i32, i32) {
    %c0_i32 = arith.constant 0 : i32
    %c0_i32_0 = arith.constant 0 : i32
    %c0_i32_1 = arith.constant 0 : i32
    return %c0_i32, %c0_i32_0, %arg1 : i32, i32, i32
  }
  func.func @transform_2(%arg0: i32, %arg1: i32) -> (i32, i32) {
    %c0_i32 = arith.constant 0 : i32
    %c0_i32_0 = arith.constant 0 : i32
    return %c0_i32, %arg1 : i32, i32
  }
  func.func @transform_3(%arg0: i32, %arg1: i32) -> (i32, i32, i32) {
    %c0_i32 = arith.constant 0 : i32
    %c0_i32_0 = arith.constant 0 : i32
    return %arg0, %c0_i32, %arg1 : i32, i32, i32
  }
}

</mosaic_0001>

<bundles_post_ra>
// kernel: run.6
= control target key start
LH: loop header
LB: loop body
LE: loop exit
PB: predicated region body
PF: predicated region fallthrough
CT: control target
= control target key end

     0   :  { %s602_s1 = inlined_call_operand.vmem [shape: bf16[128,128], index: 1, kind: input, shape index: {}]   ;;  %s603_s0 = inlined_call_operand.vmem [shape: bf16[128,128], index: 0, kind: input, shape index: {}]   ;;  %s604_s2 = inlined_call_operand.vmem [shape: f32[1,128], index: 2, kind: input, shape index: {}]   ;;  %s605_s3 = inlined_call_operand.vmem [shape: bf16[128,128], index: 3, kind: output, shape index: {}]  }
   0x1   :  { %v491_v0 = vld [vmem:[%s602_s1 + $0x38] sm:$0xff]   ;;  %v492_v1 = vld [vmem:[%s602_s1 + $0x30] sm:$0xff]   ;;  %v493_v2 = vld [vmem:[%s602_s1 + $0x28] sm:$0xff]  }
   0x2   :  { %443 = vmatprep.subr.bf16.mxu0 %v491_v0  ;;  %475 = vmatprep.subr.bf16.mxu1 %v491_v0  ;;  %v494_v3 = vld [vmem:[%s602_s1 + $0x20] sm:$0xff]   ;;  %v495_v6 = vld [vmem:[%s602_s1 + $0x18] sm:$0xff]   ;;  %v496_v7 = vld [vmem:[%s602_s1 + $0x10] sm:$0xff]  }
   0x3   :  { %444 = vmatpush3.bf16.msra.mxu0 %v491_v0  ;;  %483 = vmatpush3.bf16.msra.mxu1 %v491_v0  ;;  %v499_v4 = vld [vmem:[%s603_s0] sm:$0xff]   ;;  %v497_v8 = vld [vmem:[%s602_s1 + $0x8] sm:$0xff]   ;;  %v503_v12 = vld [vmem:[%s603_s0 + $0x10] sm:$0xff]  }
   0x4   :  { %445 = vmatprep.subr.bf16.mxu0 %v492_v1  ;;  %476 = vmatprep.subr.bf16.mxu1 %v492_v1  ;;  %v500_v5 = vld [vmem:[%s603_s0 + $0x20] sm:$0xff]   ;;  %v501_v10 = vld [vmem:[%s603_s0 + $0x8] sm:$0xff]   ;;  %v504_v13 = vld [vmem:[%s603_s0 + $0x30] sm:$0xff]  }
   0x5   :  { %459 = vmatprep.mubr.bf16.mxu0 %v499_v4  ;;  %467 = vmatprep.mubr.bf16.mxu1 %v500_v5  ;;  %v498_v9 = vld [vmem:[%s602_s1] sm:$0xff]   ;;  %v502_v11 = vld [vmem:[%s603_s0 + $0x28] sm:$0xff]   ;;  %v505_v14 = vld [vmem:[%s603_s0 + $0x18] sm:$0xff]  }
   0x6   :  { %v506_v15 = vld [vmem:[%s603_s0 + $0x38] sm:$0xff]   ;;  %v331_v18 = vld [vmem:[%s604_s2] ss:$0 sm:$0xff] }
   0x7   :  { %446 = vmatpush3.bf16.msra.mxu0 %v492_v1  ;;  %484 = vmatpush3.bf16.msra.mxu1 %v492_v1 }
   0x8   :  { %447 = vmatprep.subr.bf16.mxu0 %v493_v2  ;;  %477 = vmatprep.subr.bf16.mxu1 %v493_v2 }
   0xb   :  { %448 = vmatpush3.bf16.msra.mxu0 %v493_v2  ;;  %485 = vmatpush3.bf16.msra.mxu1 %v493_v2 }
   0xc   :  { %449 = vmatprep.subr.bf16.mxu0 %v494_v3  ;;  %478 = vmatprep.subr.bf16.mxu1 %v494_v3 }
   0xf   :  { %450 = vmatpush3.bf16.msra.mxu0 %v494_v3  ;;  %486 = vmatpush3.bf16.msra.mxu1 %v494_v3 }
  0x10   :  { %451 = vmatprep.subr.bf16.mxu0 %v495_v6  ;;  %479 = vmatprep.subr.bf16.mxu1 %v495_v6 }
  0x13   :  { %452 = vmatpush3.bf16.msra.mxu0 %v495_v6  ;;  %487 = vmatpush3.bf16.msra.mxu1 %v495_v6 }
  0x14   :  { %453 = vmatprep.subr.bf16.mxu0 %v496_v7  ;;  %480 = vmatprep.subr.bf16.mxu1 %v496_v7 }
  0x17   :  { %454 = vmatpush3.bf16.msra.mxu0 %v496_v7  ;;  %488 = vmatpush3.bf16.msra.mxu1 %v496_v7 }
  0x18   :  { %455 = vmatprep.subr.bf16.mxu0 %v497_v8  ;;  %481 = vmatprep.subr.bf16.mxu1 %v497_v8 }
  0x1b   :  { %456 = vmatpush3.bf16.msra.mxu0 %v497_v8  ;;  %489 = vmatpush3.bf16.msra.mxu1 %v497_v8 }
  0x1c   :  { %457 = vmatprep.subr.bf16.mxu0 %v498_v9  ;;  %482 = vmatprep.subr.bf16.mxu1 %v498_v9 }
  0x1f   :  { %458 = vmatpush3.bf16.msra.mxu0 %v498_v9  ;;  %490 = vmatpush3.bf16.msra.mxu1 %v498_v9 }
  0x22   :  { %460 = vmatmul.mubr.bf16.vlgmr.msra.gmra.mxu0 %v501_v10  ;;  %468 = vmatmul.mubr.bf16.vlgmr.msra.gmra.mxu1 %v502_v11 }
  0x23   :  { %463 = vmatprep.mubr.bf16.mxu0 %v503_v12  ;;  %471 = vmatprep.mubr.bf16.mxu1 %v504_v13 }
  0x2a   :  { %464 = vmatmul.mubr.bf16.gmra.mxu0 %v505_v14  ;;  %472 = vmatmul.mubr.bf16.gmra.mxu1 %v506_v15 }
  0xe2   :  { %v461_v16 = vpop.f32.mrf.mxu0  ;;  %v469_v17 = vpop.f32.mrf.mxu1 }
  0xe3   :  { %v193_v23 = vadd.f32 %v461_v16, %v331_v18  ;;  %v225_v24 = vadd.f32 %v469_v17, %v331_v18 }
  0xe4   :  { %v184_v19 = vpop.f32.mrf.mxu0  ;;  %v216_v20 = vpop.f32.mrf.mxu1 }
  0xe5   :  { %v185_v27 = vadd.f32 %v331_v18, %v184_v19  ;;  %v217_v28 = vadd.f32 %v331_v18, %v216_v20 }
  0xe6   :  { %v462_v21 = vpop.f32.mrf.mxu0  ;;  %v470_v22 = vpop.f32.mrf.mxu1 }
  0xe7   :  { %v196_v25 = vadd.f32 %v462_v21, %v331_v18  ;;  %v228_v26 = vadd.f32 %v470_v22, %v331_v18 }
  0xe8   :  { %v187_v29 = vpop.f32.mrf.mxu0  ;;  %v219_v30 = vpop.f32.mrf.mxu1 }
  0xe9   :  { %v388_v31 = vpack.c.bf16 %v196_v25, %v193_v23  ;;  %v408_v32 = vpack.c.bf16 %v228_v26, %v225_v24  ;;  %v188_v33 = vadd.f32 %v331_v18, %v187_v29  ;;  %v220_v34 = vadd.f32 %v331_v18, %v219_v30 }
  0xea   :  { %v465_v35 = vpop.f32.mrf.mxu0  ;;  %v473_v36 = vpop.f32.mrf.mxu1 }
  0xeb   :  { %420 = vst [vmem:[%s605_s3 + $0x8] sm:$0xff] %v388_v31   ;;  %424 = vst [vmem:[%s605_s3 + $0x28] sm:$0xff] %v408_v32   ;;  %v383_v37 = vpack.c.bf16 %v188_v33, %v185_v27  ;;  %v403_v38 = vpack.c.bf16 %v220_v34, %v217_v28  ;;  %v209_v43 = vadd.f32 %v465_v35, %v331_v18 }
  0xec   :  { %v200_v39 = vpop.f32.mrf.mxu0  ;;  %v232_v40 = vpop.f32.mrf.mxu1  ;;  %v241_v44 = vadd.f32 %v473_v36, %v331_v18 }
  0xed   :  { %384 = vst [vmem:[%s605_s3] sm:$0xff] %v383_v37   ;;  %423 = vst [vmem:[%s605_s3 + $0x20] sm:$0xff] %v403_v38   ;;  %v201_v47 = vadd.f32 %v331_v18, %v200_v39  ;;  %v233_v48 = vadd.f32 %v331_v18, %v232_v40 }
  0xee   :  { %v466_v41 = vpop.f32.mrf.mxu0  ;;  %v474_v42 = vpop.f32.mrf.mxu1 }
  0xef   :  { %v212_v45 = vadd.f32 %v466_v41, %v331_v18  ;;  %v244_v46 = vadd.f32 %v474_v42, %v331_v18 }
  0xf0   :  { %v203_v49 = vpop.f32.mrf.mxu0  ;;  %v235_v50 = vpop.f32.mrf.mxu1 }
  0xf1   :  { %v398_v51 = vpack.c.bf16 %v212_v45, %v209_v43  ;;  %v418_v52 = vpack.c.bf16 %v244_v46, %v241_v44  ;;  %v204_v53 = vadd.f32 %v331_v18, %v203_v49  ;;  %v236_v54 = vadd.f32 %v331_v18, %v235_v50 }
  0xf3   :  { %422 = vst [vmem:[%s605_s3 + $0x18] sm:$0xff] %v398_v51   ;;  %426 = vst [vmem:[%s605_s3 + $0x38] sm:$0xff] %v418_v52   ;;  %v393_v55 = vpack.c.bf16 %v204_v53, %v201_v47  ;;  %v413_v56 = vpack.c.bf16 %v236_v54, %v233_v48 }
  0xf5   :  { %421 = vst [vmem:[%s605_s3 + $0x10] sm:$0xff] %v393_v55   ;;  %425 = vst [vmem:[%s605_s3 + $0x30] sm:$0xff] %v413_v56  }

// kernel: run.5
= control target key start
LH: loop header
LB: loop body
LE: loop exit
PB: predicated region body
PF: predicated region fallthrough
CT: control target
= control target key end

     0   :  { %s2950_s1 = inlined_call_operand.vmem [shape: bf16[1152,128], index: 1, kind: input, shape index: {}]   ;;  %s2951_s0 = inlined_call_operand.vmem [shape: bf16[128,1152], index: 0, kind: input, shape index: {}]   ;;  %s2952_s2 = inlined_call_operand.vmem [shape: f32[1,128], index: 2, kind: input, shape index: {}]   ;;  %s2953_s3 = inlined_call_operand.vmem [shape: bf16[128,128], index: 3, kind: output, shape index: {}]  }
   0x1   :  { %v2175_v0 = vld [vmem:[%s2950_s1 + $0x78] sm:$0xff]   ;;  %v2179_v4 = vld [vmem:[%s2950_s1 + $0x70] sm:$0xff]   ;;  %v2183_v8 = vld [vmem:[%s2950_s1 + $0x68] sm:$0xff]  }
   0x2   :  { %v2176_v1 = vld [vmem:[%s2950_s1 + $0xf8] sm:$0xff]   ;;  %1855 = vmatprep.subr.bf16.mxu0 %v2175_v0  ;;  %v2180_v5 = vld [vmem:[%s2950_s1 + $0xf0] sm:$0xff]   ;;  %v2184_v9 = vld [vmem:[%s2950_s1 + $0xe8] sm:$0xff]  }
   0x3   :  { %v2177_v2 = vld [vmem:[%s2950_s1 + $0x38] sm:$0xff]   ;;  %1919 = vmatprep.subr.bf16.mxu1 %v2176_v1  ;;  %v2181_v6 = vld [vmem:[%s2950_s1 + $0x30] sm:$0xff]   ;;  %v2185_v10 = vld [vmem:[%s2950_s1 + $0x28] sm:$0xff]  }
   0x4   :  { %v2178_v3 = vld [vmem:[%s2950_s1 + $0xb8] sm:$0xff]   ;;  %1856 = vmatpush3.bf16.msra.mxu0 %v2177_v2  ;;  %v2182_v7 = vld [vmem:[%s2950_s1 + $0xb0] sm:$0xff]   ;;  %v2186_v11 = vld [vmem:[%s2950_s1 + $0xa8] sm:$0xff]  }
   0x5   :  { %1920 = vmatpush3.bf16.msra.mxu1 %v2178_v3  ;;  %1857 = vmatprep.subr.bf16.mxu0 %v2179_v4  ;;  %v2187_v12 = vld [vmem:[%s2950_s1 + $0x60] sm:$0xff]   ;;  %v2191_v16 = vld [vmem:[%s2950_s1 + $0x58] sm:$0xff]   ;;  %v2195_v20 = vld [vmem:[%s2950_s1 + $0x50] sm:$0xff]  }
   0x6   :  { %1921 = vmatprep.subr.bf16.mxu1 %v2180_v5  ;;  %v2188_v13 = vld [vmem:[%s2950_s1 + $0xe0] sm:$0xff]   ;;  %v2192_v17 = vld [vmem:[%s2950_s1 + $0xd8] sm:$0xff]   ;;  %v2196_v21 = vld [vmem:[%s2950_s1 + $0xd0] sm:$0xff]  }
   0x7   :  { %v2189_v14 = vld [vmem:[%s2950_s1 + $0x20] sm:$0xff]   ;;  %v2193_v18 = vld [vmem:[%s2950_s1 + $0x18] sm:$0xff]   ;;  %v2197_v22 = vld [vmem:[%s2950_s1 + $0x10] sm:$0xff]  }
   0x8   :  { %1858 = vmatpush3.bf16.msra.mxu0 %v2181_v6  ;;  %v2190_v15 = vld [vmem:[%s2950_s1 + $0xa0] sm:$0xff]   ;;  %v2194_v19 = vld [vmem:[%s2950_s1 + $0x98] sm:$0xff]   ;;  %v2198_v23 = vld [vmem:[%s2950_s1 + $0x90] sm:$0xff]  }
   0x9   :  { %1922 = vmatpush3.bf16.msra.mxu1 %v2182_v7  ;;  %1859 = vmatprep.subr.bf16.mxu0 %v2183_v8  ;;  %v2199_v24 = vld [vmem:[%s2950_s1 + $0x48] sm:$0xff]   ;;  %v2203_v28 = vld [vmem:[%s2950_s1 + $0x40] sm:$0xff]   ;;  %v2213_v36 = vld [vmem:[%s2950_s1 + $0x178] sm:$0xff]  }
   0xa   :  { %1923 = vmatprep.subr.bf16.mxu1 %v2184_v9  ;;  %v2200_v25 = vld [vmem:[%s2950_s1 + $0xc8] sm:$0xff]   ;;  %v2204_v29 = vld [vmem:[%s2950_s1 + $0xc0] sm:$0xff]   ;;  %v2214_v37 = vld [vmem:[%s2950_s1 + $0x1f8] sm:$0xff]  }
   0xb   :  { %v2201_v26 = vld [vmem:[%s2950_s1 + $0x8] sm:$0xff]   ;;  %v2205_v30 = vld [vmem:[%s2950_s1] sm:$0xff]   ;;  %v2215_v38 = vld [vmem:[%s2950_s1 + $0x138] sm:$0xff]  }
   0xc   :  { %1860 = vmatpush3.bf16.msra.mxu0 %v2185_v10  ;;  %v2202_v27 = vld [vmem:[%s2950_s1 + $0x88] sm:$0xff]   ;;  %v2206_v31 = vld [vmem:[%s2950_s1 + $0x80] sm:$0xff]   ;;  %v2216_v39 = vld [vmem:[%s2950_s1 + $0x1b8] sm:$0xff]  }
   0xd   :  { %1924 = vmatpush3.bf16.msra.mxu1 %v2186_v11  ;;  %1861 = vmatprep.subr.bf16.mxu0 %v2187_v12  ;;  %v2207_v32 = vld [vmem:[%s2951_s0] ss:$36 sps:$4 sm:$0xff]   ;;  %v2210_v34 = vld [vmem:[%s2951_s0 + $0x8] ss:$36 sps:$4 sm:$0xff]   ;;  %v2219_v41 = vld [vmem:[%s2951_s0 + $0x54] ss:$36 sps:$4 sm:$0xff]  }
   0xe   :  { %1925 = vmatprep.subr.bf16.mxu1 %v2188_v13  ;;  %v2209_v33 = vld [vmem:[%s2951_s0 + $0x4] ss:$36 sps:$4 sm:$0xff]   ;;  %v2212_v35 = vld [vmem:[%s2951_s0 + $0xc] ss:$36 sps:$4 sm:$0xff]   ;;  %v2227_v48 = vld [vmem:[%s2951_s0 + $0x94] ss:$36 sps:$4 sm:$0xff]  }
   0xf   :  { %1078 = vmatprep.mubr.bf16.mxu0 %v2209_v33  ;;  %1175 = vmatprep.mubr.bf16.mxu1 %v2212_v35  ;;  %v2217_v40 = vld [vmem:[%s2951_s0 + $0x4c] ss:$36 sps:$4 sm:$0xff]   ;;  %v2229_v49 = vld [vmem:[%s2951_s0 + $0x9c] ss:$36 sps:$4 sm:$0xff]   ;;  %v2239_v57 = vld [vmem:[%s2951_s0 + $0xe4] ss:$36 sps:$4 sm:$0xff]  }
  0x10   :  { %1862 = vmatpush3.bf16.msra.mxu0 %v2189_v14  ;;  %v2221_v42 = vld [vmem:[%s2951_s0 + $0x48] ss:$36 sps:$4 sm:$0xff]   ;;  %v2222_v43 = vld [vmem:[%s2951_s0 + $0x50] ss:$36 sps:$4 sm:$0xff]   ;;  %v2232_v51 = vld [vmem:[%s2951_s0 + $0x98] ss:$36 sps:$4 sm:$0xff]  }
  0x11   :  { %1926 = vmatpush3.bf16.msra.mxu1 %v2190_v15  ;;  %1863 = vmatprep.subr.bf16.mxu0 %v2191_v16  ;;  %v2223_v44 = vld [vmem:[%s2950_s1 + $0x170] sm:$0xff]   ;;  %v2233_v52 = vld [vmem:[%s2950_s1 + $0x168] sm:$0xff]   ;;  %v2237_v56 = vld [vmem:[%s2951_s0 + $0xdc] ss:$36 sps:$4 sm:$0xff]  }
  0x12   :  { %1927 = vmatprep.subr.bf16.mxu1 %v2192_v17  ;;  %v2224_v45 = vld [vmem:[%s2950_s1 + $0x1f0] sm:$0xff]   ;;  %v2234_v53 = vld [vmem:[%s2950_s1 + $0x1e8] sm:$0xff]   ;;  %v2241_v58 = vld [vmem:[%s2951_s0 + $0xd8] ss:$36 sps:$4 sm:$0xff]  }
  0x13   :  { %v2225_v46 = vld [vmem:[%s2950_s1 + $0x130] sm:$0xff]   ;;  %v2235_v54 = vld [vmem:[%s2950_s1 + $0x128] sm:$0xff]   ;;  %v2242_v59 = vld [vmem:[%s2951_s0 + $0xe0] ss:$36 sps:$4 sm:$0xff]  }
  0x14   :  { %1864 = vmatpush3.bf16.msra.mxu0 %v2193_v18  ;;  %v2226_v47 = vld [vmem:[%s2950_s1 + $0x1b0] sm:$0xff]   ;;  %v2236_v55 = vld [vmem:[%s2950_s1 + $0x1a8] sm:$0xff]   ;;  %v2243_v60 = vld [vmem:[%s2950_s1 + $0x160] sm:$0xff]  }
  0x15   :  { %1928 = vmatpush3.bf16.msra.mxu1 %v2194_v19  ;;  %1865 = vmatprep.subr.bf16.mxu0 %v2195_v20  ;;  %v2231_v50 = vld [vmem:[%s2951_s0 + $0x90] ss:$36 sps:$4 sm:$0xff]   ;;  %v2244_v61 = vld [vmem:[%s2950_s1 + $0x1e0] sm:$0xff]   ;;  %v2253_v3 = vld [vmem:[%s2950_s1 + $0x158] sm:$0xff]  }
  0x16   :  { %1929 = vmatprep.subr.bf16.mxu1 %v2196_v21  ;;  %v2245_v62 = vld [vmem:[%s2950_s1 + $0x120] sm:$0xff]   ;;  %v2249_v1 = vld [vmem:[%s2951_s0 + $0x12c] ss:$36 sps:$4 sm:$0xff]   ;;  %v2254_v5 = vld [vmem:[%s2950_s1 + $0x1d8] sm:$0xff]  }
  0x17   :  { %v2246_v63 = vld [vmem:[%s2950_s1 + $0x1a0] sm:$0xff]   ;;  %v2252_v4 = vld [vmem:[%s2951_s0 + $0x128] ss:$36 sps:$4 sm:$0xff]   ;;  %v2255_v6 = vld [vmem:[%s2950_s1 + $0x118] sm:$0xff]  }
  0x18   :  { %1866 = vmatpush3.bf16.msra.mxu0 %v2197_v22  ;;  %v2247_v0 = vld [vmem:[%s2951_s0 + $0x124] ss:$36 sps:$4 sm:$0xff]   ;;  %v2256_v7 = vld [vmem:[%s2950_s1 + $0x198] sm:$0xff]   ;;  %v2257_v8 = vld [vmem:[%s2951_s0 + $0x16c] ss:$36 sps:$4 sm:$0xff]  }
  0x19   :  { %1930 = vmatpush3.bf16.msra.mxu1 %v2198_v23  ;;  %1867 = vmatprep.subr.bf16.mxu0 %v2199_v24  ;;  %v2251_v2 = vld [vmem:[%s2951_s0 + $0x120] ss:$36 sps:$4 sm:$0xff]   ;;  %v2259_v9 = vld [vmem:[%s2951_s0 + $0x174] ss:$36 sps:$4 sm:$0xff]   ;;  %v2261_v12 = vld [vmem:[%s2951_s0 + $0x168] ss:$36 sps:$4 sm:$0xff]  }
  0x1a   :  { %1931 = vmatprep.subr.bf16.mxu1 %v2200_v25  ;;  %v2263_v10 = vld [vmem:[%s2950_s1 + $0x150] sm:$0xff]   ;;  %v2269_v17 = vld [vmem:[%s2951_s0 + $0x1bc] ss:$36 sps:$4 sm:$0xff]   ;;  %v2273_v18 = vld [vmem:[%s2950_s1 + $0x148] sm:$0xff]  }
  0x1b   :  { %v2264_v11 = vld [vmem:[%s2950_s1 + $0x1d0] sm:$0xff]   ;;  %v2274_v19 = vld [vmem:[%s2950_s1 + $0x1c8] sm:$0xff]   ;;  %v2272_v23 = vld [vmem:[%s2951_s0 + $0x1b8] ss:$36 sps:$4 sm:$0xff]  }
  0x1c   :  { %1868 = vmatpush3.bf16.msra.mxu0 %v2201_v26  ;;  %v2265_v13 = vld [vmem:[%s2950_s1 + $0x110] sm:$0xff]   ;;  %v2275_v20 = vld [vmem:[%s2950_s1 + $0x108] sm:$0xff]   ;;  %v2277_v24 = vld [vmem:[%s2951_s0 + $0x1fc] ss:$36 sps:$4 sm:$0xff]  }
  0x1d   :  { %1932 = vmatpush3.bf16.msra.mxu1 %v2202_v27  ;;  %1869 = vmatprep.subr.bf16.mxu0 %v2203_v28  ;;  %v2266_v14 = vld [vmem:[%s2950_s1 + $0x190] sm:$0xff]   ;;  %v2276_v21 = vld [vmem:[%s2950_s1 + $0x188] sm:$0xff]   ;;  %v2283_v26 = vld [vmem:[%s2950_s1 + $0x140] sm:$0xff]  }
  0x1e   :  { %1933 = vmatprep.subr.bf16.mxu1 %v2204_v29  ;;  %v2262_v15 = vld [vmem:[%s2951_s0 + $0x170] ss:$36 sps:$4 sm:$0xff]   ;;  %v2279_v25 = vld [vmem:[%s2951_s0 + $0x204] ss:$36 sps:$4 sm:$0xff]  }
  0x1f   :  { %v2267_v16 = vld [vmem:[%s2951_s0 + $0x1b4] ss:$36 sps:$4 sm:$0xff]   ;;  %v2284_v27 = vld [vmem:[%s2950_s1 + $0x1c0] sm:$0xff]  }
  0x20   :  { %1870 = vmatpush3.bf16.msra.mxu0 %v2205_v30  ;;  %v2271_v22 = vld [vmem:[%s2951_s0 + $0x1b0] ss:$36 sps:$4 sm:$0xff]   ;;  %v2285_v28 = vld [vmem:[%s2950_s1 + $0x100] sm:$0xff]   ;;  %v2281_v30 = vld [vmem:[%s2951_s0 + $0x1f8] ss:$36 sps:$4 sm:$0xff]  }
  0x21   :  { %1934 = vmatpush3.bf16.msra.mxu1 %v2206_v31  ;;  %1983 = vmatprep.subr.bf16.mxu0 %v2213_v36  ;;  %v2286_v29 = vld [vmem:[%s2950_s1 + $0x180] sm:$0xff]   ;;  %v2289_v33 = vld [vmem:[%s2951_s0 + $0x14] ss:$36 sps:$4 sm:$0xff]  }
  0x22   :  { %2047 = vmatprep.subr.bf16.mxu1 %v2214_v37  ;;  %v2282_v31 = vld [vmem:[%s2951_s0 + $0x200] ss:$36 sps:$4 sm:$0xff]   ;;  %v2287_v35 = vld [vmem:[%s2951_s0 + $0x10] ss:$36 sps:$4 sm:$0xff]   ;;  %v2290_v36 = vld [vmem:[%s2951_s0 + $0x18] ss:$36 sps:$4 sm:$0xff]  }
  0x23   :  { %1079 = vmatmul.mubr.bf16.vlgmr.msra.gmra.mxu0 %v2207_v32  ;;  %v2293_v32 = vld [vmem:[%s2950_s1 + $0x238] sm:$0xff]  }
  0x24   :  { %1176 = vmatmul.mubr.bf16.vlgmr.msra.gmra.mxu1 %v2210_v34  ;;  %1984 = vmatpush3.bf16.msra.mxu0 %v2215_v38  ;;  %v2292_v34 = vld [vmem:[%s2951_s0 + $0x1c] ss:$36 sps:$4 sm:$0xff]   ;;  %v2296_v38 = vld [vmem:[%s2951_s0 + $0x64] ss:$36 sps:$4 sm:$0xff]  }
  0x25   :  { %2048 = vmatpush3.bf16.msra.mxu1 %v2216_v39  ;;  %1086 = vmatprep.mubr.bf16.mxu0 %v2217_v40  ;;  %v2294_v37 = vld [vmem:[%s2951_s0 + $0x5c] ss:$36 sps:$4 sm:$0xff]   ;;  %v2300_v39 = vld [vmem:[%s2950_s1 + $0x230] sm:$0xff]   ;;  %v2307_v40 = vld [vmem:[%s2950_s1 + $0x228] sm:$0xff]  }
  0x26   :  { %1183 = vmatprep.mubr.bf16.mxu1 %v2219_v41  ;;  %1985 = vmatprep.subr.bf16.mxu0 %v2223_v44  ;;  %v2298_v41 = vld [vmem:[%s2951_s0 + $0x58] ss:$36 sps:$4 sm:$0xff]   ;;  %v2303_v44 = vld [vmem:[%s2951_s0 + $0xac] ss:$36 sps:$4 sm:$0xff]  }
  0x27   :  { %2049 = vmatprep.subr.bf16.mxu1 %v2224_v45  ;;  %v2314_v45 = vld [vmem:[%s2950_s1 + $0x220] sm:$0xff]  }
  0x28   :  { %1986 = vmatpush3.bf16.msra.mxu0 %v2225_v46  ;;  %v2321_v46 = vld [vmem:[%s2950_s1 + $0x218] sm:$0xff]  }
  0x29   :  { %2050 = vmatpush3.bf16.msra.mxu1 %v2226_v47  ;;  %1987 = vmatprep.subr.bf16.mxu0 %v2233_v52  ;;  %v2305_v47 = vld [vmem:[%s2951_s0 + $0xa0] ss:$36 sps:$4 sm:$0xff]   ;;  %v2312_v52 = vld [vmem:[%s2951_s0 + $0xe8] ss:$36 sps:$4 sm:$0xff]  }
  0x2a   :  { %2051 = vmatprep.subr.bf16.mxu1 %v2234_v53  ;;  %v2335_v53 = vld [vmem:[%s2950_s1 + $0x208] sm:$0xff]  }
  0x2b   :  { %1087 = vmatmul.mubr.bf16.gmra.mxu0 %v2221_v42  ;;  %v2299_v42 = vld [vmem:[%s2951_s0 + $0x60] ss:$36 sps:$4 sm:$0xff]  }
  0x2c   :  { %1184 = vmatmul.mubr.bf16.gmra.mxu1 %v2222_v43  ;;  %1094 = vmatprep.mubr.bf16.mxu0 %v2227_v48  ;;  %v2301_v43 = vld [vmem:[%s2951_s0 + $0xa4] ss:$36 sps:$4 sm:$0xff]  }
  0x2d   :  { %1191 = vmatprep.mubr.bf16.mxu1 %v2229_v49  ;;  %1988 = vmatpush3.bf16.msra.mxu0 %v2235_v54  ;;  %v2306_v48 = vld [vmem:[%s2951_s0 + $0xa8] ss:$36 sps:$4 sm:$0xff]   ;;  %v2313_v54 = vld [vmem:[%s2951_s0 + $0xf0] ss:$36 sps:$4 sm:$0xff]  }
  0x2e   :  { %2052 = vmatpush3.bf16.msra.mxu1 %v2236_v55  ;;  %1989 = vmatprep.subr.bf16.mxu0 %v2243_v60  ;;  %v2308_v49 = vld [vmem:[%s2951_s0 + $0xec] ss:$36 sps:$4 sm:$0xff]   ;;  %v2315_v55 = vld [vmem:[%s2951_s0 + $0x134] ss:$36 sps:$4 sm:$0xff]   ;;  %v2322_v60 = vld [vmem:[%s2951_s0 + $0x17c] ss:$36 sps:$4 sm:$0xff]  }
  0x2f   :  { %2053 = vmatprep.subr.bf16.mxu1 %v2244_v61  ;;  %v2324_v61 = vld [vmem:[%s2951_s0 + $0x184] ss:$36 sps:$4 sm:$0xff]  }
  0x31   :  { %1990 = vmatpush3.bf16.msra.mxu0 %v2245_v62  ;;  %v2326_v62 = vld [vmem:[%s2951_s0 + $0x178] ss:$36 sps:$4 sm:$0xff]  }
  0x32   :  { %2054 = vmatpush3.bf16.msra.mxu1 %v2246_v63  ;;  %1991 = vmatprep.subr.bf16.mxu0 %v2253_v3  ;;  %v2327_v63 = vld [vmem:[%s2951_s0 + $0x180] ss:$36 sps:$4 sm:$0xff]   ;;  %v2334_v3 = vld [vmem:[%s2951_s0 + $0x1c8] ss:$36 sps:$4 sm:$0xff]  }
  0x33   :  { %1095 = vmatmul.mubr.bf16.gmra.mxu0 %v2231_v50  ;;  %2055 = vmatprep.subr.bf16.mxu1 %v2254_v5  ;;  %v2310_v50 = vld [vmem:[%s2951_s0 + $0xf4] ss:$36 sps:$4 sm:$0xff]  }
  0x34   :  { %1192 = vmatmul.mubr.bf16.gmra.mxu1 %v2232_v51  ;;  %1102 = vmatprep.mubr.bf16.mxu0 %v2237_v56  ;;  %v2328_v51 = vld [vmem:[%s2950_s1 + $0x210] sm:$0xff]   ;;  %v2317_v56 = vld [vmem:[%s2951_s0 + $0x13c] ss:$36 sps:$4 sm:$0xff]  }
  0x35   :  { %1199 = vmatprep.mubr.bf16.mxu1 %v2239_v57  ;;  %1992 = vmatpush3.bf16.msra.mxu0 %v2255_v6  ;;  %v2342_v57 = vld [vmem:[%s2950_s1 + $0x200] sm:$0xff]   ;;  %v2338_v5 = vld [vmem:[%s2951_s0 + $0x214] ss:$36 sps:$4 sm:$0xff]   ;;  %v2340_v6 = vld [vmem:[%s2951_s0 + $0x208] ss:$36 sps:$4 sm:$0xff]  }
  0x36   :  { %2056 = vmatpush3.bf16.msra.mxu1 %v2256_v7  ;;  %1993 = vmatprep.subr.bf16.mxu0 %v2263_v10  ;;  %v2341_v7 = vld [vmem:[%s2951_s0 + $0x210] ss:$36 sps:$4 sm:$0xff]   ;;  %v2345_v10 = vld [vmem:[%s2951_s0 + $0x68] ss:$36 sps:$4 sm:$0xff]  }
  0x37   :  { %2057 = vmatprep.subr.bf16.mxu1 %v2264_v11  ;;  %v2346_v11 = vld [vmem:[%s2951_s0 + $0x188] ss:$36 sps:$4 sm:$0xff]  }
  0x39   :  { %1994 = vmatpush3.bf16.msra.mxu0 %v2265_v13  ;;  %v2348_v13 = vld [vmem:[%s2951_s0 + $0x1d0] ss:$36 sps:$4 sm:$0xff]  }
  0x3a   :  { %2058 = vmatpush3.bf16.msra.mxu1 %v2266_v14  ;;  %1995 = vmatprep.subr.bf16.mxu0 %v2273_v18  ;;  %v2349_v14 = vld [vmem:[%s2951_s0 + $0xf8] ss:$36 sps:$4 sm:$0xff]   ;;  %v2806_v18 = vld [vmem:[%s2952_s2] ss:$0 sm:$0xff] }
  0x3b   :  { %1103 = vmatmul.mubr.bf16.gmra.mxu0 %v2241_v58  ;;  %2059 = vmatprep.subr.bf16.mxu1 %v2274_v19  ;;  %v2319_v58 = vld [vmem:[%s2951_s0 + $0x130] ss:$36 sps:$4 sm:$0xff]  }
  0x3c   :  { %1200 = vmatmul.mubr.bf16.gmra.mxu1 %v2242_v59  ;;  %1110 = vmatprep.mubr.bf16.mxu0 %v2247_v0  ;;  %v2320_v59 = vld [vmem:[%s2951_s0 + $0x138] ss:$36 sps:$4 sm:$0xff]   ;;  %v2329_v0 = vld [vmem:[%s2951_s0 + $0x1c4] ss:$36 sps:$4 sm:$0xff]  }
  0x3d   :  { %1207 = vmatprep.mubr.bf16.mxu1 %v2249_v1  ;;  %1996 = vmatpush3.bf16.msra.mxu0 %v2275_v20  ;;  %v2331_v1 = vld [vmem:[%s2951_s0 + $0x1cc] ss:$36 sps:$4 sm:$0xff]  }
  0x3e   :  { %2060 = vmatpush3.bf16.msra.mxu1 %v2276_v21  ;;  %1997 = vmatprep.subr.bf16.mxu0 %v2283_v26 }
  0x3f   :  { %2061 = vmatprep.subr.bf16.mxu1 %v2284_v27 }
  0x41   :  { %1998 = vmatpush3.bf16.msra.mxu0 %v2285_v28 }
  0x42   :  { %2062 = vmatpush3.bf16.msra.mxu1 %v2286_v29  ;;  %2127 = vmatprep.subr.bf16.mxu0 %v2293_v32 }
  0x43   :  { %1111 = vmatmul.mubr.bf16.gmra.mxu0 %v2251_v2  ;;  %2159 = vmatprep.subr.bf16.mxu1 %v2293_v32  ;;  %v2333_v2 = vld [vmem:[%s2951_s0 + $0x1c0] ss:$36 sps:$4 sm:$0xff]  }
  0x44   :  { %1208 = vmatmul.mubr.bf16.gmra.mxu1 %v2252_v4  ;;  %1118 = vmatprep.mubr.bf16.mxu0 %v2257_v8  ;;  %v2336_v4 = vld [vmem:[%s2951_s0 + $0x20c] ss:$36 sps:$4 sm:$0xff]   ;;  %v2343_v8 = vld [vmem:[%s2951_s0 + $0x20] ss:$36 sps:$4 sm:$0xff]  }
  0x45   :  { %1215 = vmatprep.mubr.bf16.mxu1 %v2259_v9  ;;  %v2344_v9 = vld [vmem:[%s2951_s0 + $0x140] ss:$36 sps:$4 sm:$0xff]  }
  0x4b   :  { %1119 = vmatmul.mubr.bf16.gmra.mxu0 %v2261_v12  ;;  %v2347_v12 = vld [vmem:[%s2951_s0 + $0xb0] ss:$36 sps:$4 sm:$0xff]  }
  0x4c   :  { %1216 = vmatmul.mubr.bf16.gmra.mxu1 %v2262_v15  ;;  %1126 = vmatprep.mubr.bf16.mxu0 %v2267_v16  ;;  %v2350_v15 = vld [vmem:[%s2951_s0 + $0x218] ss:$36 sps:$4 sm:$0xff]  }
  0x4d   :  { %1223 = vmatprep.mubr.bf16.mxu1 %v2269_v17 }
  0x53   :  { %1127 = vmatmul.mubr.bf16.gmra.mxu0 %v2271_v22 }
  0x54   :  { %1224 = vmatmul.mubr.bf16.gmra.mxu1 %v2272_v23  ;;  %1134 = vmatprep.mubr.bf16.mxu0 %v2277_v24 }
  0x55   :  { %1231 = vmatprep.mubr.bf16.mxu1 %v2279_v25 }
  0x5b   :  { %1135 = vmatmul.mubr.bf16.gmra.mxu0 %v2281_v30 }
  0x5c   :  { %1232 = vmatmul.mubr.bf16.gmra.mxu1 %v2282_v31  ;;  %1272 = vmatprep.mubr.bf16.mxu0 %v2289_v33 }
  0x5d   :  { %1369 = vmatprep.mubr.bf16.mxu1 %v2292_v34 }
  0x63   :  { %1273 = vmatmul.mubr.bf16.vlgmr.msra.gmra.mxu0 %v2287_v35 }
  0x64   :  { %1370 = vmatmul.mubr.bf16.vlgmr.msra.gmra.mxu1 %v2290_v36  ;;  %2128 = vmatpush3.bf16.msra.mxu0 %v2293_v32 }
  0x65   :  { %2167 = vmatpush3.bf16.msra.mxu1 %v2293_v32  ;;  %1280 = vmatprep.mubr.bf16.mxu0 %v2294_v37 }
  0x66   :  { %1377 = vmatprep.mubr.bf16.mxu1 %v2296_v38  ;;  %2129 = vmatprep.subr.bf16.mxu0 %v2300_v39 }
  0x67   :  { %2160 = vmatprep.subr.bf16.mxu1 %v2300_v39 }
  0x68   :  { %2130 = vmatpush3.bf16.msra.mxu0 %v2300_v39 }
  0x69   :  { %2168 = vmatpush3.bf16.msra.mxu1 %v2300_v39  ;;  %2131 = vmatprep.subr.bf16.mxu0 %v2307_v40 }
  0x6a   :  { %2161 = vmatprep.subr.bf16.mxu1 %v2307_v40 }
  0x6b   :  { %1281 = vmatmul.mubr.bf16.gmra.mxu0 %v2298_v41 }
  0x6c   :  { %1378 = vmatmul.mubr.bf16.gmra.mxu1 %v2299_v42  ;;  %1288 = vmatprep.mubr.bf16.mxu0 %v2301_v43 }
  0x6d   :  { %1385 = vmatprep.mubr.bf16.mxu1 %v2303_v44  ;;  %2132 = vmatpush3.bf16.msra.mxu0 %v2307_v40 }
  0x6e   :  { %2169 = vmatpush3.bf16.msra.mxu1 %v2307_v40  ;;  %2133 = vmatprep.subr.bf16.mxu0 %v2314_v45 }
  0x6f   :  { %2162 = vmatprep.subr.bf16.mxu1 %v2314_v45 }
  0x71   :  { %2134 = vmatpush3.bf16.msra.mxu0 %v2314_v45 }
  0x72   :  { %2170 = vmatpush3.bf16.msra.mxu1 %v2314_v45  ;;  %2135 = vmatprep.subr.bf16.mxu0 %v2321_v46 }
  0x73   :  { %1289 = vmatmul.mubr.bf16.gmra.mxu0 %v2305_v47  ;;  %2163 = vmatprep.subr.bf16.mxu1 %v2321_v46 }
  0x74   :  { %1386 = vmatmul.mubr.bf16.gmra.mxu1 %v2306_v48  ;;  %1296 = vmatprep.mubr.bf16.mxu0 %v2308_v49 }
  0x75   :  { %1393 = vmatprep.mubr.bf16.mxu1 %v2310_v50  ;;  %2136 = vmatpush3.bf16.msra.mxu0 %v2321_v46 }
  0x76   :  { %2171 = vmatpush3.bf16.msra.mxu1 %v2321_v46  ;;  %2137 = vmatprep.subr.bf16.mxu0 %v2328_v51 }
  0x77   :  { %2164 = vmatprep.subr.bf16.mxu1 %v2328_v51 }
  0x79   :  { %2138 = vmatpush3.bf16.msra.mxu0 %v2328_v51 }
  0x7a   :  { %2172 = vmatpush3.bf16.msra.mxu1 %v2328_v51  ;;  %2139 = vmatprep.subr.bf16.mxu0 %v2335_v53 }
  0x7b   :  { %1297 = vmatmul.mubr.bf16.gmra.mxu0 %v2312_v52  ;;  %2165 = vmatprep.subr.bf16.mxu1 %v2335_v53 }
  0x7c   :  { %1394 = vmatmul.mubr.bf16.gmra.mxu1 %v2313_v54  ;;  %1304 = vmatprep.mubr.bf16.mxu0 %v2315_v55 }
  0x7d   :  { %1401 = vmatprep.mubr.bf16.mxu1 %v2317_v56  ;;  %2140 = vmatpush3.bf16.msra.mxu0 %v2335_v53 }
  0x7e   :  { %2173 = vmatpush3.bf16.msra.mxu1 %v2335_v53  ;;  %2141 = vmatprep.subr.bf16.mxu0 %v2342_v57 }
  0x7f   :  { %2166 = vmatprep.subr.bf16.mxu1 %v2342_v57 }
  0x81   :  { %2142 = vmatpush3.bf16.msra.mxu0 %v2342_v57 }
  0x82   :  { %2174 = vmatpush3.bf16.msra.mxu1 %v2342_v57 }
  0x83   :  { %1305 = vmatmul.mubr.bf16.gmra.mxu0 %v2319_v58 }
  0x84   :  { %1402 = vmatmul.mubr.bf16.gmra.mxu1 %v2320_v59  ;;  %1312 = vmatprep.mubr.bf16.mxu0 %v2322_v60 }
  0x85   :  { %1409 = vmatprep.mubr.bf16.mxu1 %v2324_v61 }
  0x8b   :  { %1313 = vmatmul.mubr.bf16.gmra.mxu0 %v2326_v62 }
  0x8c   :  { %1410 = vmatmul.mubr.bf16.gmra.mxu1 %v2327_v63  ;;  %1320 = vmatprep.mubr.bf16.mxu0 %v2329_v0 }
  0x8d   :  { %1417 = vmatprep.mubr.bf16.mxu1 %v2331_v1 }
  0x93   :  { %1321 = vmatmul.mubr.bf16.gmra.mxu0 %v2333_v2 }
  0x94   :  { %1418 = vmatmul.mubr.bf16.gmra.mxu1 %v2334_v3  ;;  %1328 = vmatprep.mubr.bf16.mxu0 %v2336_v4 }
  0x95   :  { %1425 = vmatprep.mubr.bf16.mxu1 %v2338_v5 }
  0x9b   :  { %1329 = vmatmul.mubr.bf16.gmra.mxu0 %v2340_v6 }
  0x9c   :  { %1426 = vmatmul.mubr.bf16.gmra.mxu1 %v2341_v7  ;;  %2143 = vmatprep.mubr.bf16.mxu0 %v2343_v8 }
  0x9d   :  { %2151 = vmatprep.mubr.bf16.mxu1 %v2344_v9 }
  0xa3   :  { %2144 = vmatmul.mubr.bf16.vlgmr.msra.gmra.mxu0 %v2345_v10 }
  0xa4   :  { %2152 = vmatmul.mubr.bf16.vlgmr.msra.gmra.mxu1 %v2346_v11  ;;  %2147 = vmatprep.mubr.bf16.mxu0 %v2347_v12 }
  0xa5   :  { %2155 = vmatprep.mubr.bf16.mxu1 %v2348_v13 }
  0xab   :  { %2148 = vmatmul.mubr.bf16.gmra.mxu0 %v2349_v14 }
  0xac   :  { %2156 = vmatmul.mubr.bf16.gmra.mxu1 %v2350_v15 }
  0xe3   :  { %v1871_v16 = vpop.f32.mrf.mxu0 }
  0xe4   :  { %v1935_v17 = vpop.f32.mrf.mxu1 }
  0xe5   :  { %v1872_v19 = vpop.f32.mrf.mxu0 }
  0xe6   :  { %v1873_v20 = vadd.f32 %v1872_v19, %v1871_v16  ;;  %v1936_v21 = vpop.f32.mrf.mxu1 }
  0xe7   :  { %v1937_v22 = vadd.f32 %v1936_v21, %v1935_v17  ;;  %v1874_v23 = vpop.f32.mrf.mxu0 }
  0xe8   :  { %v1081_v24 = vadd.f32 %v1873_v20, %v2806_v18  ;;  %v1938_v25 = vpop.f32.mrf.mxu1 }
  0xe9   :  { %v1875_v26 = vpop.f32.mrf.mxu0 }
  0xea   :  { %v2809_v27 = vadd.f32 %v1937_v22, %v1081_v24  ;;  %v1876_v28 = vadd.f32 %v1875_v26, %v1874_v23  ;;  %v1939_v29 = vpop.f32.mrf.mxu1 }
  0xeb   :  { %v1940_v30 = vadd.f32 %v1939_v29, %v1938_v25  ;;  %v1877_v31 = vpop.f32.mrf.mxu0 }
  0xec   :  { %v1084_v32 = vadd.f32 %v1876_v28, %v2806_v18  ;;  %v1941_v33 = vpop.f32.mrf.mxu1 }
  0xed   :  { %v1878_v34 = vpop.f32.mrf.mxu0 }
  0xee   :  { %v2812_v35 = vadd.f32 %v1940_v30, %v1084_v32  ;;  %v1879_v36 = vadd.f32 %v1878_v34, %v1877_v31  ;;  %v1942_v37 = vpop.f32.mrf.mxu1 }
  0xef   :  { %v1943_v38 = vadd.f32 %v1942_v37, %v1941_v33  ;;  %v1880_v39 = vpop.f32.mrf.mxu0 }
  0xf0   :  { %v1089_v40 = vadd.f32 %v1879_v36, %v2806_v18  ;;  %v1944_v41 = vpop.f32.mrf.mxu1 }
  0xf1   :  { %v1881_v42 = vpop.f32.mrf.mxu0 }
  0xf2   :  { %v2815_v43 = vadd.f32 %v1943_v38, %v1089_v40  ;;  %v1882_v44 = vadd.f32 %v1881_v42, %v1880_v39  ;;  %v1945_v45 = vpop.f32.mrf.mxu1 }
  0xf3   :  { %v1946_v46 = vadd.f32 %v1945_v45, %v1944_v41  ;;  %v1883_v47 = vpop.f32.mrf.mxu0 }
  0xf4   :  { %v1092_v48 = vadd.f32 %v1882_v44, %v2806_v18  ;;  %v1947_v49 = vpop.f32.mrf.mxu1 }
  0xf5   :  { %v1884_v50 = vpop.f32.mrf.mxu0 }
  0xf6   :  { %v2818_v51 = vadd.f32 %v1946_v46, %v1092_v48  ;;  %v1885_v52 = vadd.f32 %v1884_v50, %v1883_v47  ;;  %v1948_v53 = vpop.f32.mrf.mxu1 }
  0xf7   :  { %v1949_v54 = vadd.f32 %v1948_v53, %v1947_v49  ;;  %v1886_v55 = vpop.f32.mrf.mxu0 }
  0xf8   :  { %v1097_v56 = vadd.f32 %v1885_v52, %v2806_v18  ;;  %v1950_v57 = vpop.f32.mrf.mxu1 }
  0xf9   :  { %v1887_v58 = vpop.f32.mrf.mxu0 }
  0xfa   :  { %v2821_v59 = vadd.f32 %v1949_v54, %v1097_v56  ;;  %v1888_v60 = vadd.f32 %v1887_v58, %v1886_v55  ;;  %v1951_v61 = vpop.f32.mrf.mxu1 }
  0xfb   :  { %v1952_v62 = vadd.f32 %v1951_v61, %v1950_v57  ;;  %v1889_v63 = vpop.f32.mrf.mxu0 }
  0xfc   :  { %v1100_v0 = vadd.f32 %v1888_v60, %v2806_v18  ;;  %v1953_v1 = vpop.f32.mrf.mxu1 }
  0xfd   :  { %v1890_v2 = vpop.f32.mrf.mxu0 }
  0xfe   :  { %v2824_v3 = vadd.f32 %v1952_v62, %v1100_v0  ;;  %v1891_v4 = vadd.f32 %v1890_v2, %v1889_v63  ;;  %v1954_v5 = vpop.f32.mrf.mxu1 }
  0xff   :  { %v1955_v6 = vadd.f32 %v1954_v5, %v1953_v1  ;;  %v1892_v7 = vpop.f32.mrf.mxu0 }
 0x100   :  { %2954 = vst [vmem:[#allocation2_spill] sm:$0xff] %v2824_v3  ;;  %v1105_v8 = vadd.f32 %v1891_v4, %v2806_v18  ;;  %v1956_v9 = vpop.f32.mrf.mxu1 }
 0x101   :  { %v1893_v10 = vpop.f32.mrf.mxu0 }
 0x102   :  { %v2827_v11 = vadd.f32 %v1955_v6, %v1105_v8  ;;  %v1894_v12 = vadd.f32 %v1893_v10, %v1892_v7  ;;  %v1957_v13 = vpop.f32.mrf.mxu1 }
 0x103   :  { %v1958_v14 = vadd.f32 %v1957_v13, %v1956_v9  ;;  %v1895_v15 = vpop.f32.mrf.mxu0 }
 0x104   :  { %v1108_v16 = vadd.f32 %v1894_v12, %v2806_v18  ;;  %v1959_v17 = vpop.f32.mrf.mxu1 }
 0x105   :  { %v1896_v19 = vpop.f32.mrf.mxu0 }
 0x106   :  { %v2830_v20 = vadd.f32 %v1958_v14, %v1108_v16  ;;  %v1897_v21 = vadd.f32 %v1896_v19, %v1895_v15  ;;  %v1960_v22 = vpop.f32.mrf.mxu1 }
 0x107   :  { %v1961_v23 = vadd.f32 %v1960_v22, %v1959_v17  ;;  %v1898_v24 = vpop.f32.mrf.mxu0 }
 0x108   :  { %2955 = vst [vmem:[#allocation3_spill] sm:$0xff] %v2830_v20  ;;  %v1113_v25 = vadd.f32 %v1897_v21, %v2806_v18  ;;  %v1962_v26 = vpop.f32.mrf.mxu1 }
 0x109   :  { %v1899_v28 = vpop.f32.mrf.mxu0 }
 0x10a   :  { %v2833_v29 = vadd.f32 %v1961_v23, %v1113_v25  ;;  %v1900_v30 = vadd.f32 %v1899_v28, %v1898_v24  ;;  %v1963_v31 = vpop.f32.mrf.mxu1 }
 0x10b   :  { %v1964_v32 = vadd.f32 %v1963_v31, %v1962_v26  ;;  %v1901_v33 = vpop.f32.mrf.mxu0 }
 0x10c   :  { %v1116_v34 = vadd.f32 %v1900_v30, %v2806_v18  ;;  %v1965_v36 = vpop.f32.mrf.mxu1 }
 0x10d   :  { %v1902_v37 = vpop.f32.mrf.mxu0 }
 0x10e   :  { %v2836_v38 = vadd.f32 %v1964_v32, %v1116_v34  ;;  %v1903_v39 = vadd.f32 %v1902_v37, %v1901_v33  ;;  %v1966_v40 = vpop.f32.mrf.mxu1 }
 0x10f   :  { %v1967_v41 = vadd.f32 %v1966_v40, %v1965_v36  ;;  %v1904_v42 = vpop.f32.mrf.mxu0 }
 0x110   :  { %2956 = vst [vmem:[#allocation4_spill] sm:$0xff] %v2836_v38  ;;  %v1121_v44 = vadd.f32 %v1903_v39, %v2806_v18  ;;  %v1968_v45 = vpop.f32.mrf.mxu1 }
 0x111   :  { %v1905_v46 = vpop.f32.mrf.mxu0 }
 0x112   :  { %v2839_v47 = vadd.f32 %v1967_v41, %v1121_v44  ;;  %v1906_v48 = vadd.f32 %v1905_v46, %v1904_v42  ;;  %v1969_v49 = vpop.f32.mrf.mxu1 }
 0x113   :  { %v1970_v50 = vadd.f32 %v1969_v49, %v1968_v45  ;;  %v1907_v52 = vpop.f32.mrf.mxu0 }
 0x114   :  { %v1124_v53 = vadd.f32 %v1906_v48, %v2806_v18  ;;  %v1971_v54 = vpop.f32.mrf.mxu1 }
 0x115   :  { %v1908_v55 = vpop.f32.mrf.mxu0 }
 0x116   :  { %v2842_v56 = vadd.f32 %v1970_v50, %v1124_v53  ;;  %v1909_v57 = vadd.f32 %v1908_v55, %v1907_v52  ;;  %v1972_v58 = vpop.f32.mrf.mxu1 }
 0x117   :  { %v1973_v60 = vadd.f32 %v1972_v58, %v1971_v54  ;;  %v1910_v61 = vpop.f32.mrf.mxu0 }
 0x118   :  { %2957 = vst [vmem:[#allocation5_spill] sm:$0xff] %v2842_v56  ;;  %v1129_v62 = vadd.f32 %v1909_v57, %v2806_v18  ;;  %v1974_v63 = vpop.f32.mrf.mxu1 }
 0x119   :  { %v1911_v0 = vpop.f32.mrf.mxu0 }
 0x11a   :  { %v2845_v1 = vadd.f32 %v1973_v60, %v1129_v62  ;;  %v1912_v2 = vadd.f32 %v1911_v0, %v1910_v61  ;;  %v1975_v4 = vpop.f32.mrf.mxu1 }
 0x11b   :  { %v1976_v5 = vadd.f32 %v1975_v4, %v1974_v63  ;;  %v1913_v6 = vpop.f32.mrf.mxu0 }
 0x11c   :  { %2958 = vst [vmem:[#allocation6_spill] sm:$0xff] %v2845_v1  ;;  %v1132_v7 = vadd.f32 %v1912_v2, %v2806_v18  ;;  %v1977_v8 = vpop.f32.mrf.mxu1 }
 0x11d   :  { %v1914_v9 = vpop.f32.mrf.mxu0 }
 0x11e   :  { %v2848_v10 = vadd.f32 %v1976_v5, %v1132_v7  ;;  %v1915_v12 = vadd.f32 %v1914_v9, %v1913_v6  ;;  %v1978_v13 = vpop.f32.mrf.mxu1 }
 0x11f   :  { %v1979_v14 = vadd.f32 %v1978_v13, %v1977_v8  ;;  %v1916_v15 = vpop.f32.mrf.mxu0 }
 0x120   :  { %2959 = vst [vmem:[#allocation7_spill] sm:$0xff] %v2848_v10  ;;  %v1137_v16 = vadd.f32 %v1915_v12, %v2806_v18  ;;  %v1980_v17 = vpop.f32.mrf.mxu1 }
 0x121   :  { %v1917_v19 = vpop.f32.mrf.mxu0 }
 0x122   :  { %v2851_v21 = vadd.f32 %v1979_v14, %v1137_v16  ;;  %v1918_v22 = vadd.f32 %v1917_v19, %v1916_v15  ;;  %v1981_v23 = vpop.f32.mrf.mxu1 }
 0x123   :  { %v1982_v24 = vadd.f32 %v1981_v23, %v1980_v17  ;;  %v1999_v25 = vpop.f32.mrf.mxu0 }
 0x124   :  { %2960 = vst [vmem:[#allocation8_spill] sm:$0xff] %v2851_v21  ;;  %v1140_v26 = vadd.f32 %v1918_v22, %v2806_v18  ;;  %v2063_v28 = vpop.f32.mrf.mxu1 }
 0x125   :  { %v2000_v30 = vpop.f32.mrf.mxu0 }
 0x126   :  { %v2854_v31 = vadd.f32 %v1982_v24, %v1140_v26  ;;  %v2001_v32 = vadd.f32 %v2000_v30, %v1999_v25  ;;  %v2064_v33 = vpop.f32.mrf.mxu1 }
 0x127   :  { %v2002_v34 = vpop.f32.mrf.mxu0  ;;  %v2065_v37 = vadd.f32 %v2064_v33, %v2063_v28 }
 0x128   :  { %2961 = vst [vmem:[#allocation9_spill] sm:$0xff] %v2854_v31  ;;  %v1275_v36 = vadd.f32 %v2001_v32, %v2809_v27  ;;  %v2857_v39 = vpop.f32.mrf.mxu1 }
 0x129   :  { %v2003_v40 = vpop.f32.mrf.mxu0 }
 0x12a   :  { %v2859_v41 = vpop.f32.mrf.mxu1  ;;  %v2861_v42 = vadd.f32 %v2065_v37, %v1275_v36  ;;  %v2004_v10 = vadd.f32 %v2003_v40, %v2002_v34 }
 0x12b   :  { %v2005_v44 = vpop.f32.mrf.mxu0 }
 0x12c   :  { %2962 = vst [vmem:[#allocation10_spill] sm:$0xff] %v2861_v42  ;;  %v2069_v45 = vpop.f32.mrf.mxu1  ;;  %v1278_v56 = vadd.f32 %v2004_v10, %v2812_v35 }
 0x12d   :  { %v2006_v18 = vpop.f32.mrf.mxu0 }
 0x12e   :  { %v2070_v46 = vpop.f32.mrf.mxu1  ;;  %v2007_v42 = vadd.f32 %v2006_v18, %v2005_v44  ;;  %v2068_v44 = vadd.f32 %v2859_v41, %v2857_v39 }
 0x12f   :  { %v2008_v48 = vpop.f32.mrf.mxu0  ;;  %v2071_v18 = vadd.f32 %v2070_v46, %v2069_v45 }
 0x130   :  { %v2072_v49 = vpop.f32.mrf.mxu1 }
 0x131   :  { %v2009_v50 = vpop.f32.mrf.mxu0 }
 0x132   :  { %v2073_v52 = vpop.f32.mrf.mxu1  ;;  %v2010_v21 = vadd.f32 %v2009_v50, %v2008_v48 }
 0x133   :  { %v2011_v53 = vpop.f32.mrf.mxu0  ;;  %v2074_v48 = vadd.f32 %v2073_v52, %v2072_v49 }
 0x134   :  { %v2075_v54 = vpop.f32.mrf.mxu1 }
 0x135   :  { %v2012_v55 = vpop.f32.mrf.mxu0 }
 0x136   :  { %v2076_v27 = vpop.f32.mrf.mxu1 }
 0x137   :  { %v2014_v57 = vpop.f32.mrf.mxu0 }
 0x138   :  { %v2863_v58 = vpop.f32.mrf.mxu1 }
 0x139   :  { %v2015_v60 = vpop.f32.mrf.mxu0 }
 0x13a   :  { %v2865_v61 = vpop.f32.mrf.mxu1  ;;  %v2016_v35 = vadd.f32 %v2015_v60, %v2014_v57 }
 0x13b   :  { %v2017_v62 = vpop.f32.mrf.mxu0  ;;  %v2899_v41 = vadd.f32 %v2865_v61, %v2863_v58 }
 0x13c   :  { %v2867_v63 = vpop.f32.mrf.mxu1 }
 0x13d   :  { %v2018_v0 = vpop.f32.mrf.mxu0 }
 0x13e   :  { %v2082_v2 = vpop.f32.mrf.mxu1  ;;  %v2019_v38 = vadd.f32 %v2018_v0, %v2017_v62 }
 0x13f   :  { %v2020_v4 = vpop.f32.mrf.mxu0  ;;  %v2083_v45 = vadd.f32 %v2082_v2, %v2867_v63 }
 0x140   :  { %v2869_v5 = vpop.f32.mrf.mxu1 }
 0x141   :  { %2963 = vst [vmem:[#allocation11_spill] sm:$0xff] %v2869_v5  ;;  %v2021_v6 = vpop.f32.mrf.mxu0 }
 0x142   :  { %v2871_v7 = vpop.f32.mrf.mxu1  ;;  %v2022_v46 = vadd.f32 %v2021_v6, %v2020_v4 }
 0x143   :  { %2964 = vst [vmem:[#allocation12_spill] sm:$0xff] %v2871_v7  ;;  %v2023_v8 = vpop.f32.mrf.mxu0  ;;  %v2013_v7 = vadd.f32 %v2012_v55, %v2011_v53  ;;  %v2077_v55 = vadd.f32 %v2076_v27, %v2075_v54  ;;  %v2971_v27 = vld [vmem:[#allocation5_spill] sm:$0xff] }
 0x144   :  { %v2873_v9 = vpop.f32.mrf.mxu1 }
 0x145   :  { %2965 = vst [vmem:[#allocation13_spill] sm:$0xff] %v2873_v9  ;;  %v2024_v12 = vpop.f32.mrf.mxu0  ;;  %v1291_v34 = vadd.f32 %v2013_v7, %v2821_v59 }
 0x146   :  { %v2088_v13 = vpop.f32.mrf.mxu1  ;;  %v2025_v50 = vadd.f32 %v2024_v12, %v2023_v8 }
 0x147   :  { %v2026_v14 = vpop.f32.mrf.mxu0  ;;  %v2895_v39 = vadd.f32 %v2077_v55, %v1291_v34  ;;  %v2981_v55 = vld [vmem:[#allocation7_spill] sm:$0xff] }
 0x148   :  { %v2090_v15 = vpop.f32.mrf.mxu1  ;;  %v1307_v49 = vadd.f32 %v2025_v50, %v2833_v29 }
 0x149   :  { %v2027_v16 = vpop.f32.mrf.mxu0 }
 0x14a   :  { %v2091_v17 = vpop.f32.mrf.mxu1  ;;  %v2028_v10 = vadd.f32 %v2027_v16, %v2026_v14 }
 0x14b   :  { %v2029_v19 = vpop.f32.mrf.mxu0  ;;  %v2092_v14 = vadd.f32 %v2091_v17, %v2090_v15 }
 0x14c   :  { %v2093_v22 = vpop.f32.mrf.mxu1  ;;  %v2972_v8 = vld [vmem:[#allocation13_spill] sm:$0xff] }
 0x14d   :  { %v2030_v23 = vpop.f32.mrf.mxu0  ;;  %v2089_v12 = vadd.f32 %v2088_v13, %v2972_v8 }
 0x14e   :  { %v2094_v24 = vpop.f32.mrf.mxu1  ;;  %v2031_v40 = vadd.f32 %v2030_v23, %v2029_v19  ;;  %v2973_v23 = vld [vmem:[#allocation3_spill] sm:$0xff] }
 0x14f   :  { %v2032_v25 = vpop.f32.mrf.mxu0  ;;  %v2095_v54 = vadd.f32 %v2094_v24, %v2093_v22  ;;  %v1404_v24 = vadd.f32 %v2089_v12, %v1307_v49 }
 0x150   :  { %v2096_v26 = vpop.f32.mrf.mxu1  ;;  %v1315_v59 = vadd.f32 %v2031_v40, %v2839_v47 }
 0x151   :  { %v2033_v28 = vpop.f32.mrf.mxu0 }
 0x152   :  { %v2097_v30 = vpop.f32.mrf.mxu1  ;;  %v2034_v62 = vadd.f32 %v2033_v28, %v2032_v25  ;;  %v1412_v29 = vadd.f32 %v2095_v54, %v1315_v59  ;;  %v1302_v25 = vadd.f32 %v2022_v46, %v2973_v23  ;;  %v2974_v28 = vld [vmem:[#allocation11_spill] sm:$0xff]  ;;  %v2982_v46 = vld [vmem:[#allocation9_spill] sm:$0xff] }
 0x153   :  { %v2035_v32 = vpop.f32.mrf.mxu0  ;;  %v2098_v63 = vadd.f32 %v2097_v30, %v2096_v26  ;;  %v2978_v30 = vld [vmem:[#allocation8_spill] sm:$0xff] }
 0x154   :  { %v2875_v33 = vpop.f32.mrf.mxu1  ;;  %v1318_v57 = vadd.f32 %v2034_v62, %v2971_v27 }
 0x155   :  { %2966 = vst [vmem:[#allocation14_spill] sm:$0xff] %v2875_v33  ;;  %v2036_v36 = vpop.f32.mrf.mxu0  ;;  %v1283_v33 = vadd.f32 %v2007_v42, %v2815_v43  ;;  %v1299_v43 = vadd.f32 %v2019_v38, %v2827_v11  ;;  %v2969_v38 = vld [vmem:[#allocation2_spill] sm:$0xff] }
 0x156   :  { %v2877_v37 = vpop.f32.mrf.mxu1  ;;  %v2904_v52 = vadd.f32 %v2016_v35, %v2969_v38  ;;  %v2037_v2 = vadd.f32 %v2036_v36, %v2035_v32  ;;  %v1415_v15 = vadd.f32 %v2098_v63, %v1318_v57 }
 0x157   :  { %2967 = vst [vmem:[#allocation15_spill] sm:$0xff] %v2877_v37  ;;  %v2038_v31 = vpop.f32.mrf.mxu0  ;;  %v1286_v37 = vadd.f32 %v2010_v21, %v2818_v51  ;;  %v1375_v51 = vadd.f32 %v2068_v44, %v1278_v56  ;;  %v1380_v7 = vadd.f32 %v2071_v18, %v1283_v33  ;;  %v2970_v56 = vld [vmem:[#allocation4_spill] sm:$0xff]  ;;  %v1396_v16 = vadd.f32 %v2083_v45, %v1299_v43 }
 0x158   :  { %v2879_v1 = vpop.f32.mrf.mxu1  ;;  %v1310_v47 = vadd.f32 %v2028_v10, %v2970_v56  ;;  %v2975_v33 = vld [vmem:[#allocation12_spill] sm:$0xff] }
 0x159   :  { %2968 = vst [vmem:[#allocation16_spill] sm:$0xff] %v2879_v1  ;;  %v2039_v5 = vpop.f32.mrf.mxu0  ;;  %v1383_v19 = vadd.f32 %v2074_v48, %v1286_v37  ;;  %v2086_v37 = vadd.f32 %v2975_v33, %v2974_v28  ;;  %v2980_v48 = vld [vmem:[#allocation6_spill] sm:$0xff] }
 0x15a   :  { %v2881_v20 = vpop.f32.mrf.mxu1  ;;  %v2040_v4 = vadd.f32 %v2039_v5, %v2038_v31  ;;  %v2979_v5 = vld [vmem:[#allocation10_spill] sm:$0xff]  ;;  %v1323_v50 = vadd.f32 %v2037_v2, %v2980_v48 }
 0x15b   :  { %v2041_v9 = vpop.f32.mrf.mxu0 }
 0x15c   :  { %v2884_v3 = vpop.f32.mrf.mxu1  ;;  %v1326_v35 = vadd.f32 %v2040_v4, %v2981_v55  ;;  %v1399_v4 = vadd.f32 %v2086_v37, %v1302_v25  ;;  %v1391_v25 = vadd.f32 %v2899_v41, %v2904_v52 }
 0x15d   :  { %v2042_v1 = vpop.f32.mrf.mxu0 }
 0x15e   :  { %v2106_v53 = vpop.f32.mrf.mxu1  ;;  %v2043_v58 = vadd.f32 %v2042_v1, %v2041_v9  ;;  %v1407_v1 = vadd.f32 %v2092_v14, %v1310_v47  ;;  %v2976_v9 = vld [vmem:[#allocation14_spill] sm:$0xff]  ;;  %v2977_v17 = vld [vmem:[#allocation15_spill] sm:$0xff] }
 0x15f   :  { %v2044_v0 = vpop.f32.mrf.mxu0  ;;  %v2101_v26 = vadd.f32 %v2977_v17, %v2976_v9  ;;  %v2107_v43 = vadd.f32 %v2106_v53, %v2884_v3 }
 0x160   :  { %v2892_v42 = vpop.f32.mrf.mxu1  ;;  %v1331_v31 = vadd.f32 %v2043_v58, %v2978_v30 }
 0x161   :  { %v2045_v21 = vpop.f32.mrf.mxu0  ;;  %v1420_v63 = vadd.f32 %v2101_v26, %v1323_v50 }
 0x162   :  { %v2109_v11 = vpop.f32.mrf.mxu1  ;;  %v2046_v40 = vadd.f32 %v2045_v21, %v2044_v0 }
 0x163   :  { %v2145_v60 = vpop.f32.mrf.mxu0  ;;  %v2110_v12 = vadd.f32 %v2109_v11, %v2892_v42 }
 0x164   :  { %v2153_v61 = vpop.f32.mrf.mxu1  ;;  %v1477_v22 = vadd.f32 %v2145_v60, %v1380_v7  ;;  %v1334_v49 = vadd.f32 %v2046_v40, %v2982_v46  ;;  %v1428_v60 = vadd.f32 %v2107_v43, %v1331_v31 }
 0x165   :  { %v1468_v6 = vpop.f32.mrf.mxu0  ;;  %v1509_v44 = vadd.f32 %v2153_v61, %v1412_v29  ;;  %v2983_v29 = vld [vmem:[#allocation16_spill] sm:$0xff] }
 0x166   :  { %v1500_v34 = vpop.f32.mrf.mxu1  ;;  %v1469_v32 = vadd.f32 %v1468_v6, %v2979_v5  ;;  %v1533_v59 = vmax.f32 %v1477_v22, 0.0  ;;  %v2104_v6 = vadd.f32 %v2881_v20, %v2983_v29  ;;  %v1431_v28 = vadd.f32 %v2110_v12, %v1334_v49 }
 0x167   :  { %v2146_v13 = vpop.f32.mrf.mxu0  ;;  %v1501_v10 = vadd.f32 %v1500_v34, %v1404_v24  ;;  %v1541_v38 = vmax.f32 %v1509_v44, 0.0 }
 0x168   :  { %v1480_v36 = vadd.f32 %v2146_v13, %v1383_v19  ;;  %v2154_v18 = vpop.f32.mrf.mxu1  ;;  %v1531_v54 = vmax.f32 %v1469_v32, 0.0  ;;  %v1423_v34 = vadd.f32 %v2104_v6, %v1326_v35 }
 0x169   :  { %v1512_v62 = vadd.f32 %v2154_v18, %v1415_v15  ;;  %v1471_v0 = vpop.f32.mrf.mxu0  ;;  %v1539_v14 = vmax.f32 %v1501_v10, 0.0 }
 0x16a   :  { %v1534_v21 = vmax.f32 %v1480_v36, 0.0  ;;  %v1472_v7 = vadd.f32 %v1471_v0, %v1375_v51  ;;  %v1503_v45 = vpop.f32.mrf.mxu1 }
 0x16b   :  { %v1542_v56 = vmax.f32 %v1512_v62, 0.0  ;;  %v1504_v47 = vadd.f32 %v1503_v45, %v1407_v1  ;;  %v2149_v19 = vpop.f32.mrf.mxu0 }
 0x16c   :  { %v1816_v27 = vpack.c.bf16 %v1534_v21, %v1533_v59  ;;  %v1532_v57 = vmax.f32 %v1472_v7, 0.0  ;;  %v2157_v8 = vpop.f32.mrf.mxu1  ;;  %v1493_v61 = vadd.f32 %v2149_v19, %v1396_v16 }
 0x16d   :  { %v1836_v58 = vpack.c.bf16 %v1542_v56, %v1541_v38  ;;  %v1540_v3 = vmax.f32 %v1504_v47, 0.0  ;;  %v1484_v53 = vpop.f32.mrf.mxu0  ;;  %v1525_v11 = vadd.f32 %v2157_v8, %v1428_v60 }
 0x16e   :  { %1848 = vst [vmem:[%s2953_s3 + $0x8] sm:$0xff] %v1816_v27   ;;  %v1811_v51 = vpack.c.bf16 %v1532_v57, %v1531_v54  ;;  %v1516_v2 = vpop.f32.mrf.mxu1  ;;  %v1485_v16 = vadd.f32 %v1484_v53, %v2895_v39  ;;  %v1537_v40 = vmax.f32 %v1493_v61, 0.0 }
 0x16f   :  { %1852 = vst [vmem:[%s2953_s3 + $0x28] sm:$0xff] %v1836_v58   ;;  %v1831_v42 = vpack.c.bf16 %v1540_v3, %v1539_v14  ;;  %v2150_v23 = vpop.f32.mrf.mxu0  ;;  %v1517_v20 = vadd.f32 %v1516_v2, %v1420_v63  ;;  %v1545_v1 = vmax.f32 %v1525_v11, 0.0 }
 0x170   :  { %1812 = vst [vmem:[%s2953_s3] sm:$0xff] %v1811_v51   ;;  %v1496_v33 = vadd.f32 %v2150_v23, %v1399_v4  ;;  %v2158_v22 = vpop.f32.mrf.mxu1  ;;  %v1535_v17 = vmax.f32 %v1485_v16, 0.0 }
 0x171   :  { %1851 = vst [vmem:[%s2953_s3 + $0x20] sm:$0xff] %v1831_v42   ;;  %v1528_v37 = vadd.f32 %v2158_v22, %v1431_v28  ;;  %v1487_v24 = vpop.f32.mrf.mxu0  ;;  %v1543_v31 = vmax.f32 %v1517_v20, 0.0 }
 0x172   :  { %v1538_v44 = vmax.f32 %v1496_v33, 0.0  ;;  %v1488_v13 = vadd.f32 %v1487_v24, %v1391_v25  ;;  %v1519_v15 = vpop.f32.mrf.mxu1 }
 0x173   :  { %v1546_v9 = vmax.f32 %v1528_v37, 0.0  ;;  %v1520_v39 = vadd.f32 %v1519_v15, %v1423_v34 }
 0x174   :  { %v1826_v26 = vpack.c.bf16 %v1538_v44, %v1537_v40  ;;  %v1536_v30 = vmax.f32 %v1488_v13, 0.0 }
 0x175   :  { %v1846_v41 = vpack.c.bf16 %v1546_v9, %v1545_v1  ;;  %v1544_v52 = vmax.f32 %v1520_v39, 0.0 }
 0x176   :  { %1850 = vst [vmem:[%s2953_s3 + $0x18] sm:$0xff] %v1826_v26   ;;  %v1821_v5 = vpack.c.bf16 %v1536_v30, %v1535_v17 }
 0x177   :  { %1854 = vst [vmem:[%s2953_s3 + $0x38] sm:$0xff] %v1846_v41   ;;  %v1841_v32 = vpack.c.bf16 %v1544_v52, %v1543_v31 }
 0x178   :  { %1849 = vst [vmem:[%s2953_s3 + $0x10] sm:$0xff] %v1821_v5  }
 0x179   :  { %1853 = vst [vmem:[%s2953_s3 + $0x30] sm:$0xff] %v1841_v32  }

// kernel: run.7
= control target key start
LH: loop header
LB: loop body
LE: loop exit
PB: predicated region body
PF: predicated region fallthrough
CT: control target
= control target key end

     0   :  { %s3155_s15 = smov 0   ;;  %s3157_s16 = smov 0   ;;  %s3843_s0 = inlined_call_operand.vmem [shape: bf16[2,116,128], index: 0, kind: input, shape index: {}]   ;;  %s3844_s1 = inlined_call_operand.vmem [shape: bf16[9,128,128], index: 1, kind: input, shape index: {}]   ;;  %s3845_s2 = inlined_call_operand.vmem [shape: f32[1,128], index: 2, kind: input, shape index: {}]   ;;  %s3846_s3 = inlined_call_operand.vmem [shape: bf16[2,80,128], index: 3, kind: input, shape index: {}]   ;;  %s3847_s4 = inlined_call_operand.vmem [shape: bf16[2,80,128], index: 4, kind: output, shape index: {}]  }
   0x1   :  { %s3159_s17 = smov 0  }
   0x2 LB: > { %s26_s18 = sadd.s32 1, %s3122_s16  ;;  %p2221_p0 = scmp.ge.s32.totalorder %s3126_s17, 1  ;;  %s3126_s17 = sphi %s3159_s17, %s14_s17   ;;  %s3122_s16 = sphi %s3157_s16, %s3849_s16   ;;  %s3118_s15 = sphi %s3155_s15, %s3848_s15  }
   0x3   : > { %p28_p1 = scmp.ge.s32.totalorder %s26_s18, 2  ;;  %p208_p2 = scmp.lt.s32.totalorder %s3126_s17, 3 }
   0x5   : > { %s3851_s18 = smov (%p28_p1, %s26_s18), 0  ;;  %p209_p3 = pnand %p2221_p0, %p208_p2 }
   0x6   : > { %p252_p4 = scmp.lt.s32.totalorder (!%p209_p3), %s3118_s15, 1 }
   0x7   : > { %212 = sbr.rel (%p209_p3) target bundleno = 429 (0x1ad), region = 36 }
   0xc   : > { %v3009_v0 = vld [vmem:[%s3844_s1 + $0x78] sm:$0xff]   ;;  %v3128_v1 = vmov 0.0   ;;  %v3011_v3 = vld [vmem:[%s3844_s1 + $0x70] sm:$0xff]   ;;  %vm3129_vm0 = vmmov 0   ;;  %s3853_s15 = smov (!%p252_p4, %s3118_s15), 1  ;;  %v3013_v5 = vld [vmem:[%s3844_s1 + $0x68] sm:$0xff]  }
   0xd   : > { %2641 = vmatprep.subr.bf16.mxu0 %v3128_v1  ;;  %2677 = vmatprep.subr.bf16.mxu1 %v3128_v1  ;;  %v3010_v2 = vld [vmem:[%s3844_s1 + $0x38] sm:$0xff]   ;;  %v3012_v4 = vld [vmem:[%s3844_s1 + $0x30] sm:$0xff]   ;;  %v3014_v6 = vld [vmem:[%s3844_s1 + $0x28] sm:$0xff]   ;;  %s2981_s5 = smul.u32 60, %s3853_s15  ;;  %vm353_vm1 = vsmask.f32 7424 }
   0xe   : > { %2642 = vmatpush3.bf16.msra.mxu0 %v3009_v0  ;;  %2657 = vmatprep.mubr.msk.bf16.mxu0 %vm3129_vm0, %v3128_v1  ;;  %v3015_v7 = vld [vmem:[%s3844_s1 + $0x60] sm:$0xff]   ;;  %v3017_v9 = vld [vmem:[%s3844_s1 + $0x58] sm:$0xff]   ;;  %v3019_v13 = vld [vmem:[%s3844_s1 + $0x50] sm:$0xff]   ;;  %vm671_vm2 = vcmask 1046528   ;;  %vm1043_vm3 = vsmask.f32 6400 }
   0xf   : > { %2678 = vmatpush3.bf16.msra.mxu1 %v3010_v2  ;;  %2643 = vmatprep.subr.bf16.mxu0 %v3128_v1  ;;  %v3016_v8 = vld [vmem:[%s3844_s1 + $0x20] sm:$0xff]   ;;  %s3215_s12 = scalar_lea.vmem %s3843_s0, %s2981_s5  ;;  %v3018_v10 = vld [vmem:[%s3844_s1 + $0x18] sm:$0xff]   ;;  %v3020_v16 = vld [vmem:[%s3844_s1 + $0x10] sm:$0xff]   ;;  %vm1254_vm4 = vcmask 1045504   ;;  %vm1626_vm5 = vsmask.f32 5376 }
  0x10   : > { %2679 = vmatprep.subr.bf16.mxu1 %v3128_v1  ;;  %2693 = vmatprep.mubr.msk.bf16.mxu1 %vm3129_vm0, %v3128_v1  ;;  %v281_v11 = vld [vmem:[%s3215_s12] sm:$0xf]  ;;  %v3227_v12 = vld [vmem:[%s3215_s12 + $0x4] sm:$0xf]  ;;  %v3234_v15 = vld [vmem:[%s3215_s12 + $0x8] sm:$0xff]   ;;  %vm1837_vm6 = vcmask 1044480  }
  0x11   : > { %v2241_v14 = vcombine.low %v281_v11, %v3227_v12  ;;  %v3021_v18 = vld [vmem:[%s3844_s1 + $0x48] sm:$0xff]   ;;  %v362_v21 = vshll.u32 %v3234_v15, 16  ;;  %v3023_v23 = vld [vmem:[%s3844_s1 + $0x40] sm:$0xff]   ;;  %v3257_v27 = vld [vmem:[%s3215_s12 + $0x10] sm:$0xff]   ;;  %v366_v30 = vshrl.u32 %v3234_v15, 16 }
  0x12   : > { %2644 = vmatpush3.bf16.msra.mxu0 %v3011_v3  ;;  %v3022_v22 = vld [vmem:[%s3844_s1 + $0x8] sm:$0xff]   ;;  %v3024_v24 = vld [vmem:[%s3844_s1] sm:$0xff]   ;;  %v3027_v28 = vld [vmem:[%s3844_s1 + $0xb8] sm:$0xff]   ;;  %v370_v31 = vshll.u32 %v3257_v27, 16  ;;  %v374_v41 = vshrl.u32 %v3257_v27, 16 }
  0x13   : > { %2680 = vmatpush3.bf16.msra.mxu1 %v3012_v4  ;;  %2645 = vmatprep.subr.bf16.mxu0 %v3128_v1  ;;  %v357_v17 = vshll.u32 %v2241_v14, 16  ;;  %v355_v19 = vshrl.u32 %v2241_v14, 16  ;;  %v364_v26 = vrot.slane %v362_v21, 1  ;;  %v3030_v32 = vld [vmem:[%s3844_s1 + $0xf8] sm:$0xff]   ;;  %v3028_v34 = vld [vmem:[%s3844_s1 + $0xb0] sm:$0xff]   ;;  %v3031_v40 = vld [vmem:[%s3844_s1 + $0xa8] sm:$0xff]  }
  0x14   : > { %2681 = vmatprep.subr.bf16.mxu1 %v3128_v1  ;;  %v3273_v33 = vld [vmem:[%s3215_s12 + $0x18] sm:$0xff]   ;;  %v372_v36 = vrot.slane %v370_v31, 1  ;;  %v3032_v37 = vld [vmem:[%s3844_s1 + $0xf0] sm:$0xff]   ;;  %v3035_v42 = vld [vmem:[%s3844_s1 + $0xe8] sm:$0xff]   ;;  %v675_v21 = vrot.slane %v3257_v27, 1 }
  0x15   : > { %v359_v20 = vrot.slane %v357_v17, 1  ;;  %v368_v35 = vor.u32 %v366_v30, %v364_v26  ;;  %v378_v38 = vshll.u32 %v3273_v33, 16  ;;  %v3034_v44 = vld [vmem:[%s3844_s1 + $0xa0] sm:$0xff]   ;;  %v3036_v48 = vld [vmem:[%s3844_s1 + $0x98] sm:$0xff]   ;;  %v382_v50 = vshrl.u32 %v3273_v33, 16  ;;  %v3040_v56 = vld [vmem:[%s3844_s1 + $0x90] sm:$0xff]  }
  0x16   : > { %2646 = vmatpush3.bf16.msra.mxu0 %v3013_v5  ;;  %v3302_v45 = vld [vmem:[%s3215_s12 + $0x20] sm:$0xff]   ;;  %v376_v46 = vor.u32 %v374_v41, %v372_v36  ;;  %v3039_v52 = vld [vmem:[%s3844_s1 + $0xd8] sm:$0xff]   ;;  %v3325_v53 = vld [vmem:[%s3215_s12 + $0x28] ss:$0 sps:$4 sm:$0x11]  }
  0x17   : > { %2682 = vmatpush3.bf16.msra.mxu1 %v3014_v6  ;;  %2647 = vmatprep.subr.bf16.mxu0 %v3128_v1  ;;  %v360_v25 = vor.u32 %v359_v20, %v355_v19  ;;  %v373_v39 = vsel %vm353_vm1, %v368_v35, %v372_v36  ;;  %v380_v43 = vrot.slane %v378_v38, 1  ;;  %v3037_v47 = vld [vmem:[%s3844_s1 + $0xe0] sm:$0xff]   ;;  %v386_v51 = vshll.u32 %v3302_v45, 16  ;;  %v3041_v57 = vld [vmem:[%s3844_s1 + $0xd0] sm:$0xff]   ;;  %v3042_v61 = vld [vmem:[%s3844_s1 + $0x88] sm:$0xff]  }
  0x18   : > { %2683 = vmatprep.subr.bf16.mxu1 %v3128_v1  ;;  %v390_v59 = vshrl.u32 %v3302_v45, 16  ;;  %v394_v60 = vshll.u32 %v3325_v53, 16  ;;  %v3044_v62 = vld [vmem:[%s3844_s1 + $0xc8] sm:$0xff]   ;;  %v3045_v63 = vld [vmem:[%s3844_s1 + $0x80] sm:$0xff]   ;;  %v3050_v17 = vld [vmem:[%s3844_s1 + $0x138] sm:$0xff]   ;;  %v679_v38 = vrot.slane %v3302_v45, 1 }
  0x19   : > { %v365_v29 = vsel %vm353_vm1, %v360_v25, %v364_v26  ;;  %v381_v49 = vsel %vm353_vm1, %v376_v46, %v380_v43  ;;  %v384_v54 = vor.u32 %v382_v50, %v380_v43  ;;  %v388_v55 = vrot.slane %v386_v51, 1  ;;  %v3046_v3 = vld [vmem:[%s3844_s1 + $0xc0] sm:$0xff]   ;;  %v3367_v6 = vld [vmem:[%s3215_s12 + $0x8] sm:$0xf]  ;;  %v3394_v19 = vld [vmem:[%s3215_s12 + $0x14] sm:$0xff]  }
  0x1a   : > { %2648 = vmatpush3.bf16.msra.mxu0 %v3015_v7  ;;  %v396_v2 = vrot.slane %v394_v60, 1  ;;  %v650_v4 = vld [vmem:[%s3215_s12] sm:$0xe]  ;;  %v819_v5 = vld [vmem:[%s3215_s12 + $0x4] sm:$0xe]  ;;  %v3051_v20 = vld [vmem:[%s3844_s1 + $0x130] sm:$0xff]  }
  0x1b   : > { %2684 = vmatpush3.bf16.msra.mxu1 %v3016_v8  ;;  %2649 = vmatprep.subr.bf16.mxu0 %v3128_v1  ;;  %v389_v58 = vsel %vm353_vm1, %v384_v54, %v388_v55  ;;  %v392_v0 = vor.u32 %v390_v59, %v388_v55  ;;  %v2279_v8 = vcombine.low %v650_v4, %v3227_v12  ;;  %v673_v12 = vrot.slane %v3234_v15, 1  ;;  %v3054_v25 = vld [vmem:[%s3844_s1 + $0x128] sm:$0xff]   ;;  %v3057_v30 = vld [vmem:[%s3844_s1 + $0x120] sm:$0xff]   ;;  %v3064_v41 = vld [vmem:[%s3844_s1 + $0x150] sm:$0xff]  }
  0x1c   : > { %2685 = vmatprep.subr.bf16.mxu1 %v3128_v1  ;;  %v3447_v36 = vld [vmem:[%s3215_s12 + $0x24] sm:$0xff]   ;;  %v3066_v43 = vld [vmem:[%s3215_s12 + $0x2c] ss:$0 sps:$4 sm:$0x11]  }
  0x1d   : > { %v397_v7 = vsel %vm353_vm1, %v392_v0, %v396_v2  ;;  %v672_v11 = vrot.slane %v2279_v8, 1  ;;  %v3067_v46 = vld [vmem:[%s3844_s1 + $0x148] sm:$0xff]   ;;  %v3069_v54 = vld [vmem:[%s3844_s1 + $0x140] sm:$0xff]   ;;  %v1062_v2 = vshrl.u32 %v3394_v19, 16 }
  0x1e   : > { %2650 = vmatpush3.bf16.msra.mxu0 %v3017_v9  ;;  %v3373_v9 = vcombine.low %v819_v5, %v3367_v6  ;;  %v1233_v55 = vld [vmem:[%s3215_s12 + $0x4] sm:$0xc] }
  0x1f   : > { %2686 = vmatpush3.bf16.msra.mxu1 %v3018_v10  ;;  %2651 = vmatprep.subr.bf16.mxu0 %v3128_v1  ;;  %v3376_v10 = vld [vmem:[%s3215_s12 + $0xc] sm:$0xff]   ;;  %v1064_v8 = vrot.slane %v1062_v2, 1 }
  0x20   : > { %2687 = vmatprep.subr.bf16.mxu1 %v3128_v1  ;;  %v1053_v50 = vshrl.u32 %v3376_v10, 16  ;;  %v1056_v51 = vshll.u32 %v3376_v10, 16  ;;  %v1256_v5 = vrot.slane %v3376_v10, 2 }
  0x22   : > { %2652 = vmatpush3.bf16.msra.mxu0 %v3019_v13  ;;  %v875_v13 = vrot.slane %v3373_v9, 1  ;;  %v1055_v59 = vrot.slane %v1053_v50, 1  ;;  %v1058_v60 = vrot.slane %v1056_v51, 2  ;;  %v3592_v51 = vld [vmem:[%s3215_s12 + $0x10] sm:$0xff]  }
  0x23   : > { %2688 = vmatpush3.bf16.msra.mxu1 %v3020_v16  ;;  %2653 = vmatprep.subr.bf16.mxu0 %v3128_v1  ;;  %v674_v16 = vsel %vm671_vm2, %v672_v11, %v673_v12 }
  0x24   : > { %2689 = vmatprep.subr.bf16.mxu1 %v3128_v1  ;;  %v1059_v0 = vor.u32 %v1058_v60, %v1055_v59  ;;  %v1639_v59 = vshll.u32 %v3592_v51, 16  ;;  %v3087_v60 = vld [vmem:[%s3844_s1 + $0x1c0] sm:$0xff]  }
  0x26   : > { %2654 = vmatpush3.bf16.msra.mxu0 %v3021_v18 }
  0x27   : > { %2690 = vmatpush3.bf16.msra.mxu1 %v3022_v22  ;;  %2655 = vmatprep.subr.bf16.mxu0 %v3128_v1  ;;  %v878_v22 = vrot.slane %v3394_v19, 1 }
  0x28   : > { %2691 = vmatprep.subr.bf16.mxu1 %v3128_v1 }
  0x2a   : > { %2656 = vmatpush3.bf16.msra.mxu0 %v3023_v23  ;;  %v3055_v23 = vld [vmem:[%s3844_s1 + $0x170] sm:$0xff]  }
  0x2b   : > { %2692 = vmatpush3.bf16.msra.mxu1 %v3024_v24  ;;  %2713 = vmatprep.subr.bf16.mxu0 %v3128_v1  ;;  %v676_v24 = vsel %vm671_vm2, %v673_v12, %v675_v21  ;;  %v3073_v12 = vld [vmem:[%s3844_s1 + $0x1f8] sm:$0xff]  }
  0x2c   : > { %2749 = vmatprep.subr.bf16.mxu1 %v3128_v1 }
  0x2d   : > { %2658 = vmatmul.mubr.bf16.vlgmr.msra.gmra.mxu0 %v365_v29  ;;  %v677_v29 = vrot.slane %v3273_v33, 1 }
  0x2e   : > { %2694 = vmatmul.mubr.bf16.vlgmr.msra.gmra.mxu1 %v2241_v14  ;;  %2714 = vmatpush3.bf16.msra.mxu0 %v3027_v28  ;;  %v876_v14 = vrot.slane %v3376_v10, 1  ;;  %v3058_v28 = vld [vmem:[%s3844_s1 + $0x168] sm:$0xff]   ;;  %v3072_v10 = vld [vmem:[%s3844_s1 + $0x1b0] sm:$0xff]  }
  0x2f   : > { %2715 = vmatprep.subr.bf16.mxu0 %v3128_v1  ;;  %2661 = vmatprep.mubr.msk.bf16.mxu0 %vm3129_vm0, %v3128_v1 }
  0x30   : > { %2697 = vmatprep.mubr.msk.bf16.mxu1 %vm3129_vm0, %v3128_v1  ;;  %2750 = vmatpush3.bf16.msra.mxu1 %v3030_v32  ;;  %v877_v18 = vsel %vm671_vm2, %v875_v13, %v876_v14  ;;  %v879_v26 = vsel %vm671_vm2, %v876_v14, %v878_v22  ;;  %v3060_v32 = vld [vmem:[%s3844_s1 + $0x160] sm:$0xff]  }
  0x31   : > { %2751 = vmatprep.subr.bf16.mxu1 %v3128_v1 }
  0x32   : > { %2716 = vmatpush3.bf16.msra.mxu0 %v3028_v34  ;;  %v3059_v34 = vld [vmem:[%s3844_s1 + $0x118] sm:$0xff]  }
  0x33   : > { %2717 = vmatprep.subr.bf16.mxu0 %v3128_v1 }
  0x34   : > { %2752 = vmatpush3.bf16.msra.mxu1 %v3032_v37  ;;  %v3062_v37 = vld [vmem:[%s3844_s1 + $0x158] sm:$0xff]  }
  0x35   : > { %2662 = vmatmul.mubr.bf16.gmra.mxu0 %v373_v39  ;;  %2753 = vmatprep.subr.bf16.mxu1 %v3128_v1  ;;  %v3063_v39 = vld [vmem:[%s3844_s1 + $0x110] sm:$0xff]  }
  0x36   : > { %2698 = vmatmul.mubr.bf16.gmra.mxu1 %v3234_v15  ;;  %2718 = vmatpush3.bf16.msra.mxu0 %v3031_v40  ;;  %v3053_v15 = vld [vmem:[%s3844_s1 + $0x178] sm:$0xff]   ;;  %v882_v40 = vrot.slane %v3447_v36, 1 }
  0x37   : > { %2665 = vmatprep.mubr.msk.bf16.mxu0 %vm3129_vm0, %v3128_v1  ;;  %2701 = vmatprep.mubr.msk.bf16.mxu1 %vm3129_vm0, %v3128_v1 }
  0x38   : > { %2719 = vmatprep.subr.bf16.mxu0 %v3128_v1  ;;  %2754 = vmatpush3.bf16.msra.mxu1 %v3035_v42  ;;  %v680_v42 = vsel %vm671_vm2, %v677_v29, %v679_v38 }
  0x39   : > { %2755 = vmatprep.subr.bf16.mxu1 %v3128_v1 }
  0x3a   : > { %2720 = vmatpush3.bf16.msra.mxu0 %v3034_v44 }
  0x3b   : > { %2721 = vmatprep.subr.bf16.mxu0 %v3128_v1 }
  0x3c   : > { %2756 = vmatpush3.bf16.msra.mxu1 %v3037_v47  ;;  %v681_v47 = vrot.slane %v3325_v53, 1  ;;  %v3068_v53 = vld [vmem:[%s3844_s1 + $0x100] sm:$0xff]  }
  0x3d   : > { %2666 = vmatmul.mubr.bf16.gmra.mxu0 %v381_v49  ;;  %2757 = vmatprep.subr.bf16.mxu1 %v3128_v1  ;;  %v1048_v49 = vshll.u32 %v3373_v9, 16 }
  0x3e   : > { %2702 = vmatmul.mubr.bf16.gmra.mxu1 %v3257_v27  ;;  %2722 = vmatpush3.bf16.msra.mxu0 %v3036_v48  ;;  %v3420_v27 = vld [vmem:[%s3215_s12 + $0x1c] sm:$0xff]   ;;  %v1045_v48 = vshrl.u32 %v3373_v9, 16 }
  0x3f   : > { %2669 = vmatprep.mubr.msk.bf16.mxu0 %vm3129_vm0, %v3128_v1  ;;  %2705 = vmatprep.mubr.msk.bf16.mxu1 %vm3129_vm0, %v3128_v1  ;;  %v880_v31 = vrot.slane %v3420_v27, 1  ;;  %v1071_v14 = vshrl.u32 %v3420_v27, 16 }
  0x40   : > { %2723 = vmatprep.subr.bf16.mxu0 %v3128_v1  ;;  %2758 = vmatpush3.bf16.msra.mxu1 %v3039_v52  ;;  %v884_v52 = vrot.slane %v3066_v43, 1  ;;  %v3082_v43 = vld [vmem:[%s3844_s1 + $0x1d0] sm:$0xff]  }
  0x41   : > { %2759 = vmatprep.subr.bf16.mxu1 %v3128_v1  ;;  %v881_v35 = vsel %vm671_vm2, %v878_v22, %v880_v31  ;;  %v883_v44 = vsel %vm671_vm2, %v880_v31, %v882_v40 }
  0x42   : > { %2724 = vmatpush3.bf16.msra.mxu0 %v3040_v56  ;;  %v682_v56 = vsel %vm671_vm2, %v679_v38, %v681_v47 }
  0x43   : > { %2725 = vmatprep.subr.bf16.mxu0 %v3128_v1 }
  0x44   : > { %2760 = vmatpush3.bf16.msra.mxu1 %v3041_v57  ;;  %v1047_v57 = vrot.slane %v1045_v48, 1 }
  0x45   : > { %2670 = vmatmul.mubr.bf16.gmra.mxu0 %v389_v58  ;;  %2761 = vmatprep.subr.bf16.mxu1 %v3128_v1  ;;  %v1050_v58 = vrot.slane %v1048_v49, 2 }
  0x46   : > { %2706 = vmatmul.mubr.bf16.gmra.mxu1 %v3273_v33  ;;  %2673 = vmatprep.mubr.msk.bf16.mxu0 %vm3129_vm0, %v3128_v1  ;;  %v678_v33 = vsel %vm671_vm2, %v675_v21, %v677_v29  ;;  %v1073_v21 = vrot.slane %v1071_v14, 1  ;;  %v1260_v29 = vrot.slane %v3420_v27, 2 }
  0x47   : > { %2709 = vmatprep.mubr.msk.bf16.mxu1 %vm3129_vm0, %v3128_v1  ;;  %2726 = vmatpush3.bf16.msra.mxu0 %v3042_v61  ;;  %v885_v61 = vsel %vm671_vm2, %v882_v40, %v884_v52  ;;  %v3085_v52 = vld [vmem:[%s3844_s1 + $0x1c8] sm:$0xff]  }
  0x48   : > { %2762 = vmatpush3.bf16.msra.mxu1 %v3044_v62  ;;  %2727 = vmatprep.subr.bf16.mxu0 %v3128_v1  ;;  %v2359_v62 = vcombine.low %v1233_v55, %v3367_v6  ;;  %v3086_v55 = vld [vmem:[%s3844_s1 + $0x180] sm:$0xff]  }
  0x49   : > { %2763 = vmatprep.subr.bf16.mxu1 %v3128_v1 }
  0x4a   : > { %v1255_v4 = vrot.slane %v2359_v62, 2 }
  0x4b   : > { %2728 = vmatpush3.bf16.msra.mxu0 %v3045_v63  ;;  %v1051_v63 = vor.u32 %v1050_v58, %v1047_v57  ;;  %v1636_v58 = vshrl.u32 %v3592_v51, 16 }
  0x4c   : > { %2764 = vmatpush3.bf16.msra.mxu1 %v3046_v3  ;;  %2785 = vmatprep.subr.bf16.mxu0 %v3128_v1  ;;  %v1065_v3 = vshll.u32 %v3394_v19, 16  ;;  %v1257_v11 = vsel %vm1254_vm4, %v1255_v4, %v1256_v5  ;;  %v3615_v4 = vld [vmem:[%s3215_s12 + $0x18] sm:$0xff]  }
  0x4d   : > { %2674 = vmatmul.mubr.bf16.gmra.mxu0 %v397_v7  ;;  %2821 = vmatprep.subr.bf16.mxu1 %v3128_v1  ;;  %v1060_v6 = vsel %vm1043_vm3, %v1051_v63, %v1059_v0  ;;  %v3071_v7 = vld [vmem:[%s3844_s1 + $0x1b8] sm:$0xff]   ;;  %v1638_v2 = vrot.slane %v1636_v58, 2 }
  0x4e   : > { %2710 = vmatmul.mubr.bf16.gmra.mxu1 %v3302_v45  ;;  %2729 = vmatprep.mubr.msk.bf16.mxu0 %vm3129_vm0, %v3128_v1  ;;  %v3065_v45 = vld [vmem:[%s3844_s1 + $0x108] sm:$0xff]   ;;  %v1067_v9 = vrot.slane %v1065_v3, 2  ;;  %v1641_v3 = vrot.slane %v1639_v59, 3 }
  0x4f   : > { %2765 = vmatprep.mubr.msk.bf16.mxu1 %vm3129_vm0, %v3128_v1 }
  0x50   : > { %v1068_v13 = vor.u32 %v1067_v9, %v1064_v8  ;;  %v1642_v8 = vor.u32 %v1641_v3, %v1638_v2  ;;  %v1645_v9 = vshrl.u32 %v3615_v4, 16 }
  0x52   : > { %v1647_v14 = vrot.slane %v1645_v9, 2 }
  0x55   : > { %2730 = vmatmul.mubr.bf16.vlgmr.msra.gmra.mxu0 %v674_v16  ;;  %v1074_v16 = vshll.u32 %v3420_v27, 16 }
  0x56   : > { %2766 = vmatmul.mubr.bf16.vlgmr.msra.gmra.mxu1 %v877_v18  ;;  %2786 = vmatpush3.bf16.msra.mxu0 %v3050_v17  ;;  %v1258_v17 = vrot.slane %v3394_v19, 2  ;;  %v3075_v18 = vld [vmem:[%s3844_s1 + $0x1f0] sm:$0xff]  }
  0x57   : > { %2787 = vmatprep.subr.bf16.mxu0 %v3128_v1  ;;  %2733 = vmatprep.mubr.msk.bf16.mxu0 %vm3129_vm0, %v3128_v1  ;;  %v1076_v22 = vrot.slane %v1074_v16, 2 }
  0x58   : > { %2769 = vmatprep.mubr.msk.bf16.mxu1 %vm3129_vm0, %v3128_v1  ;;  %2822 = vmatpush3.bf16.msra.mxu1 %v3053_v15  ;;  %v1069_v15 = vsel %vm1043_vm3, %v1059_v0, %v1068_v13  ;;  %v1259_v19 = vsel %vm1254_vm4, %v1256_v5, %v1258_v17  ;;  %v1261_v27 = vsel %vm1254_vm4, %v1258_v17, %v1260_v29  ;;  %v3632_v17 = vld [vmem:[%s3215_s12 + $0x20] sm:$0xff]  }
  0x59   : > { %2823 = vmatprep.subr.bf16.mxu1 %v3128_v1 }
  0x5a   : > { %2788 = vmatpush3.bf16.msra.mxu0 %v3051_v20  ;;  %v3074_v20 = vld [vmem:[%s3844_s1 + $0x1a8] sm:$0xff]  }
  0x5b   : > { %2789 = vmatprep.subr.bf16.mxu0 %v3128_v1 }
  0x5c   : > { %2824 = vmatpush3.bf16.msra.mxu1 %v3055_v23  ;;  %v3077_v23 = vld [vmem:[%s3844_s1 + $0x1e8] sm:$0xff]  }
  0x5d   : > { %2734 = vmatmul.mubr.bf16.gmra.mxu0 %v676_v24  ;;  %2825 = vmatprep.subr.bf16.mxu1 %v3128_v1  ;;  %v1077_v24 = vor.u32 %v1076_v22, %v1073_v21  ;;  %v1654_v21 = vshrl.u32 %v3632_v17, 16  ;;  %v1657_v22 = vshll.u32 %v3632_v17, 16 }
  0x5e   : > { %2770 = vmatmul.mubr.bf16.gmra.mxu1 %v879_v26  ;;  %2790 = vmatpush3.bf16.msra.mxu0 %v3054_v25  ;;  %v3076_v25 = vld [vmem:[%s3844_s1 + $0x1a0] sm:$0xff]   ;;  %v1080_v26 = vshrl.u32 %v3447_v36, 16 }
  0x5f   : > { %2737 = vmatprep.mubr.msk.bf16.mxu0 %vm3129_vm0, %v3128_v1  ;;  %2773 = vmatprep.mubr.msk.bf16.mxu1 %vm3129_vm0, %v3128_v1  ;;  %v1078_v31 = vsel %vm1043_vm3, %v1068_v13, %v1077_v24 }
  0x60   : > { %2791 = vmatprep.subr.bf16.mxu0 %v3128_v1  ;;  %2826 = vmatpush3.bf16.msra.mxu1 %v3058_v28  ;;  %v1083_v28 = vshll.u32 %v3447_v36, 16 }
  0x61   : > { %2827 = vmatprep.subr.bf16.mxu1 %v3128_v1 }
  0x62   : > { %2792 = vmatpush3.bf16.msra.mxu0 %v3057_v30  ;;  %v3079_v30 = vld [vmem:[%s3844_s1 + $0x1e0] sm:$0xff]  }
  0x63   : > { %2793 = vmatprep.subr.bf16.mxu0 %v3128_v1 }
  0x64   : > { %2828 = vmatpush3.bf16.msra.mxu1 %v3060_v32  ;;  %v3078_v32 = vld [vmem:[%s3844_s1 + $0x198] sm:$0xff]  }
  0x65   : > { %2738 = vmatmul.mubr.bf16.gmra.mxu0 %v678_v33  ;;  %2829 = vmatprep.subr.bf16.mxu1 %v3128_v1  ;;  %v1082_v33 = vrot.slane %v1080_v26, 1  ;;  %v1659_v26 = vrot.slane %v1657_v22, 3 }
  0x66   : > { %2774 = vmatmul.mubr.bf16.gmra.mxu1 %v881_v35  ;;  %2794 = vmatpush3.bf16.msra.mxu0 %v3059_v34  ;;  %v1085_v34 = vrot.slane %v1083_v28, 2  ;;  %v3084_v35 = vld [vmem:[%s3215_s12 + $0x2c] ss:$0 sps:$4 sm:$0x33]  }
  0x67   : > { %2741 = vmatprep.mubr.msk.bf16.mxu0 %vm3129_vm0, %v3128_v1  ;;  %2777 = vmatprep.mubr.msk.bf16.mxu1 %vm3129_vm0, %v3128_v1  ;;  %v1089_v40 = vshrl.u32 %v3084_v35, 16  ;;  %v3653_v28 = vld [vmem:[%s3215_s12 + $0x28] sm:$0xff]  }
  0x68   : > { %2795 = vmatprep.subr.bf16.mxu0 %v3128_v1  ;;  %2830 = vmatpush3.bf16.msra.mxu1 %v3062_v37  ;;  %v3080_v37 = vld [vmem:[%s3844_s1 + $0x1d8] sm:$0xff]   ;;  %v1086_v38 = vor.u32 %v1085_v34, %v1082_v33  ;;  %v1666_v33 = vshll.u32 %v3653_v28, 16 }
  0x69   : > { %2831 = vmatprep.subr.bf16.mxu1 %v3128_v1  ;;  %v1091_v47 = vrot.slane %v1089_v40, 1  ;;  %v1465_v40 = vrot.slane %v3653_v28, 2 }
  0x6a   : > { %2796 = vmatpush3.bf16.msra.mxu0 %v3063_v39  ;;  %v3081_v39 = vld [vmem:[%s3844_s1 + $0x190] sm:$0xff]  }
  0x6b   : > { %2797 = vmatprep.subr.bf16.mxu0 %v3128_v1 }
  0x6c   : > { %2832 = vmatpush3.bf16.msra.mxu1 %v3064_v41  ;;  %v1092_v41 = vshll.u32 %v3084_v35, 16 }
  0x6d   : > { %2742 = vmatmul.mubr.bf16.gmra.mxu0 %v680_v42  ;;  %2833 = vmatprep.subr.bf16.mxu1 %v3128_v1  ;;  %v1262_v42 = vrot.slane %v3447_v36, 2  ;;  %v3083_v36 = vld [vmem:[%s3844_s1 + $0x188] sm:$0xff]  }
  0x6e   : > { %2778 = vmatmul.mubr.bf16.gmra.mxu1 %v883_v44  ;;  %2745 = vmatprep.mubr.msk.bf16.mxu0 %vm3129_vm0, %v3128_v1  ;;  %v1402_v44 = vld [vmem:[%s3215_s12 + $0x8] sm:$0xc]  ;;  %v1094_v48 = vrot.slane %v1092_v41, 2  ;;  %v3098_v41 = vld [vmem:[%s3844_s1 + $0x210] sm:$0xff]  }
  0x6f   : > { %2781 = vmatprep.mubr.msk.bf16.mxu1 %vm3129_vm0, %v3128_v1  ;;  %2798 = vmatpush3.bf16.msra.mxu0 %v3065_v45  ;;  %v3581_v45 = vld [vmem:[%s3215_s12 + $0xc] sm:$0xf]  ;;  %v1263_v49 = vsel %vm1254_vm4, %v1260_v29, %v1262_v42  ;;  %v1463_v29 = vrot.slane %v3632_v17, 2 }
  0x70   : > { %2834 = vmatpush3.bf16.msra.mxu1 %v3067_v46  ;;  %2799 = vmatprep.subr.bf16.mxu0 %v3128_v1  ;;  %v1087_v46 = vsel %vm1043_vm3, %v1077_v24, %v1086_v38  ;;  %v2384_v50 = vcombine.low %v1402_v44, %v3581_v45 }
  0x71   : > { %2835 = vmatprep.subr.bf16.mxu1 %v3128_v1 }
  0x72   : > { %v1631_v57 = vshll.u32 %v2384_v50, 16  ;;  %v1458_v5 = vrot.slane %v2384_v50, 2 }
  0x73   : > { %2800 = vmatpush3.bf16.msra.mxu0 %v3068_v53  ;;  %v1095_v53 = vor.u32 %v1094_v48, %v1091_v47  ;;  %v3100_v47 = vld [vmem:[%s3215_s12 + $0x30] ss:$0 sps:$4 sm:$0x33]  }
  0x74   : > { %2836 = vmatpush3.bf16.msra.mxu1 %v3069_v54  ;;  %2857 = vmatprep.subr.bf16.mxu0 %v3128_v1  ;;  %v1264_v54 = vrot.slane %v3084_v35, 2  ;;  %v1633_v0 = vrot.slane %v1631_v57, 3  ;;  %v3096_v35 = vld [vmem:[%s3844_s1 + $0x218] sm:$0xff]  }
  0x75   : > { %2746 = vmatmul.mubr.bf16.gmra.mxu0 %v682_v56  ;;  %2893 = vmatprep.subr.bf16.mxu1 %v3128_v1  ;;  %v1628_v56 = vshrl.u32 %v2384_v50, 16 }
  0x76   : > { %2782 = vmatmul.mubr.bf16.gmra.mxu1 %v885_v61  ;;  %2801 = vmatprep.mubr.msk.bf16.mxu0 %vm3129_vm0, %v3128_v1  ;;  %v1096_v61 = vsel %vm1043_vm3, %v1086_v38, %v1095_v53  ;;  %v1265_v62 = vsel %vm1254_vm4, %v1262_v42, %v1264_v54  ;;  %v1668_v38 = vrot.slane %v1666_v33, 3  ;;  %v3102_v54 = vld [vmem:[%s3844_s1 + $0x200] sm:$0xff]  }
  0x77   : > { %2837 = vmatprep.mubr.msk.bf16.mxu1 %vm3129_vm0, %v3128_v1  ;;  %v1630_v63 = vrot.slane %v1628_v56, 2 }
  0x7d   : > { %2802 = vmatmul.mubr.bf16.vlgmr.msra.gmra.mxu0 %v1060_v6  ;;  %v1459_v6 = vrot.slane %v3592_v51, 2 }
  0x7e   : > { %2838 = vmatmul.mubr.bf16.vlgmr.msra.gmra.mxu1 %v1257_v11  ;;  %2858 = vmatpush3.bf16.msra.mxu0 %v3071_v7  ;;  %v1634_v7 = vor.u32 %v1633_v0, %v1630_v63  ;;  %v1648_v11 = vshll.u32 %v3615_v4, 16  ;;  %v1841_v0 = vrot.slane %v3615_v4, 3 }
  0x7f   : > { %2859 = vmatprep.subr.bf16.mxu0 %v3128_v1  ;;  %2805 = vmatprep.mubr.msk.bf16.mxu0 %vm3129_vm0, %v3128_v1 }
  0x80   : > { %2841 = vmatprep.mubr.msk.bf16.mxu1 %vm3129_vm0, %v3128_v1  ;;  %2894 = vmatpush3.bf16.msra.mxu1 %v3073_v12  ;;  %v1460_v12 = vsel %vm1254_vm4, %v1458_v5, %v1459_v6  ;;  %v1643_v13 = vsel %vm1626_vm5, %v1634_v7, %v1642_v8  ;;  %v1650_v16 = vrot.slane %v1648_v11, 3 }
  0x81   : > { %2895 = vmatprep.subr.bf16.mxu1 %v3128_v1 }
  0x82   : > { %2860 = vmatpush3.bf16.msra.mxu0 %v3072_v10  ;;  %v3090_v10 = vld [vmem:[%s3844_s1 + $0x238] sm:$0xff]  }
  0x83   : > { %2861 = vmatprep.subr.bf16.mxu0 %v3128_v1 }
  0x84   : > { %2896 = vmatpush3.bf16.msra.mxu1 %v3075_v18  ;;  %v3091_v18 = vld [vmem:[%s3844_s1 + $0x230] sm:$0xff]  }
  0x85   : > { %2806 = vmatmul.mubr.bf16.gmra.mxu0 %v1069_v15  ;;  %2897 = vmatprep.subr.bf16.mxu1 %v3128_v1  ;;  %v1461_v15 = vrot.slane %v3615_v4, 2 }
  0x86   : > { %2842 = vmatmul.mubr.bf16.gmra.mxu1 %v1259_v19  ;;  %2862 = vmatpush3.bf16.msra.mxu0 %v3074_v20  ;;  %v1651_v20 = vor.u32 %v1650_v16, %v1647_v14 }
  0x87   : > { %2809 = vmatprep.mubr.msk.bf16.mxu0 %vm3129_vm0, %v3128_v1  ;;  %2845 = vmatprep.mubr.msk.bf16.mxu1 %vm3129_vm0, %v3128_v1  ;;  %v1462_v19 = vsel %vm1254_vm4, %v1459_v6, %v1461_v15  ;;  %v1464_v34 = vsel %vm1254_vm4, %v1461_v15, %v1463_v29 }
  0x88   : > { %2863 = vmatprep.subr.bf16.mxu0 %v3128_v1  ;;  %2898 = vmatpush3.bf16.msra.mxu1 %v3077_v23  ;;  %v3093_v23 = vld [vmem:[%s3844_s1 + $0x228] sm:$0xff]   ;;  %v1652_v24 = vsel %vm1626_vm5, %v1642_v8, %v1651_v20 }
  0x89   : > { %2899 = vmatprep.subr.bf16.mxu1 %v3128_v1 }
  0x8a   : > { %2864 = vmatpush3.bf16.msra.mxu0 %v3076_v25  ;;  %v1656_v25 = vrot.slane %v1654_v21, 2 }
  0x8b   : > { %2865 = vmatprep.subr.bf16.mxu0 %v3128_v1 }
  0x8c   : > { %2900 = vmatpush3.bf16.msra.mxu1 %v3079_v30  ;;  %v3095_v30 = vld [vmem:[%s3844_s1 + $0x220] sm:$0xff]  }
  0x8d   : > { %2810 = vmatmul.mubr.bf16.gmra.mxu0 %v1078_v31  ;;  %2901 = vmatprep.subr.bf16.mxu1 %v3128_v1  ;;  %v1660_v31 = vor.u32 %v1659_v26, %v1656_v25 }
  0x8e   : > { %2846 = vmatmul.mubr.bf16.gmra.mxu1 %v1261_v27  ;;  %2866 = vmatpush3.bf16.msra.mxu0 %v3078_v32  ;;  %v1663_v32 = vshrl.u32 %v3653_v28, 16 }
  0x8f   : > { %2813 = vmatprep.mubr.msk.bf16.mxu0 %vm3129_vm0, %v3128_v1  ;;  %2849 = vmatprep.mubr.msk.bf16.mxu1 %vm3129_vm0, %v3128_v1  ;;  %v1661_v27 = vsel %vm1626_vm5, %v1651_v20, %v1660_v31 }
  0x90   : > { %2867 = vmatprep.subr.bf16.mxu0 %v3128_v1  ;;  %2902 = vmatpush3.bf16.msra.mxu1 %v3080_v37  ;;  %v1665_v37 = vrot.slane %v1663_v32, 2 }
  0x91   : > { %2903 = vmatprep.subr.bf16.mxu1 %v3128_v1 }
  0x92   : > { %2868 = vmatpush3.bf16.msra.mxu0 %v3081_v39  ;;  %v3675_v39 = vld [vmem:[%s3215_s12 + $0x30] ss:$0 sps:$4 sm:$0x77]   ;;  %v1669_v42 = vor.u32 %v1668_v38, %v1665_v37 }
  0x93   : > { %2869 = vmatprep.subr.bf16.mxu0 %v3128_v1  ;;  %v1675_v44 = vshll.u32 %v3675_v39, 16 }
  0x94   : > { %2904 = vmatpush3.bf16.msra.mxu1 %v3082_v43  ;;  %v1672_v43 = vshrl.u32 %v3675_v39, 16  ;;  %v1670_v48 = vsel %vm1626_vm5, %v1660_v31, %v1669_v42 }
  0x95   : > { %2814 = vmatmul.mubr.bf16.gmra.mxu0 %v1087_v46  ;;  %2905 = vmatprep.subr.bf16.mxu1 %v3128_v1  ;;  %v1466_v46 = vsel %vm1254_vm4, %v1463_v29, %v1465_v40  ;;  %v1677_v50 = vrot.slane %v1675_v44, 3 }
  0x96   : > { %2850 = vmatmul.mubr.bf16.gmra.mxu1 %v1263_v49  ;;  %2817 = vmatprep.mubr.msk.bf16.mxu0 %vm3129_vm0, %v3128_v1  ;;  %v3099_v49 = vld [vmem:[%s3844_s1 + $0x208] sm:$0xff]  }
  0x97   : > { %2853 = vmatprep.mubr.msk.bf16.mxu1 %vm3129_vm0, %v3128_v1  ;;  %2870 = vmatpush3.bf16.msra.mxu0 %v3083_v36  ;;  %v1674_v36 = vrot.slane %v1672_v43, 2 }
  0x98   : > { %2906 = vmatpush3.bf16.msra.mxu1 %v3085_v52  ;;  %2871 = vmatprep.subr.bf16.mxu0 %v3128_v1  ;;  %v1467_v52 = vrot.slane %v3100_v47, 2 }
  0x99   : > { %2907 = vmatprep.subr.bf16.mxu1 %v3128_v1  ;;  %v1678_v53 = vor.u32 %v1677_v50, %v1674_v36 }
  0x9a   : > { %v1468_v56 = vsel %vm1254_vm4, %v1465_v40, %v1467_v52 }
  0x9b   : > { %2872 = vmatpush3.bf16.msra.mxu0 %v3086_v55  ;;  %v1816_v55 = vld [vmem:[%s3215_s12 + $0x8] sm:$0x8]  ;;  %v1679_v58 = vsel %vm1626_vm5, %v1669_v42, %v1678_v53  ;;  %s2982_s12 = smul.u32 40, %s3853_s15 }
  0x9c   : > { %2908 = vmatpush3.bf16.msra.mxu1 %v3087_v60  ;;  %2929 = vmatprep.subr.bf16.mxu0 %v3128_v1  ;;  %v2439_v57 = vcombine.low %v1816_v55, %v3581_v45  ;;  %v1839_v60 = vrot.slane %v3592_v51, 3  ;;  %v1845_v45 = vrot.slane %v3653_v28, 3  ;;  %v1847_v51 = vrot.slane %v3675_v39, 3 }
  0x9d   : > { %2818 = vmatmul.mubr.bf16.gmra.mxu0 %v1096_v61  ;;  %2965 = vmatprep.subr.bf16.mxu1 %v3128_v1  ;;  %v1843_v61 = vrot.slane %v3632_v17, 3  ;;  %s3782_s21 = scalar_lea.vmem %s3846_s3, %s2982_s12  ;;  %s3817_s26 = scalar_lea.vmem %s3847_s4, %s2982_s12 }
  0x9e   : > { %2854 = vmatmul.mubr.bf16.gmra.mxu1 %v1265_v62  ;;  %2873 = vmatprep.mubr.msk.bf16.mxu0 %vm3129_vm0, %v3128_v1  ;;  %v1838_v59 = vrot.slane %v2439_v57, 3  ;;  %v1842_v2 = vsel %vm1837_vm6, %v1839_v60, %v1841_v0  ;;  %v1848_v3 = vsel %vm1837_vm6, %v1845_v45, %v1847_v51 }
  0x9f   : > { %2909 = vmatprep.mubr.msk.bf16.mxu1 %vm3129_vm0, %v3128_v1  ;;  %v1846_v63 = vsel %vm1837_vm6, %v1843_v61, %v1845_v45  ;;  %v1844_v5 = vsel %vm1837_vm6, %v1841_v0, %v1843_v61 }
  0xa0   : > { %v1840_v62 = vsel %vm1837_vm6, %v1838_v59, %v1839_v60 }
  0xa5   : > { %2874 = vmatmul.mubr.bf16.vlgmr.msra.gmra.mxu0 %v1460_v12 }
  0xa6   : > { %2910 = vmatmul.mubr.bf16.vlgmr.msra.gmra.mxu1 %v1643_v13  ;;  %2930 = vmatpush3.bf16.msra.mxu0 %v3090_v10 }
  0xa7   : > { %2931 = vmatprep.subr.bf16.mxu0 %v3128_v1  ;;  %2877 = vmatprep.mubr.msk.bf16.mxu0 %vm3129_vm0, %v3128_v1 }
  0xa8   : > { %2913 = vmatprep.mubr.msk.bf16.mxu1 %vm3129_vm0, %v3128_v1  ;;  %2973 = vmatpush3.bf16.msra.mxu1 %v3090_v10 }
  0xa9   : > { %2966 = vmatprep.subr.bf16.mxu1 %v3128_v1 }
  0xaa   : > { %2932 = vmatpush3.bf16.msra.mxu0 %v3091_v18 }
  0xab   : > { %2933 = vmatprep.subr.bf16.mxu0 %v3128_v1 }
  0xac   : > { %2974 = vmatpush3.bf16.msra.mxu1 %v3091_v18 }
  0xad   : > { %2878 = vmatmul.mubr.bf16.gmra.mxu0 %v1462_v19  ;;  %2967 = vmatprep.subr.bf16.mxu1 %v3128_v1 }
  0xae   : > { %2914 = vmatmul.mubr.bf16.gmra.mxu1 %v1652_v24  ;;  %2934 = vmatpush3.bf16.msra.mxu0 %v3093_v23 }
  0xaf   : > { %2881 = vmatprep.mubr.msk.bf16.mxu0 %vm3129_vm0, %v3128_v1  ;;  %2917 = vmatprep.mubr.msk.bf16.mxu1 %vm3129_vm0, %v3128_v1 }
  0xb0   : > { %2935 = vmatprep.subr.bf16.mxu0 %v3128_v1  ;;  %2975 = vmatpush3.bf16.msra.mxu1 %v3093_v23 }
  0xb1   : > { %2968 = vmatprep.subr.bf16.mxu1 %v3128_v1 }
  0xb2   : > { %2936 = vmatpush3.bf16.msra.mxu0 %v3095_v30 }
  0xb3   : > { %2937 = vmatprep.subr.bf16.mxu0 %v3128_v1 }
  0xb4   : > { %2976 = vmatpush3.bf16.msra.mxu1 %v3095_v30 }
  0xb5   : > { %2882 = vmatmul.mubr.bf16.gmra.mxu0 %v1464_v34  ;;  %2969 = vmatprep.subr.bf16.mxu1 %v3128_v1 }
  0xb6   : > { %2918 = vmatmul.mubr.bf16.gmra.mxu1 %v1661_v27  ;;  %2938 = vmatpush3.bf16.msra.mxu0 %v3096_v35 }
  0xb7   : > { %2885 = vmatprep.mubr.msk.bf16.mxu0 %vm3129_vm0, %v3128_v1  ;;  %2921 = vmatprep.mubr.msk.bf16.mxu1 %vm3129_vm0, %v3128_v1 }
  0xb8   : > { %2977 = vmatpush3.bf16.msra.mxu1 %v3096_v35  ;;  %2939 = vmatprep.subr.bf16.mxu0 %v3128_v1 }
  0xb9   : > { %2970 = vmatprep.subr.bf16.mxu1 %v3128_v1 }
  0xba   : > { %2940 = vmatpush3.bf16.msra.mxu0 %v3098_v41 }
  0xbb   : > { %2941 = vmatprep.subr.bf16.mxu0 %v3128_v1 }
  0xbc   : > { %2978 = vmatpush3.bf16.msra.mxu1 %v3098_v41 }
  0xbd   : > { %2886 = vmatmul.mubr.bf16.gmra.mxu0 %v1466_v46  ;;  %2971 = vmatprep.subr.bf16.mxu1 %v3128_v1 }
  0xbe   : > { %2922 = vmatmul.mubr.bf16.gmra.mxu1 %v1670_v48  ;;  %2889 = vmatprep.mubr.msk.bf16.mxu0 %vm3129_vm0, %v3128_v1 }
  0xbf   : > { %2925 = vmatprep.mubr.msk.bf16.mxu1 %vm3129_vm0, %v3128_v1  ;;  %2942 = vmatpush3.bf16.msra.mxu0 %v3099_v49 }
  0xc0   : > { %2979 = vmatpush3.bf16.msra.mxu1 %v3099_v49  ;;  %2943 = vmatprep.subr.bf16.mxu0 %v3128_v1 }
  0xc1   : > { %2972 = vmatprep.subr.bf16.mxu1 %v3128_v1 }
  0xc3   : > { %2944 = vmatpush3.bf16.msra.mxu0 %v3102_v54 }
  0xc4   : > { %2980 = vmatpush3.bf16.msra.mxu1 %v3102_v54 }
  0xc5   : > { %2890 = vmatmul.mubr.bf16.gmra.mxu0 %v1468_v56 }
  0xc6   : > { %2926 = vmatmul.mubr.bf16.gmra.mxu1 %v1679_v58  ;;  %2945 = vmatprep.mubr.msk.bf16.mxu0 %vm3129_vm0, %v3128_v1 }
  0xc7   : > { %2957 = vmatprep.mubr.msk.bf16.mxu1 %vm3129_vm0, %v3128_v1 }
  0xcd   : > { %2946 = vmatmul.mubr.bf16.vlgmr.msra.gmra.mxu0 %v1840_v62 }
  0xce   : > { %2958 = vmatmul.mubr.bf16.vlgmr.msra.gmra.mxu1 %v1846_v63  ;;  %2949 = vmatprep.mubr.msk.bf16.mxu0 %vm3129_vm0, %v3128_v1 }
  0xcf   : > { %2961 = vmatprep.mubr.msk.bf16.mxu1 %vm3129_vm0, %v3128_v1 }
  0xd5   : > { %2950 = vmatmul.mubr.bf16.gmra.mxu0 %v1842_v2 }
  0xd6   : > { %2962 = vmatmul.mubr.bf16.gmra.mxu1 %v1848_v3  ;;  %2953 = vmatprep.mubr.msk.bf16.mxu0 %vm3129_vm0, %v3128_v1 }
  0xdd   : > { %2954 = vmatmul.mubr.bf16.gmra.mxu0 %v1844_v5 }
  0xed   : > { %v485_v6 = vpop.f32.mrf.mxu0 }
  0xee   : > { %v611_v7 = vpop.f32.mrf.mxu1 }
  0xef   : > { %v612_v4 = vadd.f32 %v611_v7, %v485_v6  ;;  %v2659_v8 = vpop.f32.mrf.mxu0 }
  0xf0   : > { %v2695_v9 = vpop.f32.mrf.mxu1 }
  0xf1   : > { %v488_v11 = vpop.f32.mrf.mxu0 }
  0xf2   : > { %v614_v12 = vpop.f32.mrf.mxu1 }
  0xf3   : > { %v615_v10 = vadd.f32 %v614_v12, %v488_v11  ;;  %v2660_v13 = vpop.f32.mrf.mxu0 }
  0xf4   : > { %v2696_v14 = vpop.f32.mrf.mxu1 }
  0xf5   : > { %v493_v16 = vpop.f32.mrf.mxu0 }
  0xf6   : > { %v619_v17 = vpop.f32.mrf.mxu1 }
  0xf7   : > { %v620_v18 = vadd.f32 %v619_v17, %v493_v16  ;;  %v2663_v15 = vpop.f32.mrf.mxu0 }
  0xf8   : > { %v2699_v20 = vpop.f32.mrf.mxu1 }
  0xf9   : > { %v496_v21 = vpop.f32.mrf.mxu0 }
  0xfa   : > { %v622_v1 = vpop.f32.mrf.mxu1 }
  0xfb   : > { %v623_v22 = vadd.f32 %v622_v1, %v496_v21  ;;  %v2664_v19 = vpop.f32.mrf.mxu0 }
  0xfc   : > { %v2700_v23 = vpop.f32.mrf.mxu1 }
  0xfd   : > { %v501_v24 = vpop.f32.mrf.mxu0 }
  0xfe   : > { %v627_v25 = vpop.f32.mrf.mxu1 }
  0xff   : > { %v628_v26 = vadd.f32 %v627_v25, %v501_v24  ;;  %v2667_v28 = vpop.f32.mrf.mxu0 }
 0x100   : > { %v2703_v29 = vpop.f32.mrf.mxu1 }
 0x101   : > { %v504_v30 = vpop.f32.mrf.mxu0 }
 0x102   : > { %v630_v31 = vpop.f32.mrf.mxu1 }
 0x103   : > { %v631_v32 = vadd.f32 %v630_v31, %v504_v30  ;;  %v2668_v33 = vpop.f32.mrf.mxu0 }
 0x104   : > { %v2704_v34 = vpop.f32.mrf.mxu1 }
 0x105   : > { %v509_v35 = vpop.f32.mrf.mxu0 }
 0x106   : > { %v635_v27 = vpop.f32.mrf.mxu1 }
 0x107   : > { %v636_v37 = vadd.f32 %v635_v27, %v509_v35  ;;  %v2671_v38 = vpop.f32.mrf.mxu0 }
 0x108   : > { %v2707_v39 = vpop.f32.mrf.mxu1 }
 0x109   : > { %v512_v40 = vpop.f32.mrf.mxu0 }
 0x10a   : > { %v638_v41 = vpop.f32.mrf.mxu1 }
 0x10b   : > { %v639_v42 = vadd.f32 %v638_v41, %v512_v40  ;;  %v2672_v43 = vpop.f32.mrf.mxu0 }
 0x10c   : > { %v2708_v44 = vpop.f32.mrf.mxu1 }
 0x10d   : > { %v517_v46 = vpop.f32.mrf.mxu0 }
 0x10e   : > { %v643_v47 = vpop.f32.mrf.mxu1 }
 0x10f   : > { %v644_v48 = vadd.f32 %v643_v47, %v517_v46  ;;  %v2675_v49 = vpop.f32.mrf.mxu0 }
 0x110   : > { %v2711_v36 = vpop.f32.mrf.mxu1 }
 0x111   : > { %v520_v50 = vpop.f32.mrf.mxu0 }
 0x112   : > { %v646_v52 = vpop.f32.mrf.mxu1 }
 0x113   : > { %v647_v53 = vadd.f32 %v646_v52, %v520_v50  ;;  %v2676_v54 = vpop.f32.mrf.mxu0 }
 0x114   : > { %v2712_v55 = vpop.f32.mrf.mxu1 }
 0x115   : > { %v770_v56 = vpop.f32.mrf.mxu0 }
 0x116   : > { %v809_v57 = vadd.f32 %v770_v56, %v612_v4  ;;  %v973_v58 = vpop.f32.mrf.mxu1 }
 0x117   : > { %v2731_v59 = vpop.f32.mrf.mxu0 }
 0x118   : > { %v1012_v60 = vadd.f32 %v973_v58, %v809_v57  ;;  %v2767_v61 = vpop.f32.mrf.mxu1 }
 0x119   : > { %v773_v45 = vpop.f32.mrf.mxu0 }
 0x11a   : > { %v810_v62 = vadd.f32 %v773_v45, %v615_v10  ;;  %v976_v63 = vpop.f32.mrf.mxu1 }
 0x11b   : > { %v2732_v0 = vpop.f32.mrf.mxu0 }
 0x11c   : > { %v1013_v51 = vadd.f32 %v976_v63, %v810_v62  ;;  %v2768_v2 = vpop.f32.mrf.mxu1 }
 0x11d   : > { %v778_v3 = vpop.f32.mrf.mxu0 }
 0x11e   : > { %v811_v5 = vadd.f32 %v778_v3, %v620_v18  ;;  %v981_v6 = vpop.f32.mrf.mxu1 }
 0x11f   : > { %v2735_v7 = vpop.f32.mrf.mxu0 }
 0x120   : > { %v1014_v8 = vadd.f32 %v981_v6, %v811_v5  ;;  %v2771_v9 = vpop.f32.mrf.mxu1 }
 0x121   : > { %v781_v11 = vpop.f32.mrf.mxu0 }
 0x122   : > { %v812_v12 = vadd.f32 %v781_v11, %v623_v22  ;;  %v984_v13 = vpop.f32.mrf.mxu1 }
 0x123   : > { %v2736_v4 = vpop.f32.mrf.mxu0 }
 0x124   : > { %v1015_v14 = vadd.f32 %v984_v13, %v812_v12  ;;  %v2772_v16 = vpop.f32.mrf.mxu1 }
 0x125   : > { %v786_v17 = vpop.f32.mrf.mxu0 }
 0x126   : > { %v813_v15 = vadd.f32 %v786_v17, %v628_v26  ;;  %v989_v20 = vpop.f32.mrf.mxu1 }
 0x127   : > { %v2739_v10 = vpop.f32.mrf.mxu0 }
 0x128   : > { %v1016_v21 = vadd.f32 %v989_v20, %v813_v15  ;;  %v2775_v1 = vpop.f32.mrf.mxu1 }
 0x129   : > { %v789_v19 = vpop.f32.mrf.mxu0 }
 0x12a   : > { %v814_v23 = vadd.f32 %v789_v19, %v631_v32  ;;  %v992_v24 = vpop.f32.mrf.mxu1 }
 0x12b   : > { %v2740_v18 = vpop.f32.mrf.mxu0 }
 0x12c   : > { %v1017_v25 = vadd.f32 %v992_v24, %v814_v23  ;;  %v2776_v28 = vpop.f32.mrf.mxu1 }
 0x12d   : > { %v794_v29 = vpop.f32.mrf.mxu0 }
 0x12e   : > { %v815_v30 = vadd.f32 %v794_v29, %v636_v37  ;;  %v997_v31 = vpop.f32.mrf.mxu1 }
 0x12f   : > { %v2743_v22 = vpop.f32.mrf.mxu0 }
 0x130   : > { %v3731_v33 = vadd.f32 %v997_v31, %v815_v30  ;;  %v2779_v34 = vpop.f32.mrf.mxu1 }
 0x131   : > { %v797_v35 = vpop.f32.mrf.mxu0 }
 0x132   : > { %v816_v27 = vadd.f32 %v797_v35, %v639_v42  ;;  %v1000_v26 = vpop.f32.mrf.mxu1 }
 0x133   : > { %v2744_v38 = vpop.f32.mrf.mxu0 }
 0x134   : > { %v3733_v39 = vadd.f32 %v1000_v26, %v816_v27  ;;  %v2780_v40 = vpop.f32.mrf.mxu1 }
 0x135   : > { %v802_v41 = vpop.f32.mrf.mxu0 }
 0x136   : > { %v817_v32 = vadd.f32 %v802_v41, %v644_v48  ;;  %v1005_v43 = vpop.f32.mrf.mxu1 }
 0x137   : > { %v2747_v44 = vpop.f32.mrf.mxu0 }
 0x138   : > { %v3735_v46 = vadd.f32 %v1005_v43, %v817_v32  ;;  %v2783_v47 = vpop.f32.mrf.mxu1 }
 0x139   : > { %v805_v37 = vpop.f32.mrf.mxu0 }
 0x13a   : > { %v818_v49 = vadd.f32 %v805_v37, %v647_v53  ;;  %v1008_v36 = vpop.f32.mrf.mxu1 }
 0x13b   : > { %v2748_v50 = vpop.f32.mrf.mxu0 }
 0x13c   : > { %v3737_v52 = vadd.f32 %v1008_v36, %v818_v49  ;;  %v2784_v54 = vpop.f32.mrf.mxu1 }
 0x13d   : > { %v1184_v42 = vpop.f32.mrf.mxu0 }
 0x13e   : > { %v1223_v55 = vadd.f32 %v1184_v42, %v1012_v60  ;;  %v1353_v56 = vpop.f32.mrf.mxu1 }
 0x13f   : > { %v2803_v57 = vpop.f32.mrf.mxu0 }
 0x140   : > { %v3739_v58 = vadd.f32 %v1353_v56, %v1223_v55  ;;  %v2839_v59 = vpop.f32.mrf.mxu1 }
 0x141   : > { %v1187_v48 = vpop.f32.mrf.mxu0 }
 0x142   : > { %v1224_v61 = vadd.f32 %v1187_v48, %v1013_v51  ;;  %v1356_v45 = vpop.f32.mrf.mxu1 }
 0x143   : > { %v2804_v62 = vpop.f32.mrf.mxu0 }
 0x144   : > { %v3741_v63 = vadd.f32 %v1356_v45, %v1224_v61  ;;  %v2840_v0 = vpop.f32.mrf.mxu1 }
 0x145   : > { %v1192_v53 = vpop.f32.mrf.mxu0 }
 0x146   : > { %v1225_v2 = vadd.f32 %v1192_v53, %v1014_v8  ;;  %v1361_v3 = vpop.f32.mrf.mxu1 }
 0x147   : > { %v2807_v5 = vpop.f32.mrf.mxu0 }
 0x148   : > { %v3743_v6 = vadd.f32 %v1361_v3, %v1225_v2  ;;  %v2843_v7 = vpop.f32.mrf.mxu1 }
 0x149   : > { %v1195_v60 = vpop.f32.mrf.mxu0 }
 0x14a   : > { %v1226_v9 = vadd.f32 %v1195_v60, %v1015_v14  ;;  %v1364_v11 = vpop.f32.mrf.mxu1 }
 0x14b   : > { %v2808_v12 = vpop.f32.mrf.mxu0 }
 0x14c   : > { %v3745_v13 = vadd.f32 %v1364_v11, %v1226_v9  ;;  %v2844_v4 = vpop.f32.mrf.mxu1 }
 0x14d   : > { %v1200_v51 = vpop.f32.mrf.mxu0 }
 0x14e   : > { %v1227_v16 = vadd.f32 %v1200_v51, %v1016_v21  ;;  %v1369_v17 = vpop.f32.mrf.mxu1 }
 0x14f   : > { %v2811_v15 = vpop.f32.mrf.mxu0 }
 0x150   : > { %v3747_v20 = vadd.f32 %v1369_v17, %v1227_v16  ;;  %v2847_v10 = vpop.f32.mrf.mxu1 }
 0x151   : > { %v1203_v8 = vpop.f32.mrf.mxu0 }
 0x152   : > { %v1228_v1 = vadd.f32 %v1203_v8, %v1017_v25  ;;  %v1372_v19 = vpop.f32.mrf.mxu1 }
 0x153   : > { %v2812_v23 = vpop.f32.mrf.mxu0 }
 0x154   : > { %v3749_v24 = vadd.f32 %v1372_v19, %v1228_v1  ;;  %v2848_v18 = vpop.f32.mrf.mxu1 }
 0x155   : > { %v1208_v14 = vpop.f32.mrf.mxu0 }
 0x156   : > { %v1377_v28 = vpop.f32.mrf.mxu1  ;;  %v1229_v17 = vadd.f32 %v1208_v14, %v3731_v33 }
 0x157   : > { %v2815_v29 = vpop.f32.mrf.mxu0 }
 0x158   : > { %v2851_v30 = vpop.f32.mrf.mxu1  ;;  %v1398_v19 = vadd.f32 %v1377_v28, %v1229_v17 }
 0x159   : > { %v1211_v31 = vpop.f32.mrf.mxu0 }
 0x15a   : > { %v1380_v22 = vpop.f32.mrf.mxu1  ;;  %v1230_v23 = vadd.f32 %v1211_v31, %v3733_v39 }
 0x15b   : > { %v2816_v34 = vpop.f32.mrf.mxu0 }
 0x15c   : > { %v2852_v21 = vpop.f32.mrf.mxu1  ;;  %v1399_v33 = vadd.f32 %v1380_v22, %v1230_v23 }
 0x15d   : > { %v1216_v35 = vpop.f32.mrf.mxu0 }
 0x15e   : > { %v3751_v27 = vpop.f32.mrf.mxu1  ;;  %v1231_v14 = vadd.f32 %v1216_v35, %v3735_v46 }
 0x15f   : > { %v2819_v26 = vpop.f32.mrf.mxu0 }
 0x160   : > { %v2855_v38 = vpop.f32.mrf.mxu1  ;;  %v1400_v22 = vadd.f32 %v3751_v27, %v1231_v14 }
 0x161   : > { %v3753_v40 = vpop.f32.mrf.mxu0 }
 0x162   : > { %v3755_v25 = vpop.f32.mrf.mxu1  ;;  %v1232_v46 = vadd.f32 %v3753_v40, %v3737_v52 }
 0x163   : > { %v2820_v41 = vpop.f32.mrf.mxu0 }
 0x164   : > { %v2856_v32 = vpop.f32.mrf.mxu1  ;;  %v1401_v40 = vadd.f32 %v3755_v25, %v1232_v46 }
 0x165   : > { %v1556_v43 = vpop.f32.mrf.mxu0 }
 0x166   : > { %v1767_v44 = vpop.f32.mrf.mxu1  ;;  %v1595_v29 = vadd.f32 %v1556_v43, %v3739_v58  ;;  %v3789_v43 = vld [vmem:[%s3845_s2] ss:$0 sm:$0xff] }
 0x167   : > { %v2875_v47 = vpop.f32.mrf.mxu0 }
 0x168   : > { %v2911_v37 = vpop.f32.mrf.mxu1  ;;  %v1806_v28 = vadd.f32 %v1767_v44, %v1595_v29  ;;  %v2472_v47 = vld [vmem:[%s3782_s21] sm:$0xff]  }
 0x169   : > { %v1559_v49 = vpop.f32.mrf.mxu0 }
 0x16a   : > { %v1770_v36 = vpop.f32.mrf.mxu1  ;;  %v1596_v58 = vadd.f32 %v1559_v49, %v3741_v63 }
 0x16b   : > { %v2876_v50 = vpop.f32.mrf.mxu0 }
 0x16c   : > { %v2912_v54 = vpop.f32.mrf.mxu1  ;;  %v1807_v44 = vadd.f32 %v1770_v36, %v1596_v58 }
 0x16d   : > { %v1564_v42 = vpop.f32.mrf.mxu0  ;;  %v2518_v54 = vld [vmem:[%s3782_s21 + $0x18] sm:$0xff]  }
 0x16e   : > { %v3757_v55 = vpop.f32.mrf.mxu1  ;;  %v1597_v49 = vadd.f32 %v1564_v42, %v3743_v6  ;;  %v2486_v42 = vunpack.c.h.bf16 %v2518_v54 }
 0x16f   : > { %v2879_v56 = vpop.f32.mrf.mxu0 }
 0x170   : > { %v2915_v57 = vpop.f32.mrf.mxu1 }
 0x171   : > { %v3759_v59 = vpop.f32.mrf.mxu0  ;;  %v2473_v57 = vunpack.c.l.bf16 %v2472_v47 }
 0x172   : > { %v3761_v48 = vpop.f32.mrf.mxu1  ;;  %v1598_v6 = vadd.f32 %v3759_v59, %v3745_v13 }
 0x173   : > { %v2880_v61 = vpop.f32.mrf.mxu0 }
 0x174   : > { %v2916_v45 = vpop.f32.mrf.mxu1 }
 0x175   : > { %v3763_v62 = vpop.f32.mrf.mxu0 }
 0x176   : > { %v3765_v0 = vpop.f32.mrf.mxu1 }
 0x177   : > { %v2883_v53 = vpop.f32.mrf.mxu0 }
 0x178   : > { %v2919_v2 = vpop.f32.mrf.mxu1 }
 0x179   : > { %v3767_v3 = vpop.f32.mrf.mxu0 }
 0x17a   : > { %v3769_v5 = vpop.f32.mrf.mxu1 }
 0x17b   : > { %v2884_v7 = vpop.f32.mrf.mxu0 }
 0x17c   : > { %v2920_v60 = vpop.f32.mrf.mxu1  ;;  %v2485_v7 = vunpack.c.l.bf16 %v2518_v54 }
 0x17d   : > { %v1580_v9 = vpop.f32.mrf.mxu0 }
 0x17e   : > { %v1791_v11 = vpop.f32.mrf.mxu1  ;;  %v1601_v34 = vadd.f32 %v1580_v9, %v1398_v19  ;;  %v2474_v9 = vunpack.c.h.bf16 %v2472_v47 }
 0x17f   : > { %v2887_v12 = vpop.f32.mrf.mxu0 }
 0x180   : > { %v2923_v4 = vpop.f32.mrf.mxu1  ;;  %v1812_v38 = vadd.f32 %v1791_v11, %v1601_v34  ;;  %v2516_v12 = vld [vmem:[%s3782_s21 + $0x8] sm:$0xff]  }
 0x181   : > { %v1583_v51 = vpop.f32.mrf.mxu0  ;;  %v1808_v4 = vadd.f32 %v3757_v55, %v1597_v49  ;;  %v2477_v59 = vunpack.c.l.bf16 %v2516_v12  ;;  %v2478_v47 = vunpack.c.h.bf16 %v2516_v12  ;;  %v2517_v49 = vld [vmem:[%s3782_s21 + $0x10] sm:$0xff]  }
 0x182   : > { %v1794_v16 = vpop.f32.mrf.mxu1  ;;  %v1602_v41 = vadd.f32 %v1583_v51, %v1399_v33 }
 0x183   : > { %v2888_v15 = vpop.f32.mrf.mxu0 }
 0x184   : > { %v2924_v10 = vpop.f32.mrf.mxu1  ;;  %v1813_v45 = vadd.f32 %v1794_v16, %v1602_v41  ;;  %v2519_v15 = vld [vmem:[%s3782_s21 + $0x20] sm:$0xff]  }
 0x185   : > { %v1588_v8 = vpop.f32.mrf.mxu0  ;;  %v2489_v33 = vunpack.c.l.bf16 %v2519_v15  ;;  %v2490_v54 = vunpack.c.h.bf16 %v2519_v15 }
 0x186   : > { %v1799_v1 = vpop.f32.mrf.mxu1  ;;  %v1603_v53 = vadd.f32 %v1588_v8, %v1400_v22 }
 0x187   : > { %v2891_v18 = vpop.f32.mrf.mxu0 }
 0x188   : > { %v2927_v30 = vpop.f32.mrf.mxu1  ;;  %v1814_v10 = vadd.f32 %v1799_v1, %v1603_v53 }
 0x189   : > { %v1591_v21 = vpop.f32.mrf.mxu0  ;;  %v1809_v30 = vadd.f32 %v3761_v48, %v1598_v6 }
 0x18a   : > { %v3775_v26 = vpop.f32.mrf.mxu1  ;;  %v1604_v8 = vadd.f32 %v1591_v21, %v1401_v40 }
 0x18b   : > { %v2892_v39 = vpop.f32.mrf.mxu0 }
 0x18c   : > { %v2928_v31 = vpop.f32.mrf.mxu1  ;;  %v1599_v39 = vadd.f32 %v3763_v62, %v3747_v20 }
 0x18d   : > { %v1936_v32 = vpop.f32.mrf.mxu0  ;;  %v1815_v31 = vadd.f32 %v3775_v26, %v1604_v8 }
 0x18e   : > { %v1975_v37 = vadd.f32 %v1936_v32, %v1806_v28  ;;  %v1960_v50 = vpop.f32.mrf.mxu1  ;;  %v1810_v46 = vadd.f32 %v3765_v0, %v1599_v39 }
 0x18f   : > { %v1981_v35 = vadd.f32 %v1960_v50, %v1812_v38  ;;  %v2947_v63 = vpop.f32.mrf.mxu0 }
 0x190   : > { %v1992_v56 = vadd.f32 %v3789_v43, %v1975_v37  ;;  %v2959_v61 = vpop.f32.mrf.mxu1 }
 0x191   : > { %v1998_v2 = vadd.f32 %v3789_v43, %v1981_v35  ;;  %v1939_v27 = vpop.f32.mrf.mxu0  ;;  %v1600_v35 = vadd.f32 %v3767_v3, %v3749_v24 }
 0x192   : > { %v1976_v60 = vadd.f32 %v1939_v27, %v1807_v44  ;;  %v1963_v52 = vpop.f32.mrf.mxu1  ;;  %v2022_v51 = vadd.f32 %v2473_v57, %v1992_v56  ;;  %v2481_v27 = vunpack.c.l.bf16 %v2517_v49 }
 0x193   : > { %v1982_v36 = vadd.f32 %v1963_v52, %v1813_v45  ;;  %v2948_v11 = vpop.f32.mrf.mxu0  ;;  %v2028_v19 = vadd.f32 %v2485_v7, %v1998_v2  ;;  %v1811_v24 = vadd.f32 %v3769_v5, %v1600_v35 }
 0x194   : > { %v1993_v16 = vadd.f32 %v3789_v43, %v1976_v60  ;;  %v2960_v17 = vpop.f32.mrf.mxu1  ;;  %v2032_v1 = vmax.f32 %v2022_v51, 0.0  ;;  %v2482_v11 = vunpack.c.h.bf16 %v2517_v49 }
 0x195   : > { %v1999_v23 = vadd.f32 %v3789_v43, %v1982_v36  ;;  %v1944_v25 = vpop.f32.mrf.mxu0  ;;  %v2038_v38 = vmax.f32 %v2028_v19, 0.0 }
 0x196   : > { %v2023_v18 = vadd.f32 %v2474_v9, %v1993_v16  ;;  %v1977_v13 = vadd.f32 %v1944_v25, %v1808_v4  ;;  %v1968_v29 = vpop.f32.mrf.mxu1 }
 0x197   : > { %v2029_v34 = vadd.f32 %v2486_v42, %v1999_v23  ;;  %v1983_v55 = vadd.f32 %v1968_v29, %v1814_v10  ;;  %v2951_v14 = vpop.f32.mrf.mxu0 }
 0x198   : > { %v2033_v21 = vmax.f32 %v2023_v18, 0.0  ;;  %v1994_v28 = vadd.f32 %v3789_v43, %v1977_v13  ;;  %v2963_v58 = vpop.f32.mrf.mxu1 }
 0x199   : > { %v2039_v48 = vmax.f32 %v2029_v34, 0.0  ;;  %v2000_v41 = vadd.f32 %v3789_v43, %v1983_v55  ;;  %v1947_v20 = vpop.f32.mrf.mxu0 }
 0x19a   : > { %v2494_v62 = vpack.c.bf16 %v2033_v21, %v2032_v1  ;;  %v1978_v32 = vadd.f32 %v1947_v20, %v1809_v30  ;;  %v1971_v37 = vpop.f32.mrf.mxu1  ;;  %v2024_v63 = vadd.f32 %v2477_v59, %v1994_v28 }
 0x19b   : > { %v2509_v50 = vpack.c.bf16 %v2039_v48, %v2038_v38  ;;  %v1984_v26 = vadd.f32 %v1971_v37, %v1815_v31  ;;  %v2952_v22 = vpop.f32.mrf.mxu0  ;;  %v2030_v57 = vadd.f32 %v2489_v33, %v2000_v41 }
 0x19c   : > { %2495 = vst [vmem:[%s3817_s26] sm:$0xff] %v2494_v62   ;;  %v1995_v44 = vadd.f32 %v3789_v43, %v1978_v32  ;;  %v2964_v56 = vpop.f32.mrf.mxu1  ;;  %v2034_v3 = vmax.f32 %v2024_v63, 0.0 }
 0x19d   : > { %2522 = vst [vmem:[%s3817_s26 + $0x18] sm:$0xff] %v2509_v50   ;;  %v2001_v61 = vadd.f32 %v3789_v43, %v1984_v26  ;;  %v1952_v45 = vpop.f32.mrf.mxu0  ;;  %v2040_v52 = vmax.f32 %v2030_v57, 0.0 }
 0x19e   : > { %v2025_v53 = vadd.f32 %v2478_v47, %v1995_v44  ;;  %v1979_v2 = vadd.f32 %v1952_v45, %v1810_v46 }
 0x19f   : > { %v2031_v7 = vadd.f32 %v2490_v54, %v2001_v61  ;;  %v2955_v0 = vpop.f32.mrf.mxu0 }
 0x1a0   : > { %v2035_v60 = vmax.f32 %v2025_v53, 0.0  ;;  %v1996_v9 = vadd.f32 %v3789_v43, %v1979_v2 }
 0x1a1   : > { %v2041_v40 = vmax.f32 %v2031_v7, 0.0  ;;  %v1955_v6 = vpop.f32.mrf.mxu0 }
 0x1a2   : > { %v2499_v36 = vpack.c.bf16 %v2035_v60, %v2034_v3  ;;  %v1980_v42 = vadd.f32 %v1955_v6, %v1811_v24  ;;  %v2026_v51 = vadd.f32 %v2481_v27, %v1996_v9 }
 0x1a3   : > { %v2514_v12 = vpack.c.bf16 %v2041_v40, %v2040_v52  ;;  %v2956_v4 = vpop.f32.mrf.mxu0 }
 0x1a4   : > { %2520 = vst [vmem:[%s3817_s26 + $0x8] sm:$0xff] %v2499_v36   ;;  %v1997_v16 = vadd.f32 %v3789_v43, %v1980_v42  ;;  %v2036_v5 = vmax.f32 %v2026_v51, 0.0 }
 0x1a5   : > { %2523 = vst [vmem:[%s3817_s26 + $0x20] sm:$0xff] %v2514_v12  }
 0x1a6   : > { %v2027_v17 = vadd.f32 %v2482_v11, %v1997_v16 }
 0x1a8   : > { %v2037_v15 = vmax.f32 %v2027_v17, 0.0 }
 0x1aa   : > { %v2504_v10 = vpack.c.bf16 %v2037_v15, %v2036_v5 }
 0x1ac   : > { %2521 = vst [vmem:[%s3817_s26 + $0x10] sm:$0xff] %v2504_v10  }
 0x1ad PF: > { %s14_s17 = sadd.s32 1, %s3126_s17   ;;  %s3848_s15 = smov %s3122_s16 }
 0x1ae   : > { %p11_p5 = scmp.ge.s32.totalorder %s14_s17, 4   ;;  %s3849_s16 = smov %s3851_s18 }
 0x1b0   :  { %13 = sbr.rel (!%p11_p5) target bundleno = 2 (0x2), region = 83 }

// kernel: run.8
= control target key start
LH: loop header
LB: loop body
LE: loop exit
PB: predicated region body
PF: predicated region fallthrough
CT: control target
= control target key end

     0   :  { %s3019_s12 = smov 0   ;;  %s3021_s13 = smov 0   ;;  %s3681_s0 = inlined_call_operand.vmem [shape: bf16[2,116,128], index: 0, kind: input, shape index: {}]   ;;  %s3682_s1 = inlined_call_operand.vmem [shape: bf16[9,128,128], index: 1, kind: input, shape index: {}]   ;;  %s3683_s2 = inlined_call_operand.vmem [shape: f32[1,128], index: 2, kind: input, shape index: {}]   ;;  %s3684_s3 = inlined_call_operand.vmem [shape: bf16[2,80,128], index: 3, kind: output, shape index: {}]  }
   0x1   :  { %s3023_s14 = smov 0  }
   0x2 LB: > { %s25_s15 = sadd.s32 1, %s2991_s13  ;;  %p2115_p0 = scmp.ge.s32.totalorder %s2995_s14, 1  ;;  %s2995_s14 = sphi %s3023_s14, %s13_s14   ;;  %s2991_s13 = sphi %s3021_s13, %s3686_s13   ;;  %s2987_s12 = sphi %s3019_s12, %s3685_s12  }
   0x3   : > { %p27_p1 = scmp.ge.s32.totalorder %s25_s15, 2  ;;  %p168_p2 = scmp.lt.s32.totalorder %s2995_s14, 3 }
   0x5   : > { %s3688_s15 = smov (%p27_p1, %s25_s15), 0  ;;  %p169_p3 = pnand %p2115_p0, %p168_p2 }
   0x6   : > { %p202_p4 = scmp.lt.s32.totalorder (!%p169_p3), %s2987_s12, 1 }
   0x7   : > { %172 = sbr.rel (%p169_p3) target bundleno = 427 (0x1ab), region = 32 }
   0xc   : > { %v2878_v0 = vld [vmem:[%s3682_s1 + $0x78] sm:$0xff]   ;;  %v2997_v1 = vmov 0.0   ;;  %v2880_v3 = vld [vmem:[%s3682_s1 + $0x70] sm:$0xff]   ;;  %vm2998_vm0 = vmmov 0   ;;  %s3690_s12 = smov (!%p202_p4, %s2987_s12), 1  ;;  %v2882_v5 = vld [vmem:[%s3682_s1 + $0x68] sm:$0xff]  }
   0xd   : > { %2510 = vmatprep.subr.bf16.mxu0 %v2997_v1  ;;  %2546 = vmatprep.subr.bf16.mxu1 %v2997_v1  ;;  %v2879_v2 = vld [vmem:[%s3682_s1 + $0x38] sm:$0xff]   ;;  %v2881_v4 = vld [vmem:[%s3682_s1 + $0x30] sm:$0xff]   ;;  %v2883_v6 = vld [vmem:[%s3682_s1 + $0x28] sm:$0xff]   ;;  %s2850_s28 = smul.u32 60, %s3690_s12  ;;  %vm295_vm1 = vsmask.f32 7424 }
   0xe   : > { %2511 = vmatpush3.bf16.msra.mxu0 %v2878_v0  ;;  %2526 = vmatprep.mubr.msk.bf16.mxu0 %vm2998_vm0, %v2997_v1  ;;  %v2884_v7 = vld [vmem:[%s3682_s1 + $0x60] sm:$0xff]   ;;  %v2886_v9 = vld [vmem:[%s3682_s1 + $0x58] sm:$0xff]   ;;  %v2888_v13 = vld [vmem:[%s3682_s1 + $0x50] sm:$0xff]   ;;  %vm613_vm2 = vcmask 1046528   ;;  %vm985_vm3 = vsmask.f32 6400 }
   0xf   : > { %2547 = vmatpush3.bf16.msra.mxu1 %v2879_v2  ;;  %2512 = vmatprep.subr.bf16.mxu0 %v2997_v1  ;;  %v2885_v8 = vld [vmem:[%s3682_s1 + $0x20] sm:$0xff]   ;;  %s3079_s8 = scalar_lea.vmem %s3681_s0, %s2850_s28  ;;  %v2887_v10 = vld [vmem:[%s3682_s1 + $0x18] sm:$0xff]   ;;  %v2889_v16 = vld [vmem:[%s3682_s1 + $0x10] sm:$0xff]   ;;  %vm1196_vm4 = vcmask 1045504   ;;  %vm1568_vm5 = vsmask.f32 5376 }
  0x10   : > { %2548 = vmatprep.subr.bf16.mxu1 %v2997_v1  ;;  %2562 = vmatprep.mubr.msk.bf16.mxu1 %vm2998_vm0, %v2997_v1  ;;  %v223_v11 = vld [vmem:[%s3079_s8] sm:$0xf]  ;;  %v3091_v12 = vld [vmem:[%s3079_s8 + $0x4] sm:$0xf]  ;;  %v3098_v15 = vld [vmem:[%s3079_s8 + $0x8] sm:$0xff]   ;;  %vm1779_vm6 = vcmask 1044480  }
  0x11   : > { %v2134_v14 = vcombine.low %v223_v11, %v3091_v12  ;;  %v2890_v18 = vld [vmem:[%s3682_s1 + $0x48] sm:$0xff]   ;;  %v304_v21 = vshll.u32 %v3098_v15, 16  ;;  %v2892_v23 = vld [vmem:[%s3682_s1 + $0x40] sm:$0xff]   ;;  %v3121_v27 = vld [vmem:[%s3079_s8 + $0x10] sm:$0xff]   ;;  %v308_v30 = vshrl.u32 %v3098_v15, 16  ;;  %s2851_s5 = smul.u32 40, %s3690_s12 }
  0x12   : > { %2513 = vmatpush3.bf16.msra.mxu0 %v2880_v3  ;;  %v2891_v22 = vld [vmem:[%s3682_s1 + $0x8] sm:$0xff]   ;;  %v2893_v24 = vld [vmem:[%s3682_s1] sm:$0xff]   ;;  %v2896_v28 = vld [vmem:[%s3682_s1 + $0xb8] sm:$0xff]   ;;  %v312_v31 = vshll.u32 %v3121_v27, 16  ;;  %v316_v41 = vshrl.u32 %v3121_v27, 16 }
  0x13   : > { %2549 = vmatpush3.bf16.msra.mxu1 %v2881_v4  ;;  %2514 = vmatprep.subr.bf16.mxu0 %v2997_v1  ;;  %v299_v17 = vshll.u32 %v2134_v14, 16  ;;  %v297_v19 = vshrl.u32 %v2134_v14, 16  ;;  %v306_v26 = vrot.slane %v304_v21, 1  ;;  %v2899_v32 = vld [vmem:[%s3682_s1 + $0xf8] sm:$0xff]   ;;  %v2897_v34 = vld [vmem:[%s3682_s1 + $0xb0] sm:$0xff]   ;;  %v2900_v40 = vld [vmem:[%s3682_s1 + $0xa8] sm:$0xff]   ;;  %s3652_s7 = scalar_lea.vmem %s3684_s3, %s2851_s5 }
  0x14   : > { %2550 = vmatprep.subr.bf16.mxu1 %v2997_v1  ;;  %v3137_v33 = vld [vmem:[%s3079_s8 + $0x18] sm:$0xff]   ;;  %v314_v36 = vrot.slane %v312_v31, 1  ;;  %v2901_v37 = vld [vmem:[%s3682_s1 + $0xf0] sm:$0xff]   ;;  %v2904_v42 = vld [vmem:[%s3682_s1 + $0xe8] sm:$0xff]   ;;  %v617_v21 = vrot.slane %v3121_v27, 1 }
  0x15   : > { %v301_v20 = vrot.slane %v299_v17, 1  ;;  %v310_v35 = vor.u32 %v308_v30, %v306_v26  ;;  %v320_v38 = vshll.u32 %v3137_v33, 16  ;;  %v2903_v44 = vld [vmem:[%s3682_s1 + $0xa0] sm:$0xff]   ;;  %v2905_v48 = vld [vmem:[%s3682_s1 + $0x98] sm:$0xff]   ;;  %v324_v50 = vshrl.u32 %v3137_v33, 16  ;;  %v2909_v56 = vld [vmem:[%s3682_s1 + $0x90] sm:$0xff]  }
  0x16   : > { %2515 = vmatpush3.bf16.msra.mxu0 %v2882_v5  ;;  %v3166_v45 = vld [vmem:[%s3079_s8 + $0x20] sm:$0xff]   ;;  %v318_v46 = vor.u32 %v316_v41, %v314_v36  ;;  %v2908_v52 = vld [vmem:[%s3682_s1 + $0xd8] sm:$0xff]   ;;  %v3189_v53 = vld [vmem:[%s3079_s8 + $0x28] ss:$0 sps:$4 sm:$0x11]  }
  0x17   : > { %2551 = vmatpush3.bf16.msra.mxu1 %v2883_v6  ;;  %2516 = vmatprep.subr.bf16.mxu0 %v2997_v1  ;;  %v302_v25 = vor.u32 %v301_v20, %v297_v19  ;;  %v315_v39 = vsel %vm295_vm1, %v310_v35, %v314_v36  ;;  %v322_v43 = vrot.slane %v320_v38, 1  ;;  %v2906_v47 = vld [vmem:[%s3682_s1 + $0xe0] sm:$0xff]   ;;  %v328_v51 = vshll.u32 %v3166_v45, 16  ;;  %v2910_v57 = vld [vmem:[%s3682_s1 + $0xd0] sm:$0xff]   ;;  %v2911_v61 = vld [vmem:[%s3682_s1 + $0x88] sm:$0xff]  }
  0x18   : > { %2552 = vmatprep.subr.bf16.mxu1 %v2997_v1  ;;  %v332_v59 = vshrl.u32 %v3166_v45, 16  ;;  %v336_v60 = vshll.u32 %v3189_v53, 16  ;;  %v2913_v62 = vld [vmem:[%s3682_s1 + $0xc8] sm:$0xff]   ;;  %v2914_v63 = vld [vmem:[%s3682_s1 + $0x80] sm:$0xff]   ;;  %v2919_v17 = vld [vmem:[%s3682_s1 + $0x138] sm:$0xff]   ;;  %v621_v38 = vrot.slane %v3166_v45, 1 }
  0x19   : > { %v307_v29 = vsel %vm295_vm1, %v302_v25, %v306_v26  ;;  %v323_v49 = vsel %vm295_vm1, %v318_v46, %v322_v43  ;;  %v326_v54 = vor.u32 %v324_v50, %v322_v43  ;;  %v330_v55 = vrot.slane %v328_v51, 1  ;;  %v2915_v3 = vld [vmem:[%s3682_s1 + $0xc0] sm:$0xff]   ;;  %v3231_v6 = vld [vmem:[%s3079_s8 + $0x8] sm:$0xf]  ;;  %v3258_v19 = vld [vmem:[%s3079_s8 + $0x14] sm:$0xff]  }
  0x1a   : > { %2517 = vmatpush3.bf16.msra.mxu0 %v2884_v7  ;;  %v338_v2 = vrot.slane %v336_v60, 1  ;;  %v592_v4 = vld [vmem:[%s3079_s8] sm:$0xe]  ;;  %v761_v5 = vld [vmem:[%s3079_s8 + $0x4] sm:$0xe]  ;;  %v2920_v20 = vld [vmem:[%s3682_s1 + $0x130] sm:$0xff]  }
  0x1b   : > { %2553 = vmatpush3.bf16.msra.mxu1 %v2885_v8  ;;  %2518 = vmatprep.subr.bf16.mxu0 %v2997_v1  ;;  %v331_v58 = vsel %vm295_vm1, %v326_v54, %v330_v55  ;;  %v334_v0 = vor.u32 %v332_v59, %v330_v55  ;;  %v2172_v8 = vcombine.low %v592_v4, %v3091_v12  ;;  %v615_v12 = vrot.slane %v3098_v15, 1  ;;  %v2923_v25 = vld [vmem:[%s3682_s1 + $0x128] sm:$0xff]   ;;  %v2926_v30 = vld [vmem:[%s3682_s1 + $0x120] sm:$0xff]   ;;  %v2933_v41 = vld [vmem:[%s3682_s1 + $0x150] sm:$0xff]  }
  0x1c   : > { %2554 = vmatprep.subr.bf16.mxu1 %v2997_v1  ;;  %v3311_v36 = vld [vmem:[%s3079_s8 + $0x24] sm:$0xff]   ;;  %v2935_v43 = vld [vmem:[%s3079_s8 + $0x2c] ss:$0 sps:$4 sm:$0x11]  }
  0x1d   : > { %v339_v7 = vsel %vm295_vm1, %v334_v0, %v338_v2  ;;  %v614_v11 = vrot.slane %v2172_v8, 1  ;;  %v2936_v46 = vld [vmem:[%s3682_s1 + $0x148] sm:$0xff]   ;;  %v2938_v54 = vld [vmem:[%s3682_s1 + $0x140] sm:$0xff]   ;;  %v1004_v2 = vshrl.u32 %v3258_v19, 16 }
  0x1e   : > { %2519 = vmatpush3.bf16.msra.mxu0 %v2886_v9  ;;  %v3237_v9 = vcombine.low %v761_v5, %v3231_v6  ;;  %v1175_v55 = vld [vmem:[%s3079_s8 + $0x4] sm:$0xc] }
  0x1f   : > { %2555 = vmatpush3.bf16.msra.mxu1 %v2887_v10  ;;  %2520 = vmatprep.subr.bf16.mxu0 %v2997_v1  ;;  %v3240_v10 = vld [vmem:[%s3079_s8 + $0xc] sm:$0xff]   ;;  %v1006_v8 = vrot.slane %v1004_v2, 1 }
  0x20   : > { %2556 = vmatprep.subr.bf16.mxu1 %v2997_v1  ;;  %v995_v50 = vshrl.u32 %v3240_v10, 16  ;;  %v998_v51 = vshll.u32 %v3240_v10, 16  ;;  %v1198_v5 = vrot.slane %v3240_v10, 2 }
  0x22   : > { %2521 = vmatpush3.bf16.msra.mxu0 %v2888_v13  ;;  %v817_v13 = vrot.slane %v3237_v9, 1  ;;  %v997_v59 = vrot.slane %v995_v50, 1  ;;  %v1000_v60 = vrot.slane %v998_v51, 2  ;;  %v3456_v51 = vld [vmem:[%s3079_s8 + $0x10] sm:$0xff]  }
  0x23   : > { %2557 = vmatpush3.bf16.msra.mxu1 %v2889_v16  ;;  %2522 = vmatprep.subr.bf16.mxu0 %v2997_v1  ;;  %v616_v16 = vsel %vm613_vm2, %v614_v11, %v615_v12 }
  0x24   : > { %2558 = vmatprep.subr.bf16.mxu1 %v2997_v1  ;;  %v1001_v0 = vor.u32 %v1000_v60, %v997_v59  ;;  %v1581_v59 = vshll.u32 %v3456_v51, 16  ;;  %v2956_v60 = vld [vmem:[%s3682_s1 + $0x1c0] sm:$0xff]  }
  0x26   : > { %2523 = vmatpush3.bf16.msra.mxu0 %v2890_v18 }
  0x27   : > { %2559 = vmatpush3.bf16.msra.mxu1 %v2891_v22  ;;  %2524 = vmatprep.subr.bf16.mxu0 %v2997_v1  ;;  %v820_v22 = vrot.slane %v3258_v19, 1 }
  0x28   : > { %2560 = vmatprep.subr.bf16.mxu1 %v2997_v1 }
  0x2a   : > { %2525 = vmatpush3.bf16.msra.mxu0 %v2892_v23  ;;  %v2924_v23 = vld [vmem:[%s3682_s1 + $0x170] sm:$0xff]  }
  0x2b   : > { %2561 = vmatpush3.bf16.msra.mxu1 %v2893_v24  ;;  %2582 = vmatprep.subr.bf16.mxu0 %v2997_v1  ;;  %v618_v24 = vsel %vm613_vm2, %v615_v12, %v617_v21  ;;  %v2942_v12 = vld [vmem:[%s3682_s1 + $0x1f8] sm:$0xff]  }
  0x2c   : > { %2618 = vmatprep.subr.bf16.mxu1 %v2997_v1 }
  0x2d   : > { %2527 = vmatmul.mubr.bf16.vlgmr.msra.gmra.mxu0 %v307_v29  ;;  %v619_v29 = vrot.slane %v3137_v33, 1 }
  0x2e   : > { %2563 = vmatmul.mubr.bf16.vlgmr.msra.gmra.mxu1 %v2134_v14  ;;  %2583 = vmatpush3.bf16.msra.mxu0 %v2896_v28  ;;  %v818_v14 = vrot.slane %v3240_v10, 1  ;;  %v2927_v28 = vld [vmem:[%s3682_s1 + $0x168] sm:$0xff]   ;;  %v2941_v10 = vld [vmem:[%s3682_s1 + $0x1b0] sm:$0xff]  }
  0x2f   : > { %2584 = vmatprep.subr.bf16.mxu0 %v2997_v1  ;;  %2530 = vmatprep.mubr.msk.bf16.mxu0 %vm2998_vm0, %v2997_v1 }
  0x30   : > { %2566 = vmatprep.mubr.msk.bf16.mxu1 %vm2998_vm0, %v2997_v1  ;;  %2619 = vmatpush3.bf16.msra.mxu1 %v2899_v32  ;;  %v819_v18 = vsel %vm613_vm2, %v817_v13, %v818_v14  ;;  %v821_v26 = vsel %vm613_vm2, %v818_v14, %v820_v22  ;;  %v2929_v32 = vld [vmem:[%s3682_s1 + $0x160] sm:$0xff]  }
  0x31   : > { %2620 = vmatprep.subr.bf16.mxu1 %v2997_v1 }
  0x32   : > { %2585 = vmatpush3.bf16.msra.mxu0 %v2897_v34  ;;  %v2928_v34 = vld [vmem:[%s3682_s1 + $0x118] sm:$0xff]  }
  0x33   : > { %2586 = vmatprep.subr.bf16.mxu0 %v2997_v1 }
  0x34   : > { %2621 = vmatpush3.bf16.msra.mxu1 %v2901_v37  ;;  %v2931_v37 = vld [vmem:[%s3682_s1 + $0x158] sm:$0xff]  }
  0x35   : > { %2531 = vmatmul.mubr.bf16.gmra.mxu0 %v315_v39  ;;  %2622 = vmatprep.subr.bf16.mxu1 %v2997_v1  ;;  %v2932_v39 = vld [vmem:[%s3682_s1 + $0x110] sm:$0xff]  }
  0x36   : > { %2567 = vmatmul.mubr.bf16.gmra.mxu1 %v3098_v15  ;;  %2587 = vmatpush3.bf16.msra.mxu0 %v2900_v40  ;;  %v2922_v15 = vld [vmem:[%s3682_s1 + $0x178] sm:$0xff]   ;;  %v824_v40 = vrot.slane %v3311_v36, 1 }
  0x37   : > { %2534 = vmatprep.mubr.msk.bf16.mxu0 %vm2998_vm0, %v2997_v1  ;;  %2570 = vmatprep.mubr.msk.bf16.mxu1 %vm2998_vm0, %v2997_v1 }
  0x38   : > { %2588 = vmatprep.subr.bf16.mxu0 %v2997_v1  ;;  %2623 = vmatpush3.bf16.msra.mxu1 %v2904_v42  ;;  %v622_v42 = vsel %vm613_vm2, %v619_v29, %v621_v38 }
  0x39   : > { %2624 = vmatprep.subr.bf16.mxu1 %v2997_v1 }
  0x3a   : > { %2589 = vmatpush3.bf16.msra.mxu0 %v2903_v44 }
  0x3b   : > { %2590 = vmatprep.subr.bf16.mxu0 %v2997_v1 }
  0x3c   : > { %2625 = vmatpush3.bf16.msra.mxu1 %v2906_v47  ;;  %v623_v47 = vrot.slane %v3189_v53, 1  ;;  %v2937_v53 = vld [vmem:[%s3682_s1 + $0x100] sm:$0xff]  }
  0x3d   : > { %2535 = vmatmul.mubr.bf16.gmra.mxu0 %v323_v49  ;;  %2626 = vmatprep.subr.bf16.mxu1 %v2997_v1  ;;  %v990_v49 = vshll.u32 %v3237_v9, 16 }
  0x3e   : > { %2571 = vmatmul.mubr.bf16.gmra.mxu1 %v3121_v27  ;;  %2591 = vmatpush3.bf16.msra.mxu0 %v2905_v48  ;;  %v3284_v27 = vld [vmem:[%s3079_s8 + $0x1c] sm:$0xff]   ;;  %v987_v48 = vshrl.u32 %v3237_v9, 16 }
  0x3f   : > { %2538 = vmatprep.mubr.msk.bf16.mxu0 %vm2998_vm0, %v2997_v1  ;;  %2574 = vmatprep.mubr.msk.bf16.mxu1 %vm2998_vm0, %v2997_v1  ;;  %v822_v31 = vrot.slane %v3284_v27, 1  ;;  %v1013_v14 = vshrl.u32 %v3284_v27, 16 }
  0x40   : > { %2592 = vmatprep.subr.bf16.mxu0 %v2997_v1  ;;  %2627 = vmatpush3.bf16.msra.mxu1 %v2908_v52  ;;  %v826_v52 = vrot.slane %v2935_v43, 1  ;;  %v2951_v43 = vld [vmem:[%s3682_s1 + $0x1d0] sm:$0xff]  }
  0x41   : > { %2628 = vmatprep.subr.bf16.mxu1 %v2997_v1  ;;  %v823_v35 = vsel %vm613_vm2, %v820_v22, %v822_v31  ;;  %v825_v44 = vsel %vm613_vm2, %v822_v31, %v824_v40 }
  0x42   : > { %2593 = vmatpush3.bf16.msra.mxu0 %v2909_v56  ;;  %v624_v56 = vsel %vm613_vm2, %v621_v38, %v623_v47 }
  0x43   : > { %2594 = vmatprep.subr.bf16.mxu0 %v2997_v1 }
  0x44   : > { %2629 = vmatpush3.bf16.msra.mxu1 %v2910_v57  ;;  %v989_v57 = vrot.slane %v987_v48, 1 }
  0x45   : > { %2539 = vmatmul.mubr.bf16.gmra.mxu0 %v331_v58  ;;  %2630 = vmatprep.subr.bf16.mxu1 %v2997_v1  ;;  %v992_v58 = vrot.slane %v990_v49, 2 }
  0x46   : > { %2575 = vmatmul.mubr.bf16.gmra.mxu1 %v3137_v33  ;;  %2542 = vmatprep.mubr.msk.bf16.mxu0 %vm2998_vm0, %v2997_v1  ;;  %v620_v33 = vsel %vm613_vm2, %v617_v21, %v619_v29  ;;  %v1015_v21 = vrot.slane %v1013_v14, 1  ;;  %v1202_v29 = vrot.slane %v3284_v27, 2 }
  0x47   : > { %2578 = vmatprep.mubr.msk.bf16.mxu1 %vm2998_vm0, %v2997_v1  ;;  %2595 = vmatpush3.bf16.msra.mxu0 %v2911_v61  ;;  %v827_v61 = vsel %vm613_vm2, %v824_v40, %v826_v52  ;;  %v2954_v52 = vld [vmem:[%s3682_s1 + $0x1c8] sm:$0xff]  }
  0x48   : > { %2631 = vmatpush3.bf16.msra.mxu1 %v2913_v62  ;;  %2596 = vmatprep.subr.bf16.mxu0 %v2997_v1  ;;  %v2252_v62 = vcombine.low %v1175_v55, %v3231_v6  ;;  %v2955_v55 = vld [vmem:[%s3682_s1 + $0x180] sm:$0xff]  }
  0x49   : > { %2632 = vmatprep.subr.bf16.mxu1 %v2997_v1 }
  0x4a   : > { %v1197_v4 = vrot.slane %v2252_v62, 2 }
  0x4b   : > { %2597 = vmatpush3.bf16.msra.mxu0 %v2914_v63  ;;  %v993_v63 = vor.u32 %v992_v58, %v989_v57  ;;  %v1578_v58 = vshrl.u32 %v3456_v51, 16 }
  0x4c   : > { %2633 = vmatpush3.bf16.msra.mxu1 %v2915_v3  ;;  %2654 = vmatprep.subr.bf16.mxu0 %v2997_v1  ;;  %v1007_v3 = vshll.u32 %v3258_v19, 16  ;;  %v1199_v11 = vsel %vm1196_vm4, %v1197_v4, %v1198_v5  ;;  %v3479_v4 = vld [vmem:[%s3079_s8 + $0x18] sm:$0xff]  }
  0x4d   : > { %2543 = vmatmul.mubr.bf16.gmra.mxu0 %v339_v7  ;;  %2690 = vmatprep.subr.bf16.mxu1 %v2997_v1  ;;  %v1002_v6 = vsel %vm985_vm3, %v993_v63, %v1001_v0  ;;  %v2940_v7 = vld [vmem:[%s3682_s1 + $0x1b8] sm:$0xff]   ;;  %v1580_v2 = vrot.slane %v1578_v58, 2 }
  0x4e   : > { %2579 = vmatmul.mubr.bf16.gmra.mxu1 %v3166_v45  ;;  %2598 = vmatprep.mubr.msk.bf16.mxu0 %vm2998_vm0, %v2997_v1  ;;  %v2934_v45 = vld [vmem:[%s3682_s1 + $0x108] sm:$0xff]   ;;  %v1009_v9 = vrot.slane %v1007_v3, 2  ;;  %v1583_v3 = vrot.slane %v1581_v59, 3 }
  0x4f   : > { %2634 = vmatprep.mubr.msk.bf16.mxu1 %vm2998_vm0, %v2997_v1 }
  0x50   : > { %v1010_v13 = vor.u32 %v1009_v9, %v1006_v8  ;;  %v1584_v8 = vor.u32 %v1583_v3, %v1580_v2  ;;  %v1587_v9 = vshrl.u32 %v3479_v4, 16 }
  0x52   : > { %v1589_v14 = vrot.slane %v1587_v9, 2 }
  0x55   : > { %2599 = vmatmul.mubr.bf16.vlgmr.msra.gmra.mxu0 %v616_v16  ;;  %v1016_v16 = vshll.u32 %v3284_v27, 16 }
  0x56   : > { %2635 = vmatmul.mubr.bf16.vlgmr.msra.gmra.mxu1 %v819_v18  ;;  %2655 = vmatpush3.bf16.msra.mxu0 %v2919_v17  ;;  %v1200_v17 = vrot.slane %v3258_v19, 2  ;;  %v2944_v18 = vld [vmem:[%s3682_s1 + $0x1f0] sm:$0xff]  }
  0x57   : > { %2656 = vmatprep.subr.bf16.mxu0 %v2997_v1  ;;  %2602 = vmatprep.mubr.msk.bf16.mxu0 %vm2998_vm0, %v2997_v1  ;;  %v1018_v22 = vrot.slane %v1016_v16, 2 }
  0x58   : > { %2638 = vmatprep.mubr.msk.bf16.mxu1 %vm2998_vm0, %v2997_v1  ;;  %2691 = vmatpush3.bf16.msra.mxu1 %v2922_v15  ;;  %v1011_v15 = vsel %vm985_vm3, %v1001_v0, %v1010_v13  ;;  %v1201_v19 = vsel %vm1196_vm4, %v1198_v5, %v1200_v17  ;;  %v1203_v27 = vsel %vm1196_vm4, %v1200_v17, %v1202_v29  ;;  %v3496_v17 = vld [vmem:[%s3079_s8 + $0x20] sm:$0xff]  }
  0x59   : > { %2692 = vmatprep.subr.bf16.mxu1 %v2997_v1 }
  0x5a   : > { %2657 = vmatpush3.bf16.msra.mxu0 %v2920_v20  ;;  %v2943_v20 = vld [vmem:[%s3682_s1 + $0x1a8] sm:$0xff]  }
  0x5b   : > { %2658 = vmatprep.subr.bf16.mxu0 %v2997_v1 }
  0x5c   : > { %2693 = vmatpush3.bf16.msra.mxu1 %v2924_v23  ;;  %v2946_v23 = vld [vmem:[%s3682_s1 + $0x1e8] sm:$0xff]  }
  0x5d   : > { %2603 = vmatmul.mubr.bf16.gmra.mxu0 %v618_v24  ;;  %2694 = vmatprep.subr.bf16.mxu1 %v2997_v1  ;;  %v1019_v24 = vor.u32 %v1018_v22, %v1015_v21  ;;  %v1596_v21 = vshrl.u32 %v3496_v17, 16  ;;  %v1599_v22 = vshll.u32 %v3496_v17, 16 }
  0x5e   : > { %2639 = vmatmul.mubr.bf16.gmra.mxu1 %v821_v26  ;;  %2659 = vmatpush3.bf16.msra.mxu0 %v2923_v25  ;;  %v2945_v25 = vld [vmem:[%s3682_s1 + $0x1a0] sm:$0xff]   ;;  %v1022_v26 = vshrl.u32 %v3311_v36, 16 }
  0x5f   : > { %2606 = vmatprep.mubr.msk.bf16.mxu0 %vm2998_vm0, %v2997_v1  ;;  %2642 = vmatprep.mubr.msk.bf16.mxu1 %vm2998_vm0, %v2997_v1  ;;  %v1020_v31 = vsel %vm985_vm3, %v1010_v13, %v1019_v24 }
  0x60   : > { %2660 = vmatprep.subr.bf16.mxu0 %v2997_v1  ;;  %2695 = vmatpush3.bf16.msra.mxu1 %v2927_v28  ;;  %v1025_v28 = vshll.u32 %v3311_v36, 16 }
  0x61   : > { %2696 = vmatprep.subr.bf16.mxu1 %v2997_v1 }
  0x62   : > { %2661 = vmatpush3.bf16.msra.mxu0 %v2926_v30  ;;  %v2948_v30 = vld [vmem:[%s3682_s1 + $0x1e0] sm:$0xff]  }
  0x63   : > { %2662 = vmatprep.subr.bf16.mxu0 %v2997_v1 }
  0x64   : > { %2697 = vmatpush3.bf16.msra.mxu1 %v2929_v32  ;;  %v2947_v32 = vld [vmem:[%s3682_s1 + $0x198] sm:$0xff]  }
  0x65   : > { %2607 = vmatmul.mubr.bf16.gmra.mxu0 %v620_v33  ;;  %2698 = vmatprep.subr.bf16.mxu1 %v2997_v1  ;;  %v1024_v33 = vrot.slane %v1022_v26, 1  ;;  %v1601_v26 = vrot.slane %v1599_v22, 3 }
  0x66   : > { %2643 = vmatmul.mubr.bf16.gmra.mxu1 %v823_v35  ;;  %2663 = vmatpush3.bf16.msra.mxu0 %v2928_v34  ;;  %v1027_v34 = vrot.slane %v1025_v28, 2  ;;  %v2953_v35 = vld [vmem:[%s3079_s8 + $0x2c] ss:$0 sps:$4 sm:$0x33]  }
  0x67   : > { %2610 = vmatprep.mubr.msk.bf16.mxu0 %vm2998_vm0, %v2997_v1  ;;  %2646 = vmatprep.mubr.msk.bf16.mxu1 %vm2998_vm0, %v2997_v1  ;;  %v1031_v40 = vshrl.u32 %v2953_v35, 16  ;;  %v3517_v28 = vld [vmem:[%s3079_s8 + $0x28] sm:$0xff]  }
  0x68   : > { %2664 = vmatprep.subr.bf16.mxu0 %v2997_v1  ;;  %2699 = vmatpush3.bf16.msra.mxu1 %v2931_v37  ;;  %v2949_v37 = vld [vmem:[%s3682_s1 + $0x1d8] sm:$0xff]   ;;  %v1028_v38 = vor.u32 %v1027_v34, %v1024_v33  ;;  %v1608_v33 = vshll.u32 %v3517_v28, 16 }
  0x69   : > { %2700 = vmatprep.subr.bf16.mxu1 %v2997_v1  ;;  %v1033_v47 = vrot.slane %v1031_v40, 1  ;;  %v1407_v40 = vrot.slane %v3517_v28, 2 }
  0x6a   : > { %2665 = vmatpush3.bf16.msra.mxu0 %v2932_v39  ;;  %v2950_v39 = vld [vmem:[%s3682_s1 + $0x190] sm:$0xff]  }
  0x6b   : > { %2666 = vmatprep.subr.bf16.mxu0 %v2997_v1 }
  0x6c   : > { %2701 = vmatpush3.bf16.msra.mxu1 %v2933_v41  ;;  %v1034_v41 = vshll.u32 %v2953_v35, 16 }
  0x6d   : > { %2611 = vmatmul.mubr.bf16.gmra.mxu0 %v622_v42  ;;  %2702 = vmatprep.subr.bf16.mxu1 %v2997_v1  ;;  %v1204_v42 = vrot.slane %v3311_v36, 2  ;;  %v2952_v36 = vld [vmem:[%s3682_s1 + $0x188] sm:$0xff]  }
  0x6e   : > { %2647 = vmatmul.mubr.bf16.gmra.mxu1 %v825_v44  ;;  %2614 = vmatprep.mubr.msk.bf16.mxu0 %vm2998_vm0, %v2997_v1  ;;  %v1344_v44 = vld [vmem:[%s3079_s8 + $0x8] sm:$0xc]  ;;  %v1036_v48 = vrot.slane %v1034_v41, 2  ;;  %v2967_v41 = vld [vmem:[%s3682_s1 + $0x210] sm:$0xff]  }
  0x6f   : > { %2650 = vmatprep.mubr.msk.bf16.mxu1 %vm2998_vm0, %v2997_v1  ;;  %2667 = vmatpush3.bf16.msra.mxu0 %v2934_v45  ;;  %v3445_v45 = vld [vmem:[%s3079_s8 + $0xc] sm:$0xf]  ;;  %v1205_v49 = vsel %vm1196_vm4, %v1202_v29, %v1204_v42  ;;  %v1405_v29 = vrot.slane %v3496_v17, 2 }
  0x70   : > { %2703 = vmatpush3.bf16.msra.mxu1 %v2936_v46  ;;  %2668 = vmatprep.subr.bf16.mxu0 %v2997_v1  ;;  %v1029_v46 = vsel %vm985_vm3, %v1019_v24, %v1028_v38  ;;  %v2277_v50 = vcombine.low %v1344_v44, %v3445_v45 }
  0x71   : > { %2704 = vmatprep.subr.bf16.mxu1 %v2997_v1 }
  0x72   : > { %v1573_v57 = vshll.u32 %v2277_v50, 16  ;;  %v1400_v5 = vrot.slane %v2277_v50, 2 }
  0x73   : > { %2669 = vmatpush3.bf16.msra.mxu0 %v2937_v53  ;;  %v1037_v53 = vor.u32 %v1036_v48, %v1033_v47  ;;  %v2969_v47 = vld [vmem:[%s3079_s8 + $0x30] ss:$0 sps:$4 sm:$0x33]  }
  0x74   : > { %2705 = vmatpush3.bf16.msra.mxu1 %v2938_v54  ;;  %2726 = vmatprep.subr.bf16.mxu0 %v2997_v1  ;;  %v1206_v54 = vrot.slane %v2953_v35, 2  ;;  %v1575_v0 = vrot.slane %v1573_v57, 3  ;;  %v2965_v35 = vld [vmem:[%s3682_s1 + $0x218] sm:$0xff]  }
  0x75   : > { %2615 = vmatmul.mubr.bf16.gmra.mxu0 %v624_v56  ;;  %2762 = vmatprep.subr.bf16.mxu1 %v2997_v1  ;;  %v1570_v56 = vshrl.u32 %v2277_v50, 16 }
  0x76   : > { %2651 = vmatmul.mubr.bf16.gmra.mxu1 %v827_v61  ;;  %2670 = vmatprep.mubr.msk.bf16.mxu0 %vm2998_vm0, %v2997_v1  ;;  %v1038_v61 = vsel %vm985_vm3, %v1028_v38, %v1037_v53  ;;  %v1207_v62 = vsel %vm1196_vm4, %v1204_v42, %v1206_v54  ;;  %v1610_v38 = vrot.slane %v1608_v33, 3  ;;  %v2971_v54 = vld [vmem:[%s3682_s1 + $0x200] sm:$0xff]  }
  0x77   : > { %2706 = vmatprep.mubr.msk.bf16.mxu1 %vm2998_vm0, %v2997_v1  ;;  %v1572_v63 = vrot.slane %v1570_v56, 2 }
  0x7d   : > { %2671 = vmatmul.mubr.bf16.vlgmr.msra.gmra.mxu0 %v1002_v6  ;;  %v1401_v6 = vrot.slane %v3456_v51, 2 }
  0x7e   : > { %2707 = vmatmul.mubr.bf16.vlgmr.msra.gmra.mxu1 %v1199_v11  ;;  %2727 = vmatpush3.bf16.msra.mxu0 %v2940_v7  ;;  %v1576_v7 = vor.u32 %v1575_v0, %v1572_v63  ;;  %v1590_v11 = vshll.u32 %v3479_v4, 16  ;;  %v1783_v0 = vrot.slane %v3479_v4, 3 }
  0x7f   : > { %2728 = vmatprep.subr.bf16.mxu0 %v2997_v1  ;;  %2674 = vmatprep.mubr.msk.bf16.mxu0 %vm2998_vm0, %v2997_v1 }
  0x80   : > { %2710 = vmatprep.mubr.msk.bf16.mxu1 %vm2998_vm0, %v2997_v1  ;;  %2763 = vmatpush3.bf16.msra.mxu1 %v2942_v12  ;;  %v1402_v12 = vsel %vm1196_vm4, %v1400_v5, %v1401_v6  ;;  %v1585_v13 = vsel %vm1568_vm5, %v1576_v7, %v1584_v8  ;;  %v1592_v16 = vrot.slane %v1590_v11, 3 }
  0x81   : > { %2764 = vmatprep.subr.bf16.mxu1 %v2997_v1 }
  0x82   : > { %2729 = vmatpush3.bf16.msra.mxu0 %v2941_v10  ;;  %v2959_v10 = vld [vmem:[%s3682_s1 + $0x238] sm:$0xff]  }
  0x83   : > { %2730 = vmatprep.subr.bf16.mxu0 %v2997_v1 }
  0x84   : > { %2765 = vmatpush3.bf16.msra.mxu1 %v2944_v18  ;;  %v2960_v18 = vld [vmem:[%s3682_s1 + $0x230] sm:$0xff]  }
  0x85   : > { %2675 = vmatmul.mubr.bf16.gmra.mxu0 %v1011_v15  ;;  %2766 = vmatprep.subr.bf16.mxu1 %v2997_v1  ;;  %v1403_v15 = vrot.slane %v3479_v4, 2 }
  0x86   : > { %2711 = vmatmul.mubr.bf16.gmra.mxu1 %v1201_v19  ;;  %2731 = vmatpush3.bf16.msra.mxu0 %v2943_v20  ;;  %v1593_v20 = vor.u32 %v1592_v16, %v1589_v14 }
  0x87   : > { %2678 = vmatprep.mubr.msk.bf16.mxu0 %vm2998_vm0, %v2997_v1  ;;  %2714 = vmatprep.mubr.msk.bf16.mxu1 %vm2998_vm0, %v2997_v1  ;;  %v1404_v19 = vsel %vm1196_vm4, %v1401_v6, %v1403_v15  ;;  %v1406_v34 = vsel %vm1196_vm4, %v1403_v15, %v1405_v29 }
  0x88   : > { %2732 = vmatprep.subr.bf16.mxu0 %v2997_v1  ;;  %2767 = vmatpush3.bf16.msra.mxu1 %v2946_v23  ;;  %v2962_v23 = vld [vmem:[%s3682_s1 + $0x228] sm:$0xff]   ;;  %v1594_v24 = vsel %vm1568_vm5, %v1584_v8, %v1593_v20 }
  0x89   : > { %2768 = vmatprep.subr.bf16.mxu1 %v2997_v1 }
  0x8a   : > { %2733 = vmatpush3.bf16.msra.mxu0 %v2945_v25  ;;  %v1598_v25 = vrot.slane %v1596_v21, 2 }
  0x8b   : > { %2734 = vmatprep.subr.bf16.mxu0 %v2997_v1 }
  0x8c   : > { %2769 = vmatpush3.bf16.msra.mxu1 %v2948_v30  ;;  %v2964_v30 = vld [vmem:[%s3682_s1 + $0x220] sm:$0xff]  }
  0x8d   : > { %2679 = vmatmul.mubr.bf16.gmra.mxu0 %v1020_v31  ;;  %2770 = vmatprep.subr.bf16.mxu1 %v2997_v1  ;;  %v1602_v31 = vor.u32 %v1601_v26, %v1598_v25 }
  0x8e   : > { %2715 = vmatmul.mubr.bf16.gmra.mxu1 %v1203_v27  ;;  %2735 = vmatpush3.bf16.msra.mxu0 %v2947_v32  ;;  %v1605_v32 = vshrl.u32 %v3517_v28, 16 }
  0x8f   : > { %2682 = vmatprep.mubr.msk.bf16.mxu0 %vm2998_vm0, %v2997_v1  ;;  %2718 = vmatprep.mubr.msk.bf16.mxu1 %vm2998_vm0, %v2997_v1  ;;  %v1603_v27 = vsel %vm1568_vm5, %v1593_v20, %v1602_v31 }
  0x90   : > { %2736 = vmatprep.subr.bf16.mxu0 %v2997_v1  ;;  %2771 = vmatpush3.bf16.msra.mxu1 %v2949_v37  ;;  %v1607_v37 = vrot.slane %v1605_v32, 2 }
  0x91   : > { %2772 = vmatprep.subr.bf16.mxu1 %v2997_v1 }
  0x92   : > { %2737 = vmatpush3.bf16.msra.mxu0 %v2950_v39  ;;  %v3539_v39 = vld [vmem:[%s3079_s8 + $0x30] ss:$0 sps:$4 sm:$0x77]   ;;  %v1611_v42 = vor.u32 %v1610_v38, %v1607_v37 }
  0x93   : > { %2738 = vmatprep.subr.bf16.mxu0 %v2997_v1  ;;  %v1617_v44 = vshll.u32 %v3539_v39, 16 }
  0x94   : > { %2773 = vmatpush3.bf16.msra.mxu1 %v2951_v43  ;;  %v1614_v43 = vshrl.u32 %v3539_v39, 16  ;;  %v1612_v48 = vsel %vm1568_vm5, %v1602_v31, %v1611_v42 }
  0x95   : > { %2683 = vmatmul.mubr.bf16.gmra.mxu0 %v1029_v46  ;;  %2774 = vmatprep.subr.bf16.mxu1 %v2997_v1  ;;  %v1408_v46 = vsel %vm1196_vm4, %v1405_v29, %v1407_v40  ;;  %v1619_v50 = vrot.slane %v1617_v44, 3 }
  0x96   : > { %2719 = vmatmul.mubr.bf16.gmra.mxu1 %v1205_v49  ;;  %2686 = vmatprep.mubr.msk.bf16.mxu0 %vm2998_vm0, %v2997_v1  ;;  %v2968_v49 = vld [vmem:[%s3682_s1 + $0x208] sm:$0xff]  }
  0x97   : > { %2722 = vmatprep.mubr.msk.bf16.mxu1 %vm2998_vm0, %v2997_v1  ;;  %2739 = vmatpush3.bf16.msra.mxu0 %v2952_v36  ;;  %v1616_v36 = vrot.slane %v1614_v43, 2 }
  0x98   : > { %2775 = vmatpush3.bf16.msra.mxu1 %v2954_v52  ;;  %2740 = vmatprep.subr.bf16.mxu0 %v2997_v1  ;;  %v1409_v52 = vrot.slane %v2969_v47, 2 }
  0x99   : > { %2776 = vmatprep.subr.bf16.mxu1 %v2997_v1  ;;  %v1620_v53 = vor.u32 %v1619_v50, %v1616_v36 }
  0x9a   : > { %v1410_v56 = vsel %vm1196_vm4, %v1407_v40, %v1409_v52 }
  0x9b   : > { %2741 = vmatpush3.bf16.msra.mxu0 %v2955_v55  ;;  %v1758_v55 = vld [vmem:[%s3079_s8 + $0x8] sm:$0x8]  ;;  %v1621_v58 = vsel %vm1568_vm5, %v1611_v42, %v1620_v53 }
  0x9c   : > { %2777 = vmatpush3.bf16.msra.mxu1 %v2956_v60  ;;  %2798 = vmatprep.subr.bf16.mxu0 %v2997_v1  ;;  %v2332_v57 = vcombine.low %v1758_v55, %v3445_v45  ;;  %v1781_v60 = vrot.slane %v3456_v51, 3  ;;  %v1787_v45 = vrot.slane %v3517_v28, 3  ;;  %v1789_v51 = vrot.slane %v3539_v39, 3 }
  0x9d   : > { %2687 = vmatmul.mubr.bf16.gmra.mxu0 %v1038_v61  ;;  %2834 = vmatprep.subr.bf16.mxu1 %v2997_v1  ;;  %v1785_v61 = vrot.slane %v3496_v17, 3 }
  0x9e   : > { %2723 = vmatmul.mubr.bf16.gmra.mxu1 %v1207_v62  ;;  %2742 = vmatprep.mubr.msk.bf16.mxu0 %vm2998_vm0, %v2997_v1  ;;  %v1780_v59 = vrot.slane %v2332_v57, 3  ;;  %v1784_v2 = vsel %vm1779_vm6, %v1781_v60, %v1783_v0  ;;  %v1790_v3 = vsel %vm1779_vm6, %v1787_v45, %v1789_v51 }
  0x9f   : > { %2778 = vmatprep.mubr.msk.bf16.mxu1 %vm2998_vm0, %v2997_v1  ;;  %v1788_v63 = vsel %vm1779_vm6, %v1785_v61, %v1787_v45  ;;  %v1786_v5 = vsel %vm1779_vm6, %v1783_v0, %v1785_v61 }
  0xa0   : > { %v1782_v62 = vsel %vm1779_vm6, %v1780_v59, %v1781_v60 }
  0xa5   : > { %2743 = vmatmul.mubr.bf16.vlgmr.msra.gmra.mxu0 %v1402_v12 }
  0xa6   : > { %2779 = vmatmul.mubr.bf16.vlgmr.msra.gmra.mxu1 %v1585_v13  ;;  %2799 = vmatpush3.bf16.msra.mxu0 %v2959_v10 }
  0xa7   : > { %2800 = vmatprep.subr.bf16.mxu0 %v2997_v1  ;;  %2746 = vmatprep.mubr.msk.bf16.mxu0 %vm2998_vm0, %v2997_v1 }
  0xa8   : > { %2782 = vmatprep.mubr.msk.bf16.mxu1 %vm2998_vm0, %v2997_v1  ;;  %2842 = vmatpush3.bf16.msra.mxu1 %v2959_v10 }
  0xa9   : > { %2835 = vmatprep.subr.bf16.mxu1 %v2997_v1 }
  0xaa   : > { %2801 = vmatpush3.bf16.msra.mxu0 %v2960_v18 }
  0xab   : > { %2802 = vmatprep.subr.bf16.mxu0 %v2997_v1 }
  0xac   : > { %2843 = vmatpush3.bf16.msra.mxu1 %v2960_v18 }
  0xad   : > { %2747 = vmatmul.mubr.bf16.gmra.mxu0 %v1404_v19  ;;  %2836 = vmatprep.subr.bf16.mxu1 %v2997_v1 }
  0xae   : > { %2783 = vmatmul.mubr.bf16.gmra.mxu1 %v1594_v24  ;;  %2803 = vmatpush3.bf16.msra.mxu0 %v2962_v23 }
  0xaf   : > { %2750 = vmatprep.mubr.msk.bf16.mxu0 %vm2998_vm0, %v2997_v1  ;;  %2786 = vmatprep.mubr.msk.bf16.mxu1 %vm2998_vm0, %v2997_v1 }
  0xb0   : > { %2804 = vmatprep.subr.bf16.mxu0 %v2997_v1  ;;  %2844 = vmatpush3.bf16.msra.mxu1 %v2962_v23 }
  0xb1   : > { %2837 = vmatprep.subr.bf16.mxu1 %v2997_v1 }
  0xb2   : > { %2805 = vmatpush3.bf16.msra.mxu0 %v2964_v30 }
  0xb3   : > { %2806 = vmatprep.subr.bf16.mxu0 %v2997_v1 }
  0xb4   : > { %2845 = vmatpush3.bf16.msra.mxu1 %v2964_v30 }
  0xb5   : > { %2751 = vmatmul.mubr.bf16.gmra.mxu0 %v1406_v34  ;;  %2838 = vmatprep.subr.bf16.mxu1 %v2997_v1 }
  0xb6   : > { %2787 = vmatmul.mubr.bf16.gmra.mxu1 %v1603_v27  ;;  %2807 = vmatpush3.bf16.msra.mxu0 %v2965_v35 }
  0xb7   : > { %2754 = vmatprep.mubr.msk.bf16.mxu0 %vm2998_vm0, %v2997_v1  ;;  %2790 = vmatprep.mubr.msk.bf16.mxu1 %vm2998_vm0, %v2997_v1 }
  0xb8   : > { %2846 = vmatpush3.bf16.msra.mxu1 %v2965_v35  ;;  %2808 = vmatprep.subr.bf16.mxu0 %v2997_v1 }
  0xb9   : > { %2839 = vmatprep.subr.bf16.mxu1 %v2997_v1 }
  0xba   : > { %2809 = vmatpush3.bf16.msra.mxu0 %v2967_v41 }
  0xbb   : > { %2810 = vmatprep.subr.bf16.mxu0 %v2997_v1 }
  0xbc   : > { %2847 = vmatpush3.bf16.msra.mxu1 %v2967_v41 }
  0xbd   : > { %2755 = vmatmul.mubr.bf16.gmra.mxu0 %v1408_v46  ;;  %2840 = vmatprep.subr.bf16.mxu1 %v2997_v1 }
  0xbe   : > { %2791 = vmatmul.mubr.bf16.gmra.mxu1 %v1612_v48  ;;  %2758 = vmatprep.mubr.msk.bf16.mxu0 %vm2998_vm0, %v2997_v1 }
  0xbf   : > { %2794 = vmatprep.mubr.msk.bf16.mxu1 %vm2998_vm0, %v2997_v1  ;;  %2811 = vmatpush3.bf16.msra.mxu0 %v2968_v49 }
  0xc0   : > { %2848 = vmatpush3.bf16.msra.mxu1 %v2968_v49  ;;  %2812 = vmatprep.subr.bf16.mxu0 %v2997_v1 }
  0xc1   : > { %2841 = vmatprep.subr.bf16.mxu1 %v2997_v1 }
  0xc3   : > { %2813 = vmatpush3.bf16.msra.mxu0 %v2971_v54 }
  0xc4   : > { %2849 = vmatpush3.bf16.msra.mxu1 %v2971_v54 }
  0xc5   : > { %2759 = vmatmul.mubr.bf16.gmra.mxu0 %v1410_v56 }
  0xc6   : > { %2795 = vmatmul.mubr.bf16.gmra.mxu1 %v1621_v58  ;;  %2814 = vmatprep.mubr.msk.bf16.mxu0 %vm2998_vm0, %v2997_v1 }
  0xc7   : > { %2826 = vmatprep.mubr.msk.bf16.mxu1 %vm2998_vm0, %v2997_v1 }
  0xcd   : > { %2815 = vmatmul.mubr.bf16.vlgmr.msra.gmra.mxu0 %v1782_v62 }
  0xce   : > { %2827 = vmatmul.mubr.bf16.vlgmr.msra.gmra.mxu1 %v1788_v63  ;;  %2818 = vmatprep.mubr.msk.bf16.mxu0 %vm2998_vm0, %v2997_v1 }
  0xcf   : > { %2830 = vmatprep.mubr.msk.bf16.mxu1 %vm2998_vm0, %v2997_v1 }
  0xd5   : > { %2819 = vmatmul.mubr.bf16.gmra.mxu0 %v1784_v2 }
  0xd6   : > { %2831 = vmatmul.mubr.bf16.gmra.mxu1 %v1790_v3  ;;  %2822 = vmatprep.mubr.msk.bf16.mxu0 %vm2998_vm0, %v2997_v1 }
  0xdd   : > { %2823 = vmatmul.mubr.bf16.gmra.mxu0 %v1786_v5 }
  0xed   : > { %v427_v6 = vpop.f32.mrf.mxu0 }
  0xee   : > { %v553_v7 = vpop.f32.mrf.mxu1 }
  0xef   : > { %v554_v4 = vadd.f32 %v553_v7, %v427_v6  ;;  %v2528_v8 = vpop.f32.mrf.mxu0 }
  0xf0   : > { %v2564_v9 = vpop.f32.mrf.mxu1 }
  0xf1   : > { %v430_v11 = vpop.f32.mrf.mxu0 }
  0xf2   : > { %v556_v12 = vpop.f32.mrf.mxu1 }
  0xf3   : > { %v557_v10 = vadd.f32 %v556_v12, %v430_v11  ;;  %v2529_v13 = vpop.f32.mrf.mxu0 }
  0xf4   : > { %v2565_v14 = vpop.f32.mrf.mxu1 }
  0xf5   : > { %v435_v16 = vpop.f32.mrf.mxu0 }
  0xf6   : > { %v561_v17 = vpop.f32.mrf.mxu1 }
  0xf7   : > { %v562_v18 = vadd.f32 %v561_v17, %v435_v16  ;;  %v2532_v15 = vpop.f32.mrf.mxu0 }
  0xf8   : > { %v2568_v20 = vpop.f32.mrf.mxu1 }
  0xf9   : > { %v438_v21 = vpop.f32.mrf.mxu0 }
  0xfa   : > { %v564_v1 = vpop.f32.mrf.mxu1 }
  0xfb   : > { %v565_v22 = vadd.f32 %v564_v1, %v438_v21  ;;  %v2533_v19 = vpop.f32.mrf.mxu0 }
  0xfc   : > { %v2569_v23 = vpop.f32.mrf.mxu1 }
  0xfd   : > { %v443_v24 = vpop.f32.mrf.mxu0 }
  0xfe   : > { %v569_v25 = vpop.f32.mrf.mxu1 }
  0xff   : > { %v570_v26 = vadd.f32 %v569_v25, %v443_v24  ;;  %v2536_v28 = vpop.f32.mrf.mxu0 }
 0x100   : > { %v2572_v29 = vpop.f32.mrf.mxu1 }
 0x101   : > { %v446_v30 = vpop.f32.mrf.mxu0 }
 0x102   : > { %v572_v31 = vpop.f32.mrf.mxu1 }
 0x103   : > { %v573_v32 = vadd.f32 %v572_v31, %v446_v30  ;;  %v2537_v33 = vpop.f32.mrf.mxu0 }
 0x104   : > { %v2573_v34 = vpop.f32.mrf.mxu1 }
 0x105   : > { %v451_v35 = vpop.f32.mrf.mxu0 }
 0x106   : > { %v577_v27 = vpop.f32.mrf.mxu1 }
 0x107   : > { %v578_v37 = vadd.f32 %v577_v27, %v451_v35  ;;  %v2540_v38 = vpop.f32.mrf.mxu0 }
 0x108   : > { %v2576_v39 = vpop.f32.mrf.mxu1 }
 0x109   : > { %v454_v40 = vpop.f32.mrf.mxu0 }
 0x10a   : > { %v580_v41 = vpop.f32.mrf.mxu1 }
 0x10b   : > { %v581_v42 = vadd.f32 %v580_v41, %v454_v40  ;;  %v2541_v43 = vpop.f32.mrf.mxu0 }
 0x10c   : > { %v2577_v44 = vpop.f32.mrf.mxu1 }
 0x10d   : > { %v459_v46 = vpop.f32.mrf.mxu0 }
 0x10e   : > { %v585_v47 = vpop.f32.mrf.mxu1 }
 0x10f   : > { %v586_v48 = vadd.f32 %v585_v47, %v459_v46  ;;  %v2544_v49 = vpop.f32.mrf.mxu0 }
 0x110   : > { %v2580_v36 = vpop.f32.mrf.mxu1 }
 0x111   : > { %v462_v50 = vpop.f32.mrf.mxu0 }
 0x112   : > { %v588_v52 = vpop.f32.mrf.mxu1 }
 0x113   : > { %v589_v53 = vadd.f32 %v588_v52, %v462_v50  ;;  %v2545_v54 = vpop.f32.mrf.mxu0 }
 0x114   : > { %v2581_v55 = vpop.f32.mrf.mxu1 }
 0x115   : > { %v712_v56 = vpop.f32.mrf.mxu0 }
 0x116   : > { %v751_v57 = vadd.f32 %v712_v56, %v554_v4  ;;  %v915_v58 = vpop.f32.mrf.mxu1 }
 0x117   : > { %v2600_v59 = vpop.f32.mrf.mxu0 }
 0x118   : > { %v954_v60 = vadd.f32 %v915_v58, %v751_v57  ;;  %v2636_v61 = vpop.f32.mrf.mxu1 }
 0x119   : > { %v715_v45 = vpop.f32.mrf.mxu0 }
 0x11a   : > { %v752_v62 = vadd.f32 %v715_v45, %v557_v10  ;;  %v918_v63 = vpop.f32.mrf.mxu1 }
 0x11b   : > { %v2601_v0 = vpop.f32.mrf.mxu0 }
 0x11c   : > { %v955_v51 = vadd.f32 %v918_v63, %v752_v62  ;;  %v2637_v2 = vpop.f32.mrf.mxu1 }
 0x11d   : > { %v720_v3 = vpop.f32.mrf.mxu0 }
 0x11e   : > { %v753_v5 = vadd.f32 %v720_v3, %v562_v18  ;;  %v923_v6 = vpop.f32.mrf.mxu1 }
 0x11f   : > { %v2604_v7 = vpop.f32.mrf.mxu0 }
 0x120   : > { %v956_v8 = vadd.f32 %v923_v6, %v753_v5  ;;  %v2640_v9 = vpop.f32.mrf.mxu1 }
 0x121   : > { %v723_v11 = vpop.f32.mrf.mxu0 }
 0x122   : > { %v754_v12 = vadd.f32 %v723_v11, %v565_v22  ;;  %v926_v13 = vpop.f32.mrf.mxu1 }
 0x123   : > { %v2605_v4 = vpop.f32.mrf.mxu0 }
 0x124   : > { %v957_v14 = vadd.f32 %v926_v13, %v754_v12  ;;  %v2641_v16 = vpop.f32.mrf.mxu1 }
 0x125   : > { %v728_v17 = vpop.f32.mrf.mxu0 }
 0x126   : > { %v755_v15 = vadd.f32 %v728_v17, %v570_v26  ;;  %v931_v20 = vpop.f32.mrf.mxu1 }
 0x127   : > { %v2608_v10 = vpop.f32.mrf.mxu0 }
 0x128   : > { %v958_v21 = vadd.f32 %v931_v20, %v755_v15  ;;  %v2644_v1 = vpop.f32.mrf.mxu1 }
 0x129   : > { %v731_v19 = vpop.f32.mrf.mxu0 }
 0x12a   : > { %v756_v23 = vadd.f32 %v731_v19, %v573_v32  ;;  %v934_v24 = vpop.f32.mrf.mxu1 }
 0x12b   : > { %v2609_v18 = vpop.f32.mrf.mxu0 }
 0x12c   : > { %v959_v25 = vadd.f32 %v934_v24, %v756_v23  ;;  %v2645_v28 = vpop.f32.mrf.mxu1 }
 0x12d   : > { %v736_v29 = vpop.f32.mrf.mxu0 }
 0x12e   : > { %v757_v30 = vadd.f32 %v736_v29, %v578_v37  ;;  %v939_v31 = vpop.f32.mrf.mxu1 }
 0x12f   : > { %v2612_v22 = vpop.f32.mrf.mxu0 }
 0x130   : > { %v3595_v33 = vadd.f32 %v939_v31, %v757_v30  ;;  %v2648_v34 = vpop.f32.mrf.mxu1 }
 0x131   : > { %v739_v35 = vpop.f32.mrf.mxu0 }
 0x132   : > { %v758_v27 = vadd.f32 %v739_v35, %v581_v42  ;;  %v942_v26 = vpop.f32.mrf.mxu1 }
 0x133   : > { %v2613_v38 = vpop.f32.mrf.mxu0 }
 0x134   : > { %v3597_v39 = vadd.f32 %v942_v26, %v758_v27  ;;  %v2649_v40 = vpop.f32.mrf.mxu1 }
 0x135   : > { %v744_v41 = vpop.f32.mrf.mxu0 }
 0x136   : > { %v759_v32 = vadd.f32 %v744_v41, %v586_v48  ;;  %v947_v43 = vpop.f32.mrf.mxu1 }
 0x137   : > { %v2616_v44 = vpop.f32.mrf.mxu0 }
 0x138   : > { %v3599_v46 = vadd.f32 %v947_v43, %v759_v32  ;;  %v2652_v47 = vpop.f32.mrf.mxu1 }
 0x139   : > { %v747_v37 = vpop.f32.mrf.mxu0 }
 0x13a   : > { %v760_v49 = vadd.f32 %v747_v37, %v589_v53  ;;  %v950_v36 = vpop.f32.mrf.mxu1 }
 0x13b   : > { %v2617_v50 = vpop.f32.mrf.mxu0 }
 0x13c   : > { %v3601_v52 = vadd.f32 %v950_v36, %v760_v49  ;;  %v2653_v54 = vpop.f32.mrf.mxu1 }
 0x13d   : > { %v1126_v42 = vpop.f32.mrf.mxu0 }
 0x13e   : > { %v1165_v55 = vadd.f32 %v1126_v42, %v954_v60  ;;  %v1295_v56 = vpop.f32.mrf.mxu1 }
 0x13f   : > { %v2672_v57 = vpop.f32.mrf.mxu0 }
 0x140   : > { %v3603_v58 = vadd.f32 %v1295_v56, %v1165_v55  ;;  %v2708_v59 = vpop.f32.mrf.mxu1 }
 0x141   : > { %v1129_v48 = vpop.f32.mrf.mxu0 }
 0x142   : > { %v1166_v61 = vadd.f32 %v1129_v48, %v955_v51  ;;  %v1298_v45 = vpop.f32.mrf.mxu1 }
 0x143   : > { %v2673_v62 = vpop.f32.mrf.mxu0 }
 0x144   : > { %v3605_v63 = vadd.f32 %v1298_v45, %v1166_v61  ;;  %v2709_v0 = vpop.f32.mrf.mxu1 }
 0x145   : > { %v1134_v53 = vpop.f32.mrf.mxu0 }
 0x146   : > { %v1167_v2 = vadd.f32 %v1134_v53, %v956_v8  ;;  %v1303_v3 = vpop.f32.mrf.mxu1 }
 0x147   : > { %v2676_v5 = vpop.f32.mrf.mxu0 }
 0x148   : > { %v3607_v6 = vadd.f32 %v1303_v3, %v1167_v2  ;;  %v2712_v7 = vpop.f32.mrf.mxu1 }
 0x149   : > { %v1137_v60 = vpop.f32.mrf.mxu0 }
 0x14a   : > { %v1168_v9 = vadd.f32 %v1137_v60, %v957_v14  ;;  %v1306_v11 = vpop.f32.mrf.mxu1 }
 0x14b   : > { %v2677_v12 = vpop.f32.mrf.mxu0 }
 0x14c   : > { %v3609_v13 = vadd.f32 %v1306_v11, %v1168_v9  ;;  %v2713_v4 = vpop.f32.mrf.mxu1 }
 0x14d   : > { %v1142_v51 = vpop.f32.mrf.mxu0 }
 0x14e   : > { %v1169_v16 = vadd.f32 %v1142_v51, %v958_v21  ;;  %v1311_v17 = vpop.f32.mrf.mxu1 }
 0x14f   : > { %v2680_v15 = vpop.f32.mrf.mxu0 }
 0x150   : > { %v3611_v20 = vadd.f32 %v1311_v17, %v1169_v16  ;;  %v2716_v10 = vpop.f32.mrf.mxu1 }
 0x151   : > { %v1145_v8 = vpop.f32.mrf.mxu0 }
 0x152   : > { %v1170_v1 = vadd.f32 %v1145_v8, %v959_v25  ;;  %v1314_v19 = vpop.f32.mrf.mxu1 }
 0x153   : > { %v2681_v23 = vpop.f32.mrf.mxu0 }
 0x154   : > { %v3613_v24 = vadd.f32 %v1314_v19, %v1170_v1  ;;  %v2717_v18 = vpop.f32.mrf.mxu1 }
 0x155   : > { %v1150_v14 = vpop.f32.mrf.mxu0 }
 0x156   : > { %v1319_v28 = vpop.f32.mrf.mxu1  ;;  %v1171_v17 = vadd.f32 %v1150_v14, %v3595_v33 }
 0x157   : > { %v2684_v29 = vpop.f32.mrf.mxu0 }
 0x158   : > { %v2720_v30 = vpop.f32.mrf.mxu1  ;;  %v1340_v19 = vadd.f32 %v1319_v28, %v1171_v17 }
 0x159   : > { %v1153_v31 = vpop.f32.mrf.mxu0 }
 0x15a   : > { %v1322_v22 = vpop.f32.mrf.mxu1  ;;  %v1172_v23 = vadd.f32 %v1153_v31, %v3597_v39 }
 0x15b   : > { %v2685_v34 = vpop.f32.mrf.mxu0 }
 0x15c   : > { %v2721_v21 = vpop.f32.mrf.mxu1 }
 0x15d   : > { %v1158_v35 = vpop.f32.mrf.mxu0 }
 0x15e   : > { %v1327_v27 = vpop.f32.mrf.mxu1 }
 0x15f   : > { %v2688_v26 = vpop.f32.mrf.mxu0 }
 0x160   : > { %v2724_v38 = vpop.f32.mrf.mxu1 }
 0x161   : > { %v1161_v40 = vpop.f32.mrf.mxu0  ;;  %v1341_v38 = vadd.f32 %v1322_v22, %v1172_v23  ;;  %v3638_v22 = vld [vmem:[%s3683_s2] ss:$0 sm:$0xff] }
 0x162   : > { %v3615_v41 = vpop.f32.mrf.mxu1 }
 0x163   : > { %v2689_v25 = vpop.f32.mrf.mxu0 }
 0x164   : > { %v2725_v32 = vpop.f32.mrf.mxu1  ;;  %v1173_v25 = vadd.f32 %v1158_v35, %v3599_v46 }
 0x165   : > { %v1498_v43 = vpop.f32.mrf.mxu0 }
 0x166   : > { %v1709_v44 = vpop.f32.mrf.mxu1  ;;  %v1537_v29 = vadd.f32 %v1498_v43, %v3603_v58  ;;  %v1342_v31 = vadd.f32 %v1327_v27, %v1173_v25  ;;  %v1174_v58 = vadd.f32 %v1161_v40, %v3601_v52 }
 0x167   : > { %v2744_v47 = vpop.f32.mrf.mxu0 }
 0x168   : > { %v2780_v37 = vpop.f32.mrf.mxu1  ;;  %v1748_v47 = vadd.f32 %v1709_v44, %v1537_v29  ;;  %v1343_v52 = vadd.f32 %v3615_v41, %v1174_v58 }
 0x169   : > { %v1501_v49 = vpop.f32.mrf.mxu0 }
 0x16a   : > { %v1712_v36 = vpop.f32.mrf.mxu1  ;;  %v1538_v33 = vadd.f32 %v1501_v49, %v3605_v63 }
 0x16b   : > { %v2745_v50 = vpop.f32.mrf.mxu0 }
 0x16c   : > { %v2781_v54 = vpop.f32.mrf.mxu1  ;;  %v1749_v43 = vadd.f32 %v1712_v36, %v1538_v33 }
 0x16d   : > { %v1506_v42 = vpop.f32.mrf.mxu0 }
 0x16e   : > { %v3617_v55 = vpop.f32.mrf.mxu1  ;;  %v1539_v63 = vadd.f32 %v1506_v42, %v3607_v6 }
 0x16f   : > { %v2748_v56 = vpop.f32.mrf.mxu0 }
 0x170   : > { %v2784_v57 = vpop.f32.mrf.mxu1 }
 0x171   : > { %v1509_v59 = vpop.f32.mrf.mxu0 }
 0x172   : > { %v3619_v48 = vpop.f32.mrf.mxu1  ;;  %v1540_v36 = vadd.f32 %v1509_v59, %v3609_v13 }
 0x173   : > { %v2749_v61 = vpop.f32.mrf.mxu0 }
 0x174   : > { %v2785_v45 = vpop.f32.mrf.mxu1 }
 0x175   : > { %v3621_v62 = vpop.f32.mrf.mxu0 }
 0x176   : > { %v3623_v0 = vpop.f32.mrf.mxu1 }
 0x177   : > { %v2752_v53 = vpop.f32.mrf.mxu0 }
 0x178   : > { %v2788_v2 = vpop.f32.mrf.mxu1 }
 0x179   : > { %v3625_v3 = vpop.f32.mrf.mxu0 }
 0x17a   : > { %v3627_v5 = vpop.f32.mrf.mxu1 }
 0x17b   : > { %v2753_v7 = vpop.f32.mrf.mxu0 }
 0x17c   : > { %v2789_v60 = vpop.f32.mrf.mxu1  ;;  %v1750_v7 = vadd.f32 %v3617_v55, %v1539_v63 }
 0x17d   : > { %v1522_v9 = vpop.f32.mrf.mxu0 }
 0x17e   : > { %v1733_v11 = vpop.f32.mrf.mxu1  ;;  %v1543_v34 = vadd.f32 %v1522_v9, %v1340_v19 }
 0x17f   : > { %v2756_v12 = vpop.f32.mrf.mxu0 }
 0x180   : > { %v2792_v4 = vpop.f32.mrf.mxu1  ;;  %v1754_v37 = vadd.f32 %v1733_v11, %v1543_v34 }
 0x181   : > { %v1525_v51 = vpop.f32.mrf.mxu0 }
 0x182   : > { %v1736_v16 = vpop.f32.mrf.mxu1  ;;  %v1544_v50 = vadd.f32 %v1525_v51, %v1341_v38 }
 0x183   : > { %v2757_v15 = vpop.f32.mrf.mxu0 }
 0x184   : > { %v2793_v10 = vpop.f32.mrf.mxu1  ;;  %v1755_v49 = vadd.f32 %v1736_v16, %v1544_v50  ;;  %v1751_v15 = vadd.f32 %v3619_v48, %v1540_v36 }
 0x185   : > { %v1530_v8 = vpop.f32.mrf.mxu0  ;;  %v1541_v10 = vadd.f32 %v3621_v62, %v3611_v20  ;;  %v1542_v20 = vadd.f32 %v3625_v3, %v3613_v24 }
 0x186   : > { %v1741_v1 = vpop.f32.mrf.mxu1  ;;  %v1545_v56 = vadd.f32 %v1530_v8, %v1342_v31 }
 0x187   : > { %v2760_v18 = vpop.f32.mrf.mxu0  ;;  %v1752_v48 = vadd.f32 %v3623_v0, %v1541_v10  ;;  %v1753_v0 = vadd.f32 %v3627_v5, %v1542_v20 }
 0x188   : > { %v2796_v30 = vpop.f32.mrf.mxu1  ;;  %v1756_v60 = vadd.f32 %v1741_v1, %v1545_v56 }
 0x189   : > { %v1533_v21 = vpop.f32.mrf.mxu0 }
 0x18a   : > { %v1744_v26 = vpop.f32.mrf.mxu1  ;;  %v1546_v9 = vadd.f32 %v1533_v21, %v1343_v52 }
 0x18b   : > { %v2761_v32 = vpop.f32.mrf.mxu0 }
 0x18c   : > { %v2797_v14 = vpop.f32.mrf.mxu1  ;;  %v1757_v19 = vadd.f32 %v1744_v26, %v1546_v9 }
 0x18d   : > { %v1878_v28 = vpop.f32.mrf.mxu0 }
 0x18e   : > { %v1917_v54 = vadd.f32 %v1878_v28, %v1748_v47  ;;  %v1902_v39 = vpop.f32.mrf.mxu1 }
 0x18f   : > { %v1923_v46 = vadd.f32 %v1902_v39, %v1754_v37  ;;  %v2816_v35 = vpop.f32.mrf.mxu0 }
 0x190   : > { %v2828_v44 = vpop.f32.mrf.mxu1  ;;  %v1934_v61 = vadd.f32 %v3638_v22, %v1917_v54 }
 0x191   : > { %v1881_v57 = vpop.f32.mrf.mxu0  ;;  %v1940_v40 = vadd.f32 %v3638_v22, %v1923_v46 }
 0x192   : > { %v1918_v27 = vadd.f32 %v1881_v57, %v1749_v43  ;;  %v1905_v45 = vpop.f32.mrf.mxu1  ;;  %v1944_v4 = vmax.f32 %v1934_v61, 0.0 }
 0x193   : > { %v1924_v53 = vadd.f32 %v1905_v45, %v1755_v49  ;;  %v2817_v2 = vpop.f32.mrf.mxu0  ;;  %v1950_v17 = vmax.f32 %v1940_v40, 0.0 }
 0x194   : > { %v1935_v6 = vadd.f32 %v3638_v22, %v1918_v27  ;;  %v2829_v42 = vpop.f32.mrf.mxu1 }
 0x195   : > { %v1941_v11 = vadd.f32 %v3638_v22, %v1924_v53  ;;  %v1886_v12 = vpop.f32.mrf.mxu0 }
 0x196   : > { %v1945_v51 = vmax.f32 %v1935_v6, 0.0  ;;  %v1919_v41 = vadd.f32 %v1886_v12, %v1750_v7  ;;  %v1910_v16 = vpop.f32.mrf.mxu1 }
 0x197   : > { %v1951_v13 = vmax.f32 %v1941_v11, 0.0  ;;  %v1925_v55 = vadd.f32 %v1910_v16, %v1756_v60  ;;  %v2820_v59 = vpop.f32.mrf.mxu0 }
 0x198   : > { %v2367_v8 = vpack.c.bf16 %v1945_v51, %v1944_v4  ;;  %v2832_v1 = vpop.f32.mrf.mxu1  ;;  %v1936_v29 = vadd.f32 %v3638_v22, %v1919_v41 }
 0x199   : > { %v2382_v23 = vpack.c.bf16 %v1951_v13, %v1950_v17  ;;  %v1889_v18 = vpop.f32.mrf.mxu0  ;;  %v1942_v21 = vadd.f32 %v3638_v22, %v1925_v55 }
 0x19a   : > { %2368 = vst [vmem:[%s3652_s7] sm:$0xff] %v2367_v8   ;;  %v1920_v30 = vadd.f32 %v1889_v18, %v1751_v15  ;;  %v1913_v34 = vpop.f32.mrf.mxu1  ;;  %v1946_v33 = vmax.f32 %v1936_v29, 0.0 }
 0x19b   : > { %2391 = vst [vmem:[%s3652_s7 + $0x18] sm:$0xff] %v2382_v23   ;;  %v1926_v38 = vadd.f32 %v1913_v34, %v1757_v19  ;;  %v2821_v25 = vpop.f32.mrf.mxu0  ;;  %v1952_v50 = vmax.f32 %v1942_v21, 0.0 }
 0x19c   : > { %v1937_v62 = vadd.f32 %v3638_v22, %v1920_v30  ;;  %v2833_v26 = vpop.f32.mrf.mxu1 }
 0x19d   : > { %v1943_v32 = vadd.f32 %v3638_v22, %v1926_v38  ;;  %v1894_v47 = vpop.f32.mrf.mxu0 }
 0x19e   : > { %v1947_v14 = vmax.f32 %v1937_v62, 0.0  ;;  %v1921_v37 = vadd.f32 %v1894_v47, %v1752_v48 }
 0x19f   : > { %v1953_v28 = vmax.f32 %v1943_v32, 0.0  ;;  %v2824_v54 = vpop.f32.mrf.mxu0 }
 0x1a0   : > { %v2372_v39 = vpack.c.bf16 %v1947_v14, %v1946_v33  ;;  %v1938_v24 = vadd.f32 %v3638_v22, %v1921_v37 }
 0x1a1   : > { %v2387_v31 = vpack.c.bf16 %v1953_v28, %v1952_v50  ;;  %v1897_v58 = vpop.f32.mrf.mxu0 }
 0x1a2   : > { %2389 = vst [vmem:[%s3652_s7 + $0x8] sm:$0xff] %v2372_v39   ;;  %v1922_v3 = vadd.f32 %v1897_v58, %v1753_v0  ;;  %v1948_v43 = vmax.f32 %v1938_v24, 0.0 }
 0x1a3   : > { %2392 = vst [vmem:[%s3652_s7 + $0x20] sm:$0xff] %v2387_v31   ;;  %v2825_v46 = vpop.f32.mrf.mxu0 }
 0x1a4   : > { %v1939_v35 = vadd.f32 %v3638_v22, %v1922_v3 }
 0x1a6   : > { %v1949_v63 = vmax.f32 %v1939_v35, 0.0 }
 0x1a8   : > { %v2377_v44 = vpack.c.bf16 %v1949_v63, %v1948_v43 }
 0x1aa   : > { %2390 = vst [vmem:[%s3652_s7 + $0x10] sm:$0xff] %v2377_v44  }
 0x1ab PF: > { %s13_s14 = sadd.s32 1, %s2995_s14   ;;  %s3685_s12 = smov %s2991_s13 }
 0x1ac   : > { %p10_p5 = scmp.ge.s32.totalorder %s13_s14, 4   ;;  %s3686_s13 = smov %s3688_s15 }
 0x1ae   :  { %12 = sbr.rel (!%p10_p5) target bundleno = 2 (0x2), region = 76 }

</bundles_post_ra>
